<compile_context>
chip_gen: v7x
topology: tpu7x:2x2x1
jax: 0.10.0
libtpu: 0.0.40
codegen_flags: <defaults>
</compile_context>

<pallas_src>
import numpy as np
import jax
import jax.numpy as jnp
from jax import lax
from jax.experimental import pallas as pl
from jax.experimental.pallas import tpu as pltpu

_B = 8  # samples per grid step (batch block)


# ----------------------------------------------------------------------------
# Fused forward kernel (one grid step == B samples)
# ----------------------------------------------------------------------------
def _lenet_kernel(x_ref, w1t_ref, b1_ref, w2t_ref, b2_ref,
                  f1w_ref, f1b_ref, f2w_ref, f2b_ref, f3w_ref, f3b_ref,
                  out_ref, acc1_ref, p1_ref):
    """Layouts:
      x_ref    : (32*B, 96)    rows = h*B + b, lanes = w*3 + c
      w1t_ref  : (5, 96, 168)  conv1 Toeplitz weights, cols = j*6 + o
      w2t_ref  : (5, 162, 160) conv2 Toeplitz weights, rows = 12*jp + c, cols = j2*16 + o2
      f1w_ref  : (5, 144, 120) fc1 weights per pooled row, rows = 32*iw + o2
      acc1_ref : (28*B, 168)   f32 scratch (conv1 accumulator), rows = i*B + b
      p1_ref   : (14*B, 162)   f32 scratch (pool1), valid lanes 12*jp + c
      out_ref  : (B, 2)
    """
    # ---- conv1: 5 accumulated matmuls over row-shifted, lane-dense input slabs ------
    acc1_ref[...] = jnp.dot(x_ref[pl.ds(0, 28 * _B), :], w1t_ref[0],
                            preferred_element_type=jnp.float32)
    for di in range(1, 5):
        acc1_ref[...] += jnp.dot(x_ref[pl.ds(di * _B, 28 * _B), :], w1t_ref[di],
                                 preferred_element_type=jnp.float32)
    c1 = jnp.maximum(acc1_ref[...] + b1_ref[...], 0.0)        # (28B, 168), col = j*6+o

    # ---- maxpool1 2x2 (full-block) ----------------------------------------------------
    c1 = c1.reshape(14, 2, _B, 168)                            # tile-aligned row split
    v1 = jnp.maximum(c1[:, 0], c1[:, 1])                       # (14, B, 168) vertical max
    p1 = jnp.maximum(v1[:, :, 0:162], v1[:, :, 6:168])         # horizontal max; valid @ 12*jp+c
    p1_ref[...] = p1.reshape(14 * _B, 162)

    # ---- conv2: 5 accumulated matmuls (zero weight rows kill the garbage lanes) ------
    acc2 = jnp.dot(p1_ref[pl.ds(0, 10 * _B), :], w2t_ref[0],
                   preferred_element_type=jnp.float32)
    for di in range(1, 5):
        acc2 = acc2 + jnp.dot(p1_ref[pl.ds(di * _B, 10 * _B), :], w2t_ref[di],
                              preferred_element_type=jnp.float32)
    c2 = jnp.maximum(acc2 + b2_ref[...], 0.0)                  # (10B, 160), col = j2*16+o2

    # ---- maxpool2 2x2 -----------------------------------------------------------------
    c2 = c2.reshape(5, 2, _B, 160)
    v2 = jnp.maximum(c2[:, 0], c2[:, 1])                       # (5, B, 160)
    p2 = jnp.maximum(v2[:, :, 0:144], v2[:, :, 16:160])        # (5, B, 144); valid @ 32*jp2+o2

    # ---- fc1 (flatten folded into weights) -> relu -> fc2 -> relu -> fc3 --------------
    h = jnp.dot(p2[0], f1w_ref[0], preferred_element_type=jnp.float32)
    for ih in range(1, 5):
        h = h + jnp.dot(p2[ih], f1w_ref[ih], preferred_element_type=jnp.float32)
    h1 = jnp.maximum(h + f1b_ref[...], 0.0)                    # (B, 120)
    h2 = jnp.maximum(jnp.dot(h1, f2w_ref[...], preferred_element_type=jnp.float32)
                     + f2b_ref[...], 0.0)                      # (B, 84)
    out_ref[...] = (jnp.dot(h2, f3w_ref[...], preferred_element_type=jnp.float32)
                    + f3b_ref[...])                            # (B, 2)


# ----------------------------------------------------------------------------
# Parameters: PyTorch-layout init + one-time kernel-layout preparation
# ----------------------------------------------------------------------------
def init_params(key):
    def uni(k, shape, fan_in):
        bound = 1.0 / jnp.sqrt(jnp.float32(fan_in))
        return jax.random.uniform(k, shape, jnp.float32, -bound, bound)

    ks = jax.random.split(key, 10)
    return {
        "conv1_w": uni(ks[0], (6, 3, 5, 5), 3 * 5 * 5),
        "conv1_b": uni(ks[1], (6,), 3 * 5 * 5),
        "conv2_w": uni(ks[2], (16, 6, 5, 5), 6 * 5 * 5),
        "conv2_b": uni(ks[3], (16,), 6 * 5 * 5),
        "fc1_w": uni(ks[4], (120, 400), 400),
        "fc1_b": uni(ks[5], (120,), 400),
        "fc2_w": uni(ks[6], (84, 120), 120),
        "fc2_b": uni(ks[7], (84,), 120),
        "fc3_w": uni(ks[8], (2, 84), 84),
        "fc3_b": uni(ks[9], (2,), 84),
    }


def prepare_params(params):
    """One-time host-side re-layout of torch-style weights into the kernel's layouts."""
    w1 = np.asarray(params["conv1_w"], np.float32)   # (6, 3, 5, 5)  (O, C, kh, kw)
    w2 = np.asarray(params["conv2_w"], np.float32)   # (16, 6, 5, 5)
    f1 = np.asarray(params["fc1_w"], np.float32)     # (120, 400)

    # conv1 Toeplitz: out[(i,b), j*6+o] = sum_di x[(i+di)*B+b, w*3+c] * w1t[di, w*3+c, j*6+o]
    w1t = np.zeros((5, 96, 168), np.float32)
    for di in range(5):
        for j in range(28):
            for dj in range(5):
                w_in = j + dj
                w1t[di, w_in * 3:w_in * 3 + 3, j * 6:j * 6 + 6] = w1[:, :, di, dj].T

    # conv2 Toeplitz on the un-compacted pool1 layout (rows 12*jp + c); rows 12*jp+6..11
    # stay zero so the garbage lanes left by the horizontal pool never contribute.
    w2t = np.zeros((5, 162, 160), np.float32)
    for di in range(5):
        for j2 in range(10):
            for dj in range(5):
                jp = j2 + dj
                w2t[di, 12 * jp:12 * jp + 6, j2 * 16:j2 * 16 + 16] = w2[:, :, di, dj].T

    # fc1 per pooled row ih: rows 32*iw + o2 (rows 32*iw+16..31 stay zero), matching
    # torch's view(-1, 400) order flat_idx = o2*25 + ih*5 + iw.
    f1r = f1.reshape(120, 16, 5, 5)                  # (n, o2, ih, iw)
    f1w = np.zeros((5, 144, 120), np.float32)
    for ih in range(5):
        for iw in range(5):
            f1w[ih, 32 * iw:32 * iw + 16, :] = f1r[:, :, ih, iw].T

    b1r = np.tile(np.asarray(params["conv1_b"], np.float32), 28).reshape(1, 168)
    b2r = np.tile(np.asarray(params["conv2_b"], np.float32), 10).reshape(1, 160)

    return {
        "w1t": jnp.asarray(w1t), "b1r": jnp.asarray(b1r),
        "w2t": jnp.asarray(w2t), "b2r": jnp.asarray(b2r),
        "f1w": jnp.asarray(f1w),
        "f1b": jnp.asarray(params["fc1_b"]).reshape(1, 120),
        "f2w": jnp.asarray(params["fc2_w"]).T,
        "f2b": jnp.asarray(params["fc2_b"]).reshape(1, 84),
        "f3w": jnp.asarray(params["fc3_w"]).T,
        "f3b": jnp.asarray(params["fc3_b"]).reshape(1, 2),
    }


# ----------------------------------------------------------------------------
# Forward: one pallas_call for the whole network
# ----------------------------------------------------------------------------
@jax.jit
def net_forward(prepped, x_nchw):
    n = x_nchw.shape[0]
    g = (n + _B - 1) // _B
    n_pad = g * _B
    x = x_nchw.astype(jnp.float32)
    if n_pad != n:                                   # pad batch to a multiple of B
        x = jnp.pad(x, ((0, n_pad - n), (0, 0), (0, 0), (0, 0)))

    # (n,3,32,32) NCHW -> 2D (g*32*B, 96): rows ordered (block, h, b), lanes = w*3 + c.
    x = jnp.transpose(x, (0, 2, 3, 1)).reshape(g, _B, 32, 96)
    x = jnp.transpose(x, (0, 2, 1, 3)).reshape(g * 32 * _B, 96)

    def rep(a):  # whole-array, grid-invariant VMEM block (weights / biases)
        nd = a.ndim
        return pl.BlockSpec(a.shape, lambda i, nd=nd: (0,) * nd)

    out = pl.pallas_call(
        _lenet_kernel,
        out_shape=jax.ShapeDtypeStruct((n_pad, 2), jnp.float32),
        grid=(g,),
        in_specs=[
            pl.BlockSpec((32 * _B, 96), lambda i: (i, 0)),
            rep(prepped["w1t"]), rep(prepped["b1r"]),
            rep(prepped["w2t"]), rep(prepped["b2r"]),
            rep(prepped["f1w"]), rep(prepped["f1b"]),
            rep(prepped["f2w"]), rep(prepped["f2b"]),
            rep(prepped["f3w"]), rep(prepped["f3b"]),
        ],
        out_specs=pl.BlockSpec((_B, 2), lambda i: (i, 0)),
        scratch_shapes=[
            pltpu.VMEM((28 * _B, 168), jnp.float32),   # conv1 accumulator
            pltpu.VMEM((14 * _B, 162), jnp.float32),   # pool1 output
        ],
        compiler_params=pltpu.CompilerParams(dimension_semantics=("parallel",)),
    )(x, prepped["w1t"], prepped["b1r"], prepped["w2t"], prepped["b2r"],
      prepped["f1w"], prepped["f1b"], prepped["f2w"], prepped["f2b"],
      prepped["f3w"], prepped["f3b"])
    return out[:n]


# ----------------------------------------------------------------------------
# Pure-XLA reference (matches the PyTorch forward) for a correctness check
# ----------------------------------------------------------------------------
def reference_forward(params, x_nchw):
    dn = ("NCHW", "OIHW", "NCHW")
    y = lax.conv_general_dilated(x_nchw, params["conv1_w"], (1, 1), "VALID",
                                 dimension_numbers=dn)
    y = jnp.maximum(y + params["conv1_b"].reshape(1, -1, 1, 1), 0.0)
    y = lax.reduce_window(y, -jnp.inf, lax.max, (1, 1, 2, 2), (1, 1, 2, 2), "VALID")
    y = lax.conv_general_dilated(y, params["conv2_w"], (1, 1), "VALID",
                                 dimension_numbers=dn)
    y = jnp.maximum(y + params["conv2_b"].reshape(1, -1, 1, 1), 0.0)
    y = lax.reduce_window(y, -jnp.inf, lax.max, (1, 1, 2, 2), (1, 1, 2, 2), "VALID")
    y = y.reshape(y.shape[0], 16 * 5 * 5)                        # torch's view(-1, 400)
    y = jnp.maximum(y @ params["fc1_w"].T + params["fc1_b"], 0.0)
    y = jnp.maximum(y @ params["fc2_w"].T + params["fc2_b"], 0.0)
    return y @ params["fc3_w"].T + params["fc3_b"]


if __name__ == "__main__":
    key = jax.random.PRNGKey(0)
    k_params, k_x = jax.random.split(key)
    params = init_params(k_params)
    prepped = prepare_params(params)                      # one-time weight re-layout
    # batch=16 -> 2 grid steps of B=8, so both v7x TensorCores get work.
    x = jax.random.normal(k_x, (16, 3, 32, 32), dtype=jnp.float32)  # NCHW like PyTorch

    out = jax.block_until_ready(net_forward(prepped, x))
    assert out.shape == (16, 2) and out.dtype == jnp.float32

    ref = jax.block_until_ready(reference_forward(params, x))
    assert jnp.allclose(out, ref, atol=1e-4, rtol=1e-4), (out, ref)
    print("KERNEL_OK")
</pallas_src>

<mosaic_0001>
module attributes {stable_mosaic.version = 11 : i64} {
  func.func @_lenet_kernel(%arg0: i32, %arg1: memref<256x96xf32, #tpu.memory_space<vmem>>, %arg2: memref<5x96x168xf32, #tpu.memory_space<vmem>>, %arg3: memref<1x168xf32, #tpu.memory_space<vmem>>, %arg4: memref<5x162x160xf32, #tpu.memory_space<vmem>>, %arg5: memref<1x160xf32, #tpu.memory_space<vmem>>, %arg6: memref<5x144x120xf32, #tpu.memory_space<vmem>>, %arg7: memref<1x120xf32, #tpu.memory_space<vmem>>, %arg8: memref<120x84xf32, #tpu.memory_space<vmem>>, %arg9: memref<1x84xf32, #tpu.memory_space<vmem>>, %arg10: memref<84x2xf32, #tpu.memory_space<vmem>>, %arg11: memref<1x2xf32, #tpu.memory_space<vmem>>, %arg12: memref<8x2xf32, #tpu.memory_space<vmem>>, %arg13: memref<224x168xf32, #tpu.memory_space<vmem>>, %arg14: memref<112x162xf32, #tpu.memory_space<vmem>>) attributes {dimension_semantics = [#tpu.dimension_semantics<parallel>], iteration_bounds = array<i64: 2>, scalar_prefetch = 0 : i64, scratch_operands = 2 : i64, tpu.core_type = #tpu.core_type<tc>, window_params = [{transform_indices = @transform_0, window_bounds = array<i64: 256, 96>}, {pipeline_mode = #tpu.pipeline_mode<synchronous>, transform_indices = @transform_1, window_bounds = array<i64: 5, 96, 168>}, {pipeline_mode = #tpu.pipeline_mode<synchronous>, transform_indices = @transform_2, window_bounds = array<i64: 1, 168>}, {pipeline_mode = #tpu.pipeline_mode<synchronous>, transform_indices = @transform_3, window_bounds = array<i64: 5, 162, 160>}, {pipeline_mode = #tpu.pipeline_mode<synchronous>, transform_indices = @transform_4, window_bounds = array<i64: 1, 160>}, {pipeline_mode = #tpu.pipeline_mode<synchronous>, transform_indices = @transform_5, window_bounds = array<i64: 5, 144, 120>}, {pipeline_mode = #tpu.pipeline_mode<synchronous>, transform_indices = @transform_6, window_bounds = array<i64: 1, 120>}, {pipeline_mode = #tpu.pipeline_mode<synchronous>, transform_indices = @transform_7, window_bounds = array<i64: 120, 84>}, {pipeline_mode = #tpu.pipeline_mode<synchronous>, transform_indices = @transform_8, window_bounds = array<i64: 1, 84>}, {pipeline_mode = #tpu.pipeline_mode<synchronous>, transform_indices = @transform_9, window_bounds = array<i64: 84, 2>}, {pipeline_mode = #tpu.pipeline_mode<synchronous>, transform_indices = @transform_10, window_bounds = array<i64: 1, 2>}, {transform_indices = @transform_11, window_bounds = array<i64: 8, 2>}]} {
    %c0 = arith.constant 0 : index
    %c0_0 = arith.constant 0 : index
    %0 = vector.load %arg1[%c0, %c0_0] : memref<256x96xf32, #tpu.memory_space<vmem>>, vector<224x96xf32>
    %c0_1 = arith.constant 0 : index
    %c0_2 = arith.constant 0 : index
    %c0_3 = arith.constant 0 : index
    %1 = vector.load %arg2[%c0_1, %c0_2, %c0_3] : memref<5x96x168xf32, #tpu.memory_space<vmem>>, vector<1x96x168xf32>
    %2 = vector.shape_cast %1 : vector<1x96x168xf32> to vector<96x168xf32>
    %cst = arith.constant dense<0.000000e+00> : vector<224x168xf32>
    %3 = tpu.matmul %0, %2, %cst {dimension_numbers = #tpu.dot_dimension_numbers<[1], [0], [0], [1], [0, 0, 1, 1], [], []>} : vector<224x96xf32>, vector<96x168xf32>, vector<224x168xf32> -> vector<224x168xf32>
    %c0_4 = arith.constant 0 : index
    %c0_5 = arith.constant 0 : index
    %4 = vector.load %arg13[%c0_4, %c0_5] : memref<224x168xf32, #tpu.memory_space<vmem>>, vector<224x168xf32>
    tpu.vector_store %arg13[%c0_4, %c0_5], %3 {strides = array<i32>} : memref<224x168xf32, #tpu.memory_space<vmem>>, vector<224x168xf32>,
    %c0_6 = arith.constant 0 : index
    %c0_7 = arith.constant 0 : index
    %5 = vector.load %arg13[%c0_6, %c0_7] : memref<224x168xf32, #tpu.memory_space<vmem>>, vector<224x168xf32>
    %c8 = arith.constant 8 : index
    %c0_8 = arith.constant 0 : index
    %6 = vector.load %arg1[%c8, %c0_8] : memref<256x96xf32, #tpu.memory_space<vmem>>, vector<224x96xf32>
    %c1 = arith.constant 1 : index
    %c0_9 = arith.constant 0 : index
    %c0_10 = arith.constant 0 : index
    %7 = vector.load %arg2[%c1, %c0_9, %c0_10] : memref<5x96x168xf32, #tpu.memory_space<vmem>>, vector<1x96x168xf32>
    %8 = vector.shape_cast %7 : vector<1x96x168xf32> to vector<96x168xf32>
    %cst_11 = arith.constant dense<0.000000e+00> : vector<224x168xf32>
    %9 = tpu.matmul %6, %8, %cst_11 {dimension_numbers = #tpu.dot_dimension_numbers<[1], [0], [0], [1], [0, 0, 1, 1], [], []>} : vector<224x96xf32>, vector<96x168xf32>, vector<224x168xf32> -> vector<224x168xf32>
    %10 = arith.addf %5, %9 : vector<224x168xf32>
    %c0_12 = arith.constant 0 : index
    %c0_13 = arith.constant 0 : index
    %11 = vector.load %arg13[%c0_12, %c0_13] : memref<224x168xf32, #tpu.memory_space<vmem>>, vector<224x168xf32>
    tpu.vector_store %arg13[%c0_12, %c0_13], %10 {strides = array<i32>} : memref<224x168xf32, #tpu.memory_space<vmem>>, vector<224x168xf32>,
    %c0_14 = arith.constant 0 : index
    %c0_15 = arith.constant 0 : index
    %12 = vector.load %arg13[%c0_14, %c0_15] : memref<224x168xf32, #tpu.memory_space<vmem>>, vector<224x168xf32>
    %c16 = arith.constant 16 : index
    %c0_16 = arith.constant 0 : index
    %13 = vector.load %arg1[%c16, %c0_16] : memref<256x96xf32, #tpu.memory_space<vmem>>, vector<224x96xf32>
    %c2 = arith.constant 2 : index
    %c0_17 = arith.constant 0 : index
    %c0_18 = arith.constant 0 : index
    %14 = vector.load %arg2[%c2, %c0_17, %c0_18] : memref<5x96x168xf32, #tpu.memory_space<vmem>>, vector<1x96x168xf32>
    %15 = vector.shape_cast %14 : vector<1x96x168xf32> to vector<96x168xf32>
    %cst_19 = arith.constant dense<0.000000e+00> : vector<224x168xf32>
    %16 = tpu.matmul %13, %15, %cst_19 {dimension_numbers = #tpu.dot_dimension_numbers<[1], [0], [0], [1], [0, 0, 1, 1], [], []>} : vector<224x96xf32>, vector<96x168xf32>, vector<224x168xf32> -> vector<224x168xf32>
    %17 = arith.addf %12, %16 : vector<224x168xf32>
    %c0_20 = arith.constant 0 : index
    %c0_21 = arith.constant 0 : index
    %18 = vector.load %arg13[%c0_20, %c0_21] : memref<224x168xf32, #tpu.memory_space<vmem>>, vector<224x168xf32>
    tpu.vector_store %arg13[%c0_20, %c0_21], %17 {strides = array<i32>} : memref<224x168xf32, #tpu.memory_space<vmem>>, vector<224x168xf32>,
    %c0_22 = arith.constant 0 : index
    %c0_23 = arith.constant 0 : index
    %19 = vector.load %arg13[%c0_22, %c0_23] : memref<224x168xf32, #tpu.memory_space<vmem>>, vector<224x168xf32>
    %c24 = arith.constant 24 : index
    %c0_24 = arith.constant 0 : index
    %20 = vector.load %arg1[%c24, %c0_24] : memref<256x96xf32, #tpu.memory_space<vmem>>, vector<224x96xf32>
    %c3 = arith.constant 3 : index
    %c0_25 = arith.constant 0 : index
    %c0_26 = arith.constant 0 : index
    %21 = vector.load %arg2[%c3, %c0_25, %c0_26] : memref<5x96x168xf32, #tpu.memory_space<vmem>>, vector<1x96x168xf32>
    %22 = vector.shape_cast %21 : vector<1x96x168xf32> to vector<96x168xf32>
    %cst_27 = arith.constant dense<0.000000e+00> : vector<224x168xf32>
    %23 = tpu.matmul %20, %22, %cst_27 {dimension_numbers = #tpu.dot_dimension_numbers<[1], [0], [0], [1], [0, 0, 1, 1], [], []>} : vector<224x96xf32>, vector<96x168xf32>, vector<224x168xf32> -> vector<224x168xf32>
    %24 = arith.addf %19, %23 : vector<224x168xf32>
    %c0_28 = arith.constant 0 : index
    %c0_29 = arith.constant 0 : index
    %25 = vector.load %arg13[%c0_28, %c0_29] : memref<224x168xf32, #tpu.memory_space<vmem>>, vector<224x168xf32>
    tpu.vector_store %arg13[%c0_28, %c0_29], %24 {strides = array<i32>} : memref<224x168xf32, #tpu.memory_space<vmem>>, vector<224x168xf32>,
    %c0_30 = arith.constant 0 : index
    %c0_31 = arith.constant 0 : index
    %26 = vector.load %arg13[%c0_30, %c0_31] : memref<224x168xf32, #tpu.memory_space<vmem>>, vector<224x168xf32>
    %c32 = arith.constant 32 : index
    %c0_32 = arith.constant 0 : index
    %27 = vector.load %arg1[%c32, %c0_32] : memref<256x96xf32, #tpu.memory_space<vmem>>, vector<224x96xf32>
    %c4 = arith.constant 4 : index
    %c0_33 = arith.constant 0 : index
    %c0_34 = arith.constant 0 : index
    %28 = vector.load %arg2[%c4, %c0_33, %c0_34] : memref<5x96x168xf32, #tpu.memory_space<vmem>>, vector<1x96x168xf32>
    %29 = vector.shape_cast %28 : vector<1x96x168xf32> to vector<96x168xf32>
    %cst_35 = arith.constant dense<0.000000e+00> : vector<224x168xf32>
    %30 = tpu.matmul %27, %29, %cst_35 {dimension_numbers = #tpu.dot_dimension_numbers<[1], [0], [0], [1], [0, 0, 1, 1], [], []>} : vector<224x96xf32>, vector<96x168xf32>, vector<224x168xf32> -> vector<224x168xf32>
    %31 = arith.addf %26, %30 : vector<224x168xf32>
    %c0_36 = arith.constant 0 : index
    %c0_37 = arith.constant 0 : index
    %32 = vector.load %arg13[%c0_36, %c0_37] : memref<224x168xf32, #tpu.memory_space<vmem>>, vector<224x168xf32>
    tpu.vector_store %arg13[%c0_36, %c0_37], %31 {strides = array<i32>} : memref<224x168xf32, #tpu.memory_space<vmem>>, vector<224x168xf32>,
    %c0_38 = arith.constant 0 : index
    %c0_39 = arith.constant 0 : index
    %33 = vector.load %arg13[%c0_38, %c0_39] : memref<224x168xf32, #tpu.memory_space<vmem>>, vector<224x168xf32>
    %c0_40 = arith.constant 0 : index
    %c0_41 = arith.constant 0 : index
    %34 = vector.load %arg3[%c0_40, %c0_41] : memref<1x168xf32, #tpu.memory_space<vmem>>, vector<1x168xf32>
    %35 = vector.broadcast %34 : vector<1x168xf32> to vector<224x168xf32>
    %36 = arith.addf %33, %35 : vector<224x168xf32>
    %cst_42 = arith.constant 0.000000e+00 : f32
    %37 = vector.broadcast %cst_42 : f32 to vector<224x168xf32>
    %38 = arith.maximumf %36, %37 : vector<224x168xf32>
    %39 = vector.shape_cast %38 : vector<224x168xf32> to vector<14x2x8x168xf32>
    %40 = vector.extract_strided_slice %39 {offsets = [0, 0, 0, 0], sizes = [14, 1, 8, 168], strides = [1, 1, 1, 1]} : vector<14x2x8x168xf32> to vector<14x1x8x168xf32>
    %41 = vector.shape_cast %40 : vector<14x1x8x168xf32> to vector<14x8x168xf32>
    %42 = vector.extract_strided_slice %39 {offsets = [0, 1, 0, 0], sizes = [14, 1, 8, 168], strides = [1, 1, 1, 1]} : vector<14x2x8x168xf32> to vector<14x1x8x168xf32>
    %43 = vector.shape_cast %42 : vector<14x1x8x168xf32> to vector<14x8x168xf32>
    %44 = arith.maximumf %41, %43 : vector<14x8x168xf32>
    %45 = vector.extract_strided_slice %44 {offsets = [0, 0, 0], sizes = [14, 8, 162], strides = [1, 1, 1]} : vector<14x8x168xf32> to vector<14x8x162xf32>
    %46 = vector.extract_strided_slice %44 {offsets = [0, 0, 6], sizes = [14, 8, 162], strides = [1, 1, 1]} : vector<14x8x168xf32> to vector<14x8x162xf32>
    %47 = arith.maximumf %45, %46 : vector<14x8x162xf32>
    %48 = vector.shape_cast %47 : vector<14x8x162xf32> to vector<112x162xf32>
    %c0_43 = arith.constant 0 : index
    %c0_44 = arith.constant 0 : index
    %49 = vector.load %arg14[%c0_43, %c0_44] : memref<112x162xf32, #tpu.memory_space<vmem>>, vector<112x162xf32>
    tpu.vector_store %arg14[%c0_43, %c0_44], %48 {strides = array<i32>} : memref<112x162xf32, #tpu.memory_space<vmem>>, vector<112x162xf32>,
    %c0_45 = arith.constant 0 : index
    %c0_46 = arith.constant 0 : index
    %50 = vector.load %arg14[%c0_45, %c0_46] : memref<112x162xf32, #tpu.memory_space<vmem>>, vector<80x162xf32>
    %c0_47 = arith.constant 0 : index
    %c0_48 = arith.constant 0 : index
    %c0_49 = arith.constant 0 : index
    %51 = vector.load %arg4[%c0_47, %c0_48, %c0_49] : memref<5x162x160xf32, #tpu.memory_space<vmem>>, vector<1x162x160xf32>
    %52 = vector.shape_cast %51 : vector<1x162x160xf32> to vector<162x160xf32>
    %cst_50 = arith.constant dense<0.000000e+00> : vector<80x160xf32>
    %53 = tpu.matmul %50, %52, %cst_50 {dimension_numbers = #tpu.dot_dimension_numbers<[1], [0], [0], [1], [0, 0, 1, 1], [], []>} : vector<80x162xf32>, vector<162x160xf32>, vector<80x160xf32> -> vector<80x160xf32>
    %c8_51 = arith.constant 8 : index
    %c0_52 = arith.constant 0 : index
    %54 = vector.load %arg14[%c8_51, %c0_52] : memref<112x162xf32, #tpu.memory_space<vmem>>, vector<80x162xf32>
    %c1_53 = arith.constant 1 : index
    %c0_54 = arith.constant 0 : index
    %c0_55 = arith.constant 0 : index
    %55 = vector.load %arg4[%c1_53, %c0_54, %c0_55] : memref<5x162x160xf32, #tpu.memory_space<vmem>>, vector<1x162x160xf32>
    %56 = vector.shape_cast %55 : vector<1x162x160xf32> to vector<162x160xf32>
    %cst_56 = arith.constant dense<0.000000e+00> : vector<80x160xf32>
    %57 = tpu.matmul %54, %56, %cst_56 {dimension_numbers = #tpu.dot_dimension_numbers<[1], [0], [0], [1], [0, 0, 1, 1], [], []>} : vector<80x162xf32>, vector<162x160xf32>, vector<80x160xf32> -> vector<80x160xf32>
    %58 = arith.addf %53, %57 : vector<80x160xf32>
    %c16_57 = arith.constant 16 : index
    %c0_58 = arith.constant 0 : index
    %59 = vector.load %arg14[%c16_57, %c0_58] : memref<112x162xf32, #tpu.memory_space<vmem>>, vector<80x162xf32>
    %c2_59 = arith.constant 2 : index
    %c0_60 = arith.constant 0 : index
    %c0_61 = arith.constant 0 : index
    %60 = vector.load %arg4[%c2_59, %c0_60, %c0_61] : memref<5x162x160xf32, #tpu.memory_space<vmem>>, vector<1x162x160xf32>
    %61 = vector.shape_cast %60 : vector<1x162x160xf32> to vector<162x160xf32>
    %cst_62 = arith.constant dense<0.000000e+00> : vector<80x160xf32>
    %62 = tpu.matmul %59, %61, %cst_62 {dimension_numbers = #tpu.dot_dimension_numbers<[1], [0], [0], [1], [0, 0, 1, 1], [], []>} : vector<80x162xf32>, vector<162x160xf32>, vector<80x160xf32> -> vector<80x160xf32>
    %63 = arith.addf %58, %62 : vector<80x160xf32>
    %c24_63 = arith.constant 24 : index
    %c0_64 = arith.constant 0 : index
    %64 = vector.load %arg14[%c24_63, %c0_64] : memref<112x162xf32, #tpu.memory_space<vmem>>, vector<80x162xf32>
    %c3_65 = arith.constant 3 : index
    %c0_66 = arith.constant 0 : index
    %c0_67 = arith.constant 0 : index
    %65 = vector.load %arg4[%c3_65, %c0_66, %c0_67] : memref<5x162x160xf32, #tpu.memory_space<vmem>>, vector<1x162x160xf32>
    %66 = vector.shape_cast %65 : vector<1x162x160xf32> to vector<162x160xf32>
    %cst_68 = arith.constant dense<0.000000e+00> : vector<80x160xf32>
    %67 = tpu.matmul %64, %66, %cst_68 {dimension_numbers = #tpu.dot_dimension_numbers<[1], [0], [0], [1], [0, 0, 1, 1], [], []>} : vector<80x162xf32>, vector<162x160xf32>, vector<80x160xf32> -> vector<80x160xf32>
    %68 = arith.addf %63, %67 : vector<80x160xf32>
    %c32_69 = arith.constant 32 : index
    %c0_70 = arith.constant 0 : index
    %69 = vector.load %arg14[%c32_69, %c0_70] : memref<112x162xf32, #tpu.memory_space<vmem>>, vector<80x162xf32>
    %c4_71 = arith.constant 4 : index
    %c0_72 = arith.constant 0 : index
    %c0_73 = arith.constant 0 : index
    %70 = vector.load %arg4[%c4_71, %c0_72, %c0_73] : memref<5x162x160xf32, #tpu.memory_space<vmem>>, vector<1x162x160xf32>
    %71 = vector.shape_cast %70 : vector<1x162x160xf32> to vector<162x160xf32>
    %cst_74 = arith.constant dense<0.000000e+00> : vector<80x160xf32>
    %72 = tpu.matmul %69, %71, %cst_74 {dimension_numbers = #tpu.dot_dimension_numbers<[1], [0], [0], [1], [0, 0, 1, 1], [], []>} : vector<80x162xf32>, vector<162x160xf32>, vector<80x160xf32> -> vector<80x160xf32>
    %73 = arith.addf %68, %72 : vector<80x160xf32>
    %c0_75 = arith.constant 0 : index
    %c0_76 = arith.constant 0 : index
    %74 = vector.load %arg5[%c0_75, %c0_76] : memref<1x160xf32, #tpu.memory_space<vmem>>, vector<1x160xf32>
    %75 = vector.broadcast %74 : vector<1x160xf32> to vector<80x160xf32>
    %76 = arith.addf %73, %75 : vector<80x160xf32>
    %cst_77 = arith.constant 0.000000e+00 : f32
    %77 = vector.broadcast %cst_77 : f32 to vector<80x160xf32>
    %78 = arith.maximumf %76, %77 : vector<80x160xf32>
    %79 = vector.shape_cast %78 : vector<80x160xf32> to vector<5x2x8x160xf32>
    %80 = vector.extract_strided_slice %79 {offsets = [0, 0, 0, 0], sizes = [5, 1, 8, 160], strides = [1, 1, 1, 1]} : vector<5x2x8x160xf32> to vector<5x1x8x160xf32>
    %81 = vector.shape_cast %80 : vector<5x1x8x160xf32> to vector<5x8x160xf32>
    %82 = vector.extract_strided_slice %79 {offsets = [0, 1, 0, 0], sizes = [5, 1, 8, 160], strides = [1, 1, 1, 1]} : vector<5x2x8x160xf32> to vector<5x1x8x160xf32>
    %83 = vector.shape_cast %82 : vector<5x1x8x160xf32> to vector<5x8x160xf32>
    %84 = arith.maximumf %81, %83 : vector<5x8x160xf32>
    %85 = vector.extract_strided_slice %84 {offsets = [0, 0, 0], sizes = [5, 8, 144], strides = [1, 1, 1]} : vector<5x8x160xf32> to vector<5x8x144xf32>
    %86 = vector.extract_strided_slice %84 {offsets = [0, 0, 16], sizes = [5, 8, 144], strides = [1, 1, 1]} : vector<5x8x160xf32> to vector<5x8x144xf32>
    %87 = arith.maximumf %85, %86 : vector<5x8x144xf32>
    %88 = vector.extract_strided_slice %87 {offsets = [0, 0, 0], sizes = [1, 8, 144], strides = [1, 1, 1]} : vector<5x8x144xf32> to vector<1x8x144xf32>
    %89 = vector.shape_cast %88 : vector<1x8x144xf32> to vector<8x144xf32>
    %c0_78 = arith.constant 0 : index
    %c0_79 = arith.constant 0 : index
    %c0_80 = arith.constant 0 : index
    %90 = vector.load %arg6[%c0_78, %c0_79, %c0_80] : memref<5x144x120xf32, #tpu.memory_space<vmem>>, vector<1x144x120xf32>
    %91 = vector.shape_cast %90 : vector<1x144x120xf32> to vector<144x120xf32>
    %cst_81 = arith.constant dense<0.000000e+00> : vector<8x120xf32>
    %92 = tpu.matmul %89, %91, %cst_81 {dimension_numbers = #tpu.dot_dimension_numbers<[1], [0], [0], [1], [0, 0, 1, 1], [], []>} : vector<8x144xf32>, vector<144x120xf32>, vector<8x120xf32> -> vector<8x120xf32>
    %93 = vector.extract_strided_slice %87 {offsets = [1, 0, 0], sizes = [1, 8, 144], strides = [1, 1, 1]} : vector<5x8x144xf32> to vector<1x8x144xf32>
    %94 = vector.shape_cast %93 : vector<1x8x144xf32> to vector<8x144xf32>
    %c1_82 = arith.constant 1 : index
    %c0_83 = arith.constant 0 : index
    %c0_84 = arith.constant 0 : index
    %95 = vector.load %arg6[%c1_82, %c0_83, %c0_84] : memref<5x144x120xf32, #tpu.memory_space<vmem>>, vector<1x144x120xf32>
    %96 = vector.shape_cast %95 : vector<1x144x120xf32> to vector<144x120xf32>
    %cst_85 = arith.constant dense<0.000000e+00> : vector<8x120xf32>
    %97 = tpu.matmul %94, %96, %cst_85 {dimension_numbers = #tpu.dot_dimension_numbers<[1], [0], [0], [1], [0, 0, 1, 1], [], []>} : vector<8x144xf32>, vector<144x120xf32>, vector<8x120xf32> -> vector<8x120xf32>
    %98 = arith.addf %92, %97 : vector<8x120xf32>
    %99 = vector.extract_strided_slice %87 {offsets = [2, 0, 0], sizes = [1, 8, 144], strides = [1, 1, 1]} : vector<5x8x144xf32> to vector<1x8x144xf32>
    %100 = vector.shape_cast %99 : vector<1x8x144xf32> to vector<8x144xf32>
    %c2_86 = arith.constant 2 : index
    %c0_87 = arith.constant 0 : index
    %c0_88 = arith.constant 0 : index
    %101 = vector.load %arg6[%c2_86, %c0_87, %c0_88] : memref<5x144x120xf32, #tpu.memory_space<vmem>>, vector<1x144x120xf32>
    %102 = vector.shape_cast %101 : vector<1x144x120xf32> to vector<144x120xf32>
    %cst_89 = arith.constant dense<0.000000e+00> : vector<8x120xf32>
    %103 = tpu.matmul %100, %102, %cst_89 {dimension_numbers = #tpu.dot_dimension_numbers<[1], [0], [0], [1], [0, 0, 1, 1], [], []>} : vector<8x144xf32>, vector<144x120xf32>, vector<8x120xf32> -> vector<8x120xf32>
    %104 = arith.addf %98, %103 : vector<8x120xf32>
    %105 = vector.extract_strided_slice %87 {offsets = [3, 0, 0], sizes = [1, 8, 144], strides = [1, 1, 1]} : vector<5x8x144xf32> to vector<1x8x144xf32>
    %106 = vector.shape_cast %105 : vector<1x8x144xf32> to vector<8x144xf32>
    %c3_90 = arith.constant 3 : index
    %c0_91 = arith.constant 0 : index
    %c0_92 = arith.constant 0 : index
    %107 = vector.load %arg6[%c3_90, %c0_91, %c0_92] : memref<5x144x120xf32, #tpu.memory_space<vmem>>, vector<1x144x120xf32>
    %108 = vector.shape_cast %107 : vector<1x144x120xf32> to vector<144x120xf32>
    %cst_93 = arith.constant dense<0.000000e+00> : vector<8x120xf32>
    %109 = tpu.matmul %106, %108, %cst_93 {dimension_numbers = #tpu.dot_dimension_numbers<[1], [0], [0], [1], [0, 0, 1, 1], [], []>} : vector<8x144xf32>, vector<144x120xf32>, vector<8x120xf32> -> vector<8x120xf32>
    %110 = arith.addf %104, %109 : vector<8x120xf32>
    %111 = vector.extract_strided_slice %87 {offsets = [4, 0, 0], sizes = [1, 8, 144], strides = [1, 1, 1]} : vector<5x8x144xf32> to vector<1x8x144xf32>
    %112 = vector.shape_cast %111 : vector<1x8x144xf32> to vector<8x144xf32>
    %c4_94 = arith.constant 4 : index
    %c0_95 = arith.constant 0 : index
    %c0_96 = arith.constant 0 : index
    %113 = vector.load %arg6[%c4_94, %c0_95, %c0_96] : memref<5x144x120xf32, #tpu.memory_space<vmem>>, vector<1x144x120xf32>
    %114 = vector.shape_cast %113 : vector<1x144x120xf32> to vector<144x120xf32>
    %cst_97 = arith.constant dense<0.000000e+00> : vector<8x120xf32>
    %115 = tpu.matmul %112, %114, %cst_97 {dimension_numbers = #tpu.dot_dimension_numbers<[1], [0], [0], [1], [0, 0, 1, 1], [], []>} : vector<8x144xf32>, vector<144x120xf32>, vector<8x120xf32> -> vector<8x120xf32>
    %116 = arith.addf %110, %115 : vector<8x120xf32>
    %c0_98 = arith.constant 0 : index
    %c0_99 = arith.constant 0 : index
    %117 = vector.load %arg7[%c0_98, %c0_99] : memref<1x120xf32, #tpu.memory_space<vmem>>, vector<1x120xf32>
    %118 = vector.broadcast %117 : vector<1x120xf32> to vector<8x120xf32>
    %119 = arith.addf %116, %118 : vector<8x120xf32>
    %cst_100 = arith.constant 0.000000e+00 : f32
    %120 = vector.broadcast %cst_100 : f32 to vector<8x120xf32>
    %121 = arith.maximumf %119, %120 : vector<8x120xf32>
    %c0_101 = arith.constant 0 : index
    %c0_102 = arith.constant 0 : index
    %122 = vector.load %arg8[%c0_101, %c0_102] : memref<120x84xf32, #tpu.memory_space<vmem>>, vector<120x84xf32>
    %cst_103 = arith.constant dense<0.000000e+00> : vector<8x84xf32>
    %123 = tpu.matmul %121, %122, %cst_103 {dimension_numbers = #tpu.dot_dimension_numbers<[1], [0], [0], [1], [0, 0, 1, 1], [], []>} : vector<8x120xf32>, vector<120x84xf32>, vector<8x84xf32> -> vector<8x84xf32>
    %c0_104 = arith.constant 0 : index
    %c0_105 = arith.constant 0 : index
    %124 = vector.load %arg9[%c0_104, %c0_105] : memref<1x84xf32, #tpu.memory_space<vmem>>, vector<1x84xf32>
    %125 = vector.broadcast %124 : vector<1x84xf32> to vector<8x84xf32>
    %126 = arith.addf %123, %125 : vector<8x84xf32>
    %cst_106 = arith.constant 0.000000e+00 : f32
    %127 = vector.broadcast %cst_106 : f32 to vector<8x84xf32>
    %128 = arith.maximumf %126, %127 : vector<8x84xf32>
    %c0_107 = arith.constant 0 : index
    %c0_108 = arith.constant 0 : index
    %129 = vector.load %arg10[%c0_107, %c0_108] : memref<84x2xf32, #tpu.memory_space<vmem>>, vector<84x2xf32>
    %cst_109 = arith.constant dense<0.000000e+00> : vector<8x2xf32>
    %130 = tpu.matmul %128, %129, %cst_109 {dimension_numbers = #tpu.dot_dimension_numbers<[1], [0], [0], [1], [0, 0, 1, 1], [], []>} : vector<8x84xf32>, vector<84x2xf32>, vector<8x2xf32> -> vector<8x2xf32>
    %c0_110 = arith.constant 0 : index
    %c0_111 = arith.constant 0 : index
    %131 = vector.load %arg11[%c0_110, %c0_111] : memref<1x2xf32, #tpu.memory_space<vmem>>, vector<1x2xf32>
    %132 = vector.broadcast %131 : vector<1x2xf32> to vector<8x2xf32>
    %133 = arith.addf %130, %132 : vector<8x2xf32>
    %c0_112 = arith.constant 0 : index
    %c0_113 = arith.constant 0 : index
    %134 = vector.load %arg12[%c0_112, %c0_113] : memref<8x2xf32, #tpu.memory_space<vmem>>, vector<8x2xf32>
    tpu.vector_store %arg12[%c0_112, %c0_113], %133 {strides = array<i32>} : memref<8x2xf32, #tpu.memory_space<vmem>>, vector<8x2xf32>,
    return
  }
  func.func @transform_0(%arg0: i32) -> (i32, i32) {
    %c0_i32 = arith.constant 0 : i32
    %c0_i32_0 = arith.constant 0 : i32
    return %arg0, %c0_i32 : i32, i32
  }
  func.func @transform_1(%arg0: i32) -> (i32, i32, i32) {
    %c0_i32 = arith.constant 0 : i32
    %c0_i32_0 = arith.constant 0 : i32
    %c0_i32_1 = arith.constant 0 : i32
    %c0_i32_2 = arith.constant 0 : i32
    return %c0_i32, %c0_i32_0, %c0_i32_1 : i32, i32, i32
  }
  func.func @transform_2(%arg0: i32) -> (i32, i32) {
    %c0_i32 = arith.constant 0 : i32
    %c0_i32_0 = arith.constant 0 : i32
    %c0_i32_1 = arith.constant 0 : i32
    return %c0_i32, %c0_i32_0 : i32, i32
  }
  func.func @transform_3(%arg0: i32) -> (i32, i32, i32) {
    %c0_i32 = arith.constant 0 : i32
    %c0_i32_0 = arith.constant 0 : i32
    %c0_i32_1 = arith.constant 0 : i32
    %c0_i32_2 = arith.constant 0 : i32
    return %c0_i32, %c0_i32_0, %c0_i32_1 : i32, i32, i32
  }
  func.func @transform_4(%arg0: i32) -> (i32, i32) {
    %c0_i32 = arith.constant 0 : i32
    %c0_i32_0 = arith.constant 0 : i32
    %c0_i32_1 = arith.constant 0 : i32
    return %c0_i32, %c0_i32_0 : i32, i32
  }
  func.func @transform_5(%arg0: i32) -> (i32, i32, i32) {
    %c0_i32 = arith.constant 0 : i32
    %c0_i32_0 = arith.constant 0 : i32
    %c0_i32_1 = arith.constant 0 : i32
    %c0_i32_2 = arith.constant 0 : i32
    return %c0_i32, %c0_i32_0, %c0_i32_1 : i32, i32, i32
  }
  func.func @transform_6(%arg0: i32) -> (i32, i32) {
    %c0_i32 = arith.constant 0 : i32
    %c0_i32_0 = arith.constant 0 : i32
    %c0_i32_1 = arith.constant 0 : i32
    return %c0_i32, %c0_i32_0 : i32, i32
  }
  func.func @transform_7(%arg0: i32) -> (i32, i32) {
    %c0_i32 = arith.constant 0 : i32
    %c0_i32_0 = arith.constant 0 : i32
    %c0_i32_1 = arith.constant 0 : i32
    return %c0_i32, %c0_i32_0 : i32, i32
  }
  func.func @transform_8(%arg0: i32) -> (i32, i32) {
    %c0_i32 = arith.constant 0 : i32
    %c0_i32_0 = arith.constant 0 : i32
    %c0_i32_1 = arith.constant 0 : i32
    return %c0_i32, %c0_i32_0 : i32, i32
  }
  func.func @transform_9(%arg0: i32) -> (i32, i32) {
    %c0_i32 = arith.constant 0 : i32
    %c0_i32_0 = arith.constant 0 : i32
    %c0_i32_1 = arith.constant 0 : i32
    return %c0_i32, %c0_i32_0 : i32, i32
  }
  func.func @transform_10(%arg0: i32) -> (i32, i32) {
    %c0_i32 = arith.constant 0 : i32
    %c0_i32_0 = arith.constant 0 : i32
    %c0_i32_1 = arith.constant 0 : i32
    return %c0_i32, %c0_i32_0 : i32, i32
  }
  func.func @transform_11(%arg0: i32) -> (i32, i32) {
    %c0_i32 = arith.constant 0 : i32
    %c0_i32_0 = arith.constant 0 : i32
    return %arg0, %c0_i32 : i32, i32
  }
}

</mosaic_0001>

<bundles_post_ra>
// kernel: net_forward.1
= control target key start
LH: loop header
LB: loop body
LE: loop exit
PB: predicated region body
PF: predicated region fallthrough
CT: control target
= control target key end

     0   :  { %s6636_s17 = smov 0   ;;  %s9443_s0 = inlined_call_operand.vmem [shape: f32[512,96], index: 0, kind: input, shape index: {}]   ;;  %s9444_s1 = inlined_call_operand.vmem [shape: f32[5,96,168], index: 1, kind: input, shape index: {}]   ;;  %s9445_s2 = inlined_call_operand.vmem [shape: f32[1,168], index: 2, kind: input, shape index: {}]   ;;  %s9446_s3 = inlined_call_operand.vmem [shape: f32[5,162,160], index: 3, kind: input, shape index: {}]   ;;  %s9447_s4 = inlined_call_operand.vmem [shape: f32[1,160], index: 4, kind: input, shape index: {}]   ;;  %s9448_s5 = inlined_call_operand.vmem [shape: f32[5,144,120], index: 5, kind: input, shape index: {}]   ;;  %s9449_s6 = inlined_call_operand.vmem [shape: f32[1,120], index: 6, kind: input, shape index: {}]   ;;  %s9450_s7 = inlined_call_operand.vmem [shape: f32[120,84], index: 7, kind: input, shape index: {}]   ;;  %s9451_s8 = inlined_call_operand.vmem [shape: f32[1,84], index: 8, kind: input, shape index: {}]   ;;  %s9452_s9 = inlined_call_operand.vmem [shape: f32[84,2], index: 9, kind: input, shape index: {}]   ;;  %s9453_s10 = inlined_call_operand.vmem [shape: f32[1,2], index: 10, kind: input, shape index: {}]   ;;  %s9454_s11 = inlined_call_operand.vmem [shape: f32[16,2], index: 11, kind: output, shape index: {}]  }
   0x1 LB: > { %s6642_s18 = sadd.s32 4294967295, %s6569_s17   ;;  %p5335_p0 = scmp.ge.s32.totalorder %s6569_s17, 1  ;;  %s6569_s17 = sphi %s6636_s17, %s21_s17  }
   0x2   : > { %p338_p1 = scmp.lt.s32.totalorder %s6569_s17, 3 }
   0x4   : > { %p339_p2 = pnand %p5335_p0, %p338_p1 }
   0x5   : > { %v416_v0 = vld [vmem:[%s9444_s1 + $0x8] sm:$0xff] (!%p339_p2)  ;;  %v418_v1 = vld [vmem:[%s9444_s1 + $0x18] sm:$0xff] (!%p339_p2)  ;;  %v415_v2 = vld [vmem:[%s9444_s1] sm:$0xff] (!%p339_p2)  ;;  %v6571_v7 = vmov (!%p339_p2), 0.0   ;;  %s5336_s29 = sshll.u32 (!%p339_p2), %s6642_s18, 5  ;;  %vm439_vm0 = vcmask (!%p339_p2), 785408  }
   0x6   : > { %342 = sbr.rel (%p339_p2) target bundleno = 1931 (0x78b), region = 64  ;;  %v5974_v3 = vpack.c.bf16 (!%p339_p2), %v418_v1, %v416_v0  ;;  %v417_v4 = vld [vmem:[%s9444_s1 + $0x10] sm:$0xff] (!%p339_p2)  ;;  %v420_v5 = vld [vmem:[%s9444_s1 + $0x28] sm:$0xff] (!%p339_p2)  ;;  %v422_v6 = vld [vmem:[%s9444_s1 + $0x38] sm:$0xff] (!%p339_p2)  ;;  %588 = vmatprep.mubr.f32.mxu0 (!%p339_p2), %v6571_v7  ;;  %1071 = vmatprep.mubr.f32.mxu1 (!%p339_p2), %v6571_v7  ;;  %p6741_p3 = scmp.lt.s32.totalorder (!%p339_p2), %s5336_s29, 63  ;;  %vm758_vm1 = vcmask (!%p339_p2), 326656  }
   0x7   : > { %v5976_v8 = vpack.c.bf16 (!%p339_p2), %v417_v4, %v415_v2  ;;  %v5978_v9 = vpack.c.bf16 (!%p339_p2), %v422_v6, %v420_v5  ;;  %v419_v10 = vld [vmem:[%s9444_s1 + $0x20] sm:$0xff] (!%p339_p2)  ;;  %v421_v11 = vld [vmem:[%s9444_s1 + $0x30] sm:$0xff] (!%p339_p2)  ;;  %v424_v12 = vld [vmem:[%s9444_s1 + $0x48] sm:$0xff] (!%p339_p2)  ;;  %s6572_s24 = smov (!%p339_p2), 122   ;;  %vm3495_vm2 = vcmask (!%p339_p2), 1041408   ;;  %vm3258_vm3 = vcmask (!%p339_p2), 998400  }
   0x8   : > { %5975 = vmatprep.subr.bf16.mxu0 (!%p339_p2), %v5974_v3  ;;  %v426_v13 = vld [vmem:[%s9444_s1 + $0x58] sm:$0xff] (!%p339_p2)  ;;  %v5368_v14 = vld [vmem:[%s9444_s1 + $0xc8] sm:$0xff] (!%p339_p2)  ;;  %v5980_v16 = vpack.c.bf16 (!%p339_p2), %v421_v11, %v419_v10  ;;  %v423_v18 = vld [vmem:[%s9444_s1 + $0x40] sm:$0xff] (!%p339_p2)  ;;  %vm3330_vm4 = vcmask (!%p339_p2), 277504   ;;  %s6574_s22 = smov (!%p339_p2), 112   ;;  %vm4585_vm5 = vcmask (!%p339_p2), 916480  }
   0x9   : > { %v5370_v15 = vld [vmem:[%s9444_s1 + $0xd8] sm:$0xff] (!%p339_p2)  ;;  %5977 = vmatpush1.bf16.msra.mxu0 (!%p339_p2), %v5976_v8  ;;  %v5367_v19 = vld [vmem:[%s9444_s1 + $0xc0] sm:$0xff] (!%p339_p2)  ;;  %v5982_v20 = vpack.c.bf16 (!%p339_p2), %v426_v13, %v424_v12  ;;  %v425_v21 = vld [vmem:[%s9444_s1 + $0x50] sm:$0xff] (!%p339_p2)  ;;  %vm4648_vm6 = vcmask (!%p339_p2), 130048   ;;  %vm6575_vm7 = vmmov (!%p339_p2), 0   ;;  %vm5105_vm8 = vcmask (!%p339_p2), 982016  }
   0xa   : > { %v5998_v17 = vpack.c.bf16 (!%p339_p2), %v5370_v15, %v5368_v14  ;;  %5979 = vmatprep.subr.bf16.mxu0 (!%p339_p2), %v5978_v9  ;;  %v5369_v22 = vld [vmem:[%s9444_s1 + $0xd0] sm:$0xff] (!%p339_p2)  ;;  %v428_v23 = vld [vmem:[%s9444_s1 + $0x68] sm:$0xff] (!%p339_p2)  ;;  %v430_v25 = vld [vmem:[%s9444_s1 + $0x78] sm:$0xff] (!%p339_p2)  ;;  %v5984_v31 = vpack.c.bf16 (!%p339_p2), %v425_v21, %v423_v18  ;;  %vm5202_vm9 = vcmask (!%p339_p2), 1043456   ;;  %vm5198_vm10 = vcmask (!%p339_p2), 687104   ;;  %p383_p4 = scmp.lt.s32.totalorder (!%p339_p2), %s6642_s18, 1 }
   0xb   : > { %v6000_v24 = vpack.c.bf16 (!%p339_p2), %v5369_v22, %v5367_v19  ;;  %v5372_v26 = vld [vmem:[%s9444_s1 + $0xe8] sm:$0xff] (!%p339_p2)  ;;  %v5374_v27 = vld [vmem:[%s9444_s1 + $0xf8] sm:$0xff] (!%p339_p2)  ;;  %v5371_v29 = vld [vmem:[%s9444_s1 + $0xe0] sm:$0xff] (!%p339_p2)  ;;  %v5986_v35 = vpack.c.bf16 (!%p339_p2), %v430_v25, %v428_v23  ;;  %vm5276_vm11 = vcmask (!%p339_p2), 15360  }
   0xc   : > { %5999 = vmatprep.subr.bf16.mxu1 (!%p339_p2), %v5998_v17  ;;  %v6002_v28 = vpack.c.bf16 (!%p339_p2), %v5374_v27, %v5372_v26  ;;  %v5373_v30 = vld [vmem:[%s9444_s1 + $0xf0] sm:$0xff] (!%p339_p2)  ;;  %v427_v32 = vld [vmem:[%s9444_s1 + $0x60] sm:$0xff] (!%p339_p2)  ;;  %v5376_v34 = vld [vmem:[%s9444_s1 + $0x108] sm:$0xff] (!%p339_p2) }
   0xd   : > { %5981 = vmatpush1.bf16.msra.mxu0 %v5980_v16  ;;  %6001 = vmatpush1.bf16.msra.mxu1 %v6000_v24  ;;  %v6004_v33 = vpack.c.bf16 %v5373_v30, %v5371_v29  ;;  %v429_v36 = vld [vmem:[%s9444_s1 + $0x70] sm:$0xff]  ;;  %v432_v37 = vld [vmem:[%s9444_s1 + $0x88] sm:$0xff]  ;;  %v5378_v38 = vld [vmem:[%s9444_s1 + $0x118] sm:$0xff]  ;;  %s9457_s29 = smov (!%p6741_p3, %s5336_s29), 63  ;;  %s9459_s18 = smov (!%p383_p4, %s6642_s18), 1 }
   0xe   : > { %5983 = vmatprep.subr.bf16.mxu0 %v5982_v20  ;;  %6003 = vmatprep.subr.bf16.mxu1 %v6002_v28  ;;  %v434_v39 = vld [vmem:[%s9444_s1 + $0x98] sm:$0xff]  ;;  %v6006_v40 = vpack.c.bf16 %v5378_v38, %v5376_v34  ;;  %v5375_v41 = vld [vmem:[%s9444_s1 + $0x100] sm:$0xff]  ;;  %v5377_v42 = vld [vmem:[%s9444_s1 + $0x110] sm:$0xff]  ;;  %v5988_v45 = vpack.c.bf16 %v429_v36, %v427_v32  ;;  %s5337_s28 = sshll.u32 %s9457_s29, 3  ;;  %s5338_s21 = sshll.u32 %s9459_s18, 3 }
   0xf   : > { %v5380_v43 = vld [vmem:[%s9444_s1 + $0x128] sm:$0xff]  ;;  %v5382_v44 = vld [vmem:[%s9444_s1 + $0x138] sm:$0xff]  ;;  %v431_v46 = vld [vmem:[%s9444_s1 + $0x80] sm:$0xff]  ;;  %v6008_v48 = vpack.c.bf16 %v5377_v42, %v5375_v41  ;;  %v5990_v49 = vpack.c.bf16 %v434_v39, %v432_v37  ;;  %s6806_s29 = scalar_lea.vmem %s9443_s0, %s5337_s28  ;;  %s386_s26 = scalar_lea.vmem %s9454_s11, %s5338_s21 }
  0x10   : > { %v433_v47 = vld [vmem:[%s9444_s1 + $0x90] sm:$0xff]  ;;  %v436_v50 = vld [vmem:[%s9444_s1 + $0xa8] sm:$0xff]  ;;  %v6010_v51 = vpack.c.bf16 %v5382_v44, %v5380_v43  ;;  %v5379_v52 = vld [vmem:[%s9444_s1 + $0x120] sm:$0xff] }
  0x11   : > { %5985 = vmatpush1.bf16.msra.mxu0 %v5984_v31  ;;  %6005 = vmatpush1.bf16.msra.mxu1 %v6004_v33  ;;  %v5381_v53 = vld [vmem:[%s9444_s1 + $0x130] sm:$0xff]  ;;  %v438_v54 = vld [vmem:[%s9444_s1 + $0xb8] sm:$0xff]  ;;  %v5384_v55 = vld [vmem:[%s9444_s1 + $0x148] sm:$0xff]  ;;  %v5992_v57 = vpack.c.bf16 %v433_v47, %v431_v46 }
  0x12   : > { %5987 = vmatprep.subr.bf16.mxu0 %v5986_v35  ;;  %6007 = vmatprep.subr.bf16.mxu1 %v6006_v40  ;;  %v5386_v56 = vld [vmem:[%s9444_s1 + $0x158] sm:$0xff]  ;;  %v435_v58 = vld [vmem:[%s9444_s1 + $0xa0] sm:$0xff]  ;;  %v437_v59 = vld [vmem:[%s9444_s1 + $0xb0] sm:$0xff]  ;;  %v6012_v60 = vpack.c.bf16 %v5381_v53, %v5379_v52  ;;  %v5994_v61 = vpack.c.bf16 %v438_v54, %v436_v50 }
  0x13   : > { %v6014_v62 = vpack.c.bf16 %v5386_v56, %v5384_v55  ;;  %v5383_v63 = vld [vmem:[%s9444_s1 + $0x140] sm:$0xff]  ;;  %v5385_v0 = vld [vmem:[%s9444_s1 + $0x150] sm:$0xff]  ;;  %v5420_v1 = vld [vmem:[%s9444_s1 + $0x188] sm:$0xff]  ;;  %v5996_v5 = vpack.c.bf16 %v437_v59, %v435_v58 }
  0x14   : > { %v5422_v2 = vld [vmem:[%s9444_s1 + $0x198] sm:$0xff]  ;;  %v5388_v3 = vld [vmem:[%s9444_s1 + $0x168] sm:$0xff]  ;;  %v6016_v6 = vpack.c.bf16 %v5385_v0, %v5383_v63  ;;  %v5419_v9 = vld [vmem:[%s9444_s1 + $0x180] sm:$0xff] }
  0x15   : > { %5989 = vmatpush1.bf16.msra.mxu0 %v5988_v45  ;;  %6009 = vmatpush1.bf16.msra.mxu1 %v6008_v48  ;;  %v5390_v4 = vld [vmem:[%s9444_s1 + $0x178] sm:$0xff]  ;;  %v6022_v8 = vpack.c.bf16 %v5422_v2, %v5420_v1  ;;  %v5421_v10 = vld [vmem:[%s9444_s1 + $0x190] sm:$0xff]  ;;  %v5387_v12 = vld [vmem:[%s9444_s1 + $0x160] sm:$0xff] }
  0x16   : > { %5991 = vmatprep.subr.bf16.mxu0 %v5990_v49  ;;  %6011 = vmatprep.subr.bf16.mxu1 %v6010_v51  ;;  %v6018_v11 = vpack.c.bf16 %v5390_v4, %v5388_v3  ;;  %v5389_v13 = vld [vmem:[%s9444_s1 + $0x170] sm:$0xff]  ;;  %v5424_v14 = vld [vmem:[%s9444_s1 + $0x1a8] sm:$0xff]  ;;  %v5426_v15 = vld [vmem:[%s9444_s1 + $0x1b8] sm:$0xff]  ;;  %v6024_v17 = vpack.c.bf16 %v5421_v10, %v5419_v9 }
  0x17   : > { %v387_v16 = vld [vmem:[%s6806_s29] sm:$0xff]  ;;  %v6020_v18 = vpack.c.bf16 %v5389_v13, %v5387_v12  ;;  %v6026_v19 = vpack.c.bf16 %v5426_v15, %v5424_v14  ;;  %v5425_v21 = vld [vmem:[%s9444_s1 + $0x1b0] sm:$0xff]  ;;  %v5428_v22 = vld [vmem:[%s9444_s1 + $0x1c8] sm:$0xff] }
  0x18   : > { %v5423_v20 = vld [vmem:[%s9444_s1 + $0x1a0] sm:$0xff]  ;;  %v5430_v23 = vld [vmem:[%s9444_s1 + $0x1d8] sm:$0xff]  ;;  %v388_v24 = vld [vmem:[%s6806_s29 + $0x8] sm:$0xff] }
  0x19   : > { %5993 = vmatpush1.bf16.msra.mxu0 %v5992_v57  ;;  %6013 = vmatpush1.bf16.msra.mxu1 %v6012_v60  ;;  %v6028_v25 = vpack.c.bf16 %v5425_v21, %v5423_v20  ;;  %v6030_v26 = vpack.c.bf16 %v5430_v23, %v5428_v22  ;;  %v5427_v27 = vld [vmem:[%s9444_s1 + $0x1c0] sm:$0xff]  ;;  %v5429_v28 = vld [vmem:[%s9444_s1 + $0x1d0] sm:$0xff]  ;;  %v5432_v30 = vld [vmem:[%s9444_s1 + $0x1e8] sm:$0xff] }
  0x1a   : > { %5995 = vmatprep.subr.bf16.mxu0 %v5994_v61  ;;  %6015 = vmatprep.subr.bf16.mxu1 %v6014_v62  ;;  %v6850_v29 = vld [vmem:[%s6806_s29 + $0x10] sm:$0xff]  ;;  %v5434_v31 = vld [vmem:[%s9444_s1 + $0x1f8] sm:$0xff]  ;;  %v5431_v32 = vld [vmem:[%s9444_s1 + $0x1e0] sm:$0xff]  ;;  %v6032_v35 = vpack.c.bf16 %v5429_v28, %v5427_v27 }
  0x1b   : > { %v5472_v33 = vld [vmem:[%s9444_s1 + $0x248] sm:$0xff]  ;;  %v5474_v34 = vld [vmem:[%s9444_s1 + $0x258] sm:$0xff]  ;;  %v5433_v36 = vld [vmem:[%s9444_s1 + $0x1f0] sm:$0xff]  ;;  %v6034_v40 = vpack.c.bf16 %v5434_v31, %v5432_v30 }
  0x1c   : > { %v6046_v37 = vpack.c.bf16 %v5474_v34, %v5472_v33  ;;  %v5471_v38 = vld [vmem:[%s9444_s1 + $0x240] sm:$0xff]  ;;  %v5473_v39 = vld [vmem:[%s9444_s1 + $0x250] sm:$0xff]  ;;  %v5436_v41 = vld [vmem:[%s9444_s1 + $0x208] sm:$0xff]  ;;  %v6036_v52 = vpack.c.bf16 %v5433_v36, %v5431_v32 }
  0x1d   : > { %5997 = vmatpush1.bf16.msra.mxu0 %v5996_v5  ;;  %6017 = vmatpush1.bf16.msra.mxu1 %v6016_v6  ;;  %v6048_v42 = vpack.c.bf16 %v5473_v39, %v5471_v38  ;;  %v5476_v43 = vld [vmem:[%s9444_s1 + $0x268] sm:$0xff]  ;;  %v5478_v44 = vld [vmem:[%s9444_s1 + $0x278] sm:$0xff]  ;;  %v5475_v47 = vld [vmem:[%s9444_s1 + $0x260] sm:$0xff] }
  0x1e   : > { %6023 = vmatprep.subr.bf16.mxu0 %v6022_v8  ;;  %6019 = vmatprep.subr.bf16.mxu1 %v6018_v11  ;;  %v5438_v45 = vld [vmem:[%s9444_s1 + $0x218] sm:$0xff]  ;;  %v6050_v46 = vpack.c.bf16 %v5478_v44, %v5476_v43  ;;  %v5477_v48 = vld [vmem:[%s9444_s1 + $0x270] sm:$0xff]  ;;  %v5480_v49 = vld [vmem:[%s9444_s1 + $0x288] sm:$0xff] }
  0x1f   : > { %v5482_v50 = vld [vmem:[%s9444_s1 + $0x298] sm:$0xff]  ;;  %v6038_v53 = vpack.c.bf16 %v5438_v45, %v5436_v41  ;;  %v5435_v54 = vld [vmem:[%s9444_s1 + $0x200] sm:$0xff]  ;;  %v5437_v55 = vld [vmem:[%s9444_s1 + $0x210] sm:$0xff]  ;;  %v6052_v57 = vpack.c.bf16 %v5477_v48, %v5475_v47 }
  0x20   : > { %5339 = vmatmul.mubr.msk.f32.vlgmr.msra.gmra.mrb[0].mxu0 %vm439_vm0, %v387_v16  ;;  %v6909_v51 = vld [vmem:[%s6806_s29 + $0x18] sm:$0xff]  ;;  %v5440_v56 = vld [vmem:[%s9444_s1 + $0x228] sm:$0xff]  ;;  %v6054_v59 = vpack.c.bf16 %v5482_v50, %v5480_v49  ;;  %v5479_v60 = vld [vmem:[%s9444_s1 + $0x280] sm:$0xff]  ;;  %v6040_v1 = vpack.c.bf16 %v5437_v55, %v5435_v54 }
  0x21   : > { %6025 = vmatpush1.bf16.msra.mxu0 %v6024_v17  ;;  %594 = vmatprep.mubr.f32.mxu0 %v6571_v7  ;;  %v5442_v58 = vld [vmem:[%s9444_s1 + $0x238] sm:$0xff]  ;;  %v5481_v61 = vld [vmem:[%s9444_s1 + $0x290] sm:$0xff]  ;;  %v5484_v62 = vld [vmem:[%s9444_s1 + $0x2a8] sm:$0xff] }
  0x22   : > { %6021 = vmatpush1.bf16.msra.mxu1 %v6020_v18  ;;  %6027 = vmatprep.subr.bf16.mxu0 %v6026_v19  ;;  %v5486_v63 = vld [vmem:[%s9444_s1 + $0x2b8] sm:$0xff]  ;;  %v6942_v0 = vld [vmem:[%s6806_s29 + $0x20] sm:$0xff]  ;;  %v6042_v2 = vpack.c.bf16 %v5442_v58, %v5440_v56  ;;  %v5441_v4 = vld [vmem:[%s9444_s1 + $0x230] sm:$0xff]  ;;  %v6056_v5 = vpack.c.bf16 %v5481_v61, %v5479_v60 }
  0x23   : > { %6047 = vmatprep.subr.bf16.mxu1 %v6046_v37  ;;  %v5439_v3 = vld [vmem:[%s9444_s1 + $0x220] sm:$0xff]  ;;  %v6058_v8 = vpack.c.bf16 %v5486_v63, %v5484_v62  ;;  %v5485_v9 = vld [vmem:[%s9444_s1 + $0x2b0] sm:$0xff]  ;;  %v5524_v10 = vld [vmem:[%s9444_s1 + $0x308] sm:$0xff] }
  0x24   : > { %5340 = vmatmul.mubr.msk.f32.gmra.mrb[2].mxu0 %vm439_vm0, %v388_v24  ;;  %v5483_v6 = vld [vmem:[%s9444_s1 + $0x2a0] sm:$0xff]  ;;  %v5526_v11 = vld [vmem:[%s9444_s1 + $0x318] sm:$0xff]  ;;  %v5488_v12 = vld [vmem:[%s9444_s1 + $0x2c8] sm:$0xff]  ;;  %v6044_v15 = vpack.c.bf16 %v5441_v4, %v5439_v3 }
  0x25   : > { %600 = vmatprep.mubr.f32.mxu0 %v6571_v7  ;;  %5391 = vmatmul.mubr.msk.f32.vlgmr.msra.gmra.mrb[0].mxu1 %vm439_vm0, %v388_v24  ;;  %v5490_v13 = vld [vmem:[%s9444_s1 + $0x2d8] sm:$0xff]  ;;  %v6975_v14 = vld [vmem:[%s6806_s29 + $0x28] sm:$0xff]  ;;  %v6060_v16 = vpack.c.bf16 %v5485_v9, %v5483_v6  ;;  %v6070_v17 = vpack.c.bf16 %v5526_v11, %v5524_v10  ;;  %v5487_v19 = vld [vmem:[%s9444_s1 + $0x2c0] sm:$0xff] }
  0x26   : > { %1077 = vmatprep.mubr.f32.mxu1 %v6571_v7  ;;  %6029 = vmatpush1.bf16.msra.mxu0 %v6028_v25  ;;  %v6062_v18 = vpack.c.bf16 %v5490_v13, %v5488_v12  ;;  %v5489_v20 = vld [vmem:[%s9444_s1 + $0x2d0] sm:$0xff]  ;;  %v5492_v21 = vld [vmem:[%s9444_s1 + $0x2e8] sm:$0xff]  ;;  %v5494_v22 = vld [vmem:[%s9444_s1 + $0x2f8] sm:$0xff] }
  0x27   : > { %6031 = vmatprep.subr.bf16.mxu0 %v6030_v26  ;;  %6049 = vmatpush1.bf16.msra.mxu1 %v6048_v42  ;;  %v6996_v23 = vld [vmem:[%s6806_s29 + $0x30] sm:$0xff]  ;;  %v6064_v24 = vpack.c.bf16 %v5489_v20, %v5487_v19  ;;  %v6066_v25 = vpack.c.bf16 %v5494_v22, %v5492_v21  ;;  %v5491_v26 = vld [vmem:[%s9444_s1 + $0x2e0] sm:$0xff]  ;;  %v7011_v28 = vld [vmem:[%s6806_s29 + $0x38] sm:$0xff] }
  0x28   : > { %5341 = vmatmul.mubr.msk.f32.gmra.mrb[4].mxu0 %vm439_vm0, %v6850_v29  ;;  %6051 = vmatprep.subr.bf16.mxu1 %v6050_v46  ;;  %v5493_v27 = vld [vmem:[%s9444_s1 + $0x2f0] sm:$0xff]  ;;  %v7020_v31 = vld [vmem:[%s6806_s29 + $0x40] sm:$0xff]  ;;  %v7029_v32 = vld [vmem:[%s6806_s29 + $0x48] sm:$0xff] }
  0x29   : > { %606 = vmatprep.mubr.f32.mxu0 %v6571_v7  ;;  %5392 = vmatmul.mubr.msk.f32.gmra.mrb[2].mxu1 %vm439_vm0, %v6850_v29  ;;  %v6068_v30 = vpack.c.bf16 %v5493_v27, %v5491_v26  ;;  %v7038_v33 = vld [vmem:[%s6806_s29 + $0x50] sm:$0xff]  ;;  %v7047_v34 = vld [vmem:[%s6806_s29 + $0x58] sm:$0xff]  ;;  %v7065_v36 = vld [vmem:[%s6806_s29 + $0x68] sm:$0xff] }
  0x2a   : > { %1083 = vmatprep.mubr.f32.mxu1 %v6571_v7  ;;  %6033 = vmatpush1.bf16.msra.mxu0 %v6032_v35  ;;  %v7056_v35 = vld [vmem:[%s6806_s29 + $0x60] sm:$0xff]  ;;  %v7074_v37 = vld [vmem:[%s6806_s29 + $0x70] sm:$0xff]  ;;  %v7083_v38 = vld [vmem:[%s6806_s29 + $0x78] sm:$0xff] }
  0x2b   : > { %6035 = vmatprep.subr.bf16.mxu0 %v6034_v40  ;;  %6053 = vmatpush1.bf16.msra.mxu1 %v6052_v57  ;;  %v7092_v39 = vld [vmem:[%s6806_s29 + $0x80] sm:$0xff]  ;;  %v7101_v40 = vld [vmem:[%s6806_s29 + $0x88] sm:$0xff]  ;;  %v7110_v41 = vld [vmem:[%s6806_s29 + $0x90] sm:$0xff] }
  0x2c   : > { %5342 = vmatmul.mubr.msk.f32.gmra.mrb[6].mxu0 %vm439_vm0, %v6909_v51  ;;  %6055 = vmatprep.subr.bf16.mxu1 %v6054_v59  ;;  %v7119_v42 = vld [vmem:[%s6806_s29 + $0x98] sm:$0xff]  ;;  %v7128_v43 = vld [vmem:[%s6806_s29 + $0xa0] sm:$0xff]  ;;  %v7137_v44 = vld [vmem:[%s6806_s29 + $0xa8] sm:$0xff] }
  0x2d   : > { %612 = vmatprep.mubr.f32.mxu0 %v6571_v7  ;;  %5393 = vmatmul.mubr.msk.f32.gmra.mrb[4].mxu1 %vm439_vm0, %v6909_v51  ;;  %v7146_v45 = vld [vmem:[%s6806_s29 + $0xb0] sm:$0xff]  ;;  %v7155_v46 = vld [vmem:[%s6806_s29 + $0xb8] sm:$0xff]  ;;  %v7164_v47 = vld [vmem:[%s6806_s29 + $0xc0] sm:$0xff] }
  0x2e   : > { %1089 = vmatprep.mubr.f32.mxu1 %v6571_v7  ;;  %6037 = vmatpush1.bf16.msra.mxu0 %v6036_v52  ;;  %v7173_v48 = vld [vmem:[%s6806_s29 + $0xc8] sm:$0xff]  ;;  %v7182_v49 = vld [vmem:[%s6806_s29 + $0xd0] sm:$0xff]  ;;  %v7191_v50 = vld [vmem:[%s6806_s29 + $0xd8] sm:$0xff] }
  0x2f   : > { %6039 = vmatprep.subr.bf16.mxu0 %v6038_v53  ;;  %6057 = vmatpush1.bf16.msra.mxu1 %v6056_v5  ;;  %v5523_v52 = vld [vmem:[%s9444_s1 + $0x300] sm:$0xff]  ;;  %v5525_v53 = vld [vmem:[%s9444_s1 + $0x310] sm:$0xff]  ;;  %v5528_v54 = vld [vmem:[%s9444_s1 + $0x328] sm:$0xff] }
  0x30   : > { %5343 = vmatmul.mubr.msk.f32.gmra.mrb[8].mxu0 %vm439_vm0, %v6942_v0  ;;  %6059 = vmatprep.subr.bf16.mxu1 %v6058_v8  ;;  %v5530_v55 = vld [vmem:[%s9444_s1 + $0x338] sm:$0xff]  ;;  %v6072_v56 = vpack.c.bf16 %v5525_v53, %v5523_v52  ;;  %v5527_v58 = vld [vmem:[%s9444_s1 + $0x320] sm:$0xff]  ;;  %v5529_v59 = vld [vmem:[%s9444_s1 + $0x330] sm:$0xff] }
  0x31   : > { %618 = vmatprep.mubr.f32.mxu0 %v6571_v7  ;;  %5394 = vmatmul.mubr.msk.f32.gmra.mrb[6].mxu1 %vm439_vm0, %v6942_v0  ;;  %v6074_v57 = vpack.c.bf16 %v5530_v55, %v5528_v54  ;;  %v7219_v60 = vld [vmem:[%s6806_s29 + $0xe0] sm:$0xff]  ;;  %v5532_v61 = vld [vmem:[%s9444_s1 + $0x348] sm:$0xff]  ;;  %v5534_v62 = vld [vmem:[%s9444_s1 + $0x358] sm:$0xff]  ;;  %v6076_v63 = vpack.c.bf16 %v5529_v59, %v5527_v58 }
  0x32   : > { %1095 = vmatprep.mubr.f32.mxu1 %v6571_v7  ;;  %6041 = vmatpush1.bf16.msra.mxu0 %v6040_v1  ;;  %v6078_v1 = vpack.c.bf16 %v5534_v62, %v5532_v61  ;;  %v5533_v3 = vld [vmem:[%s9444_s1 + $0x350] sm:$0xff]  ;;  %v5538_v4 = vld [vmem:[%s9444_s1 + $0x378] sm:$0xff]  ;;  %v5535_v8 = vld [vmem:[%s9444_s1 + $0x360] sm:$0xff] }
  0x33   : > { %6043 = vmatprep.subr.bf16.mxu0 %v6042_v2  ;;  %6061 = vmatpush1.bf16.msra.mxu1 %v6060_v16  ;;  %v5531_v2 = vld [vmem:[%s9444_s1 + $0x340] sm:$0xff]  ;;  %v5537_v9 = vld [vmem:[%s9444_s1 + $0x370] sm:$0xff]  ;;  %v5540_v10 = vld [vmem:[%s9444_s1 + $0x388] sm:$0xff] }
  0x34   : > { %5344 = vmatmul.mubr.msk.f32.gmra.mrb[10].mxu0 %vm439_vm0, %v6975_v14  ;;  %6063 = vmatprep.subr.bf16.mxu1 %v6062_v18  ;;  %v6080_v5 = vpack.c.bf16 %v5533_v3, %v5531_v2  ;;  %v6084_v11 = vpack.c.bf16 %v5537_v9, %v5535_v8  ;;  %v5539_v13 = vld [vmem:[%s9444_s1 + $0x380] sm:$0xff]  ;;  %v5544_v16 = vld [vmem:[%s9444_s1 + $0x3a8] sm:$0xff]  ;;  %v5545_v21 = vld [vmem:[%s9444_s1 + $0x3b0] sm:$0xff] }
  0x35   : > { %624 = vmatprep.mubr.f32.mxu0 %v6571_v7  ;;  %5395 = vmatmul.mubr.msk.f32.gmra.mrb[8].mxu1 %vm439_vm0, %v6975_v14  ;;  %v5543_v20 = vld [vmem:[%s9444_s1 + $0x3a0] sm:$0xff] }
  0x36   : > { %1101 = vmatprep.mubr.f32.mxu1 %v6571_v7  ;;  %6045 = vmatpush1.bf16.msra.mxu0 %v6044_v15  ;;  %v5541_v15 = vld [vmem:[%s9444_s1 + $0x390] sm:$0xff]  ;;  %v6092_v22 = vpack.c.bf16 %v5545_v21, %v5543_v20 }
  0x37   : > { %6071 = vmatprep.subr.bf16.mxu0 %v6070_v17  ;;  %6065 = vmatpush1.bf16.msra.mxu1 %v6064_v24  ;;  %v5546_v17 = vld [vmem:[%s9444_s1 + $0x3b8] sm:$0xff]  ;;  %v6088_v18 = vpack.c.bf16 %v5541_v15, %v5539_v13  ;;  %v2490_v20 = vld [vmem:[%s6806_s29 + $0x50] sm:$0xff] }
  0x38   : > { %5345 = vmatmul.mubr.msk.f32.gmra.mrb[12].mxu0 %vm439_vm0, %v6996_v23  ;;  %6067 = vmatprep.subr.bf16.mxu1 %v6066_v25  ;;  %v6090_v19 = vpack.c.bf16 %v5546_v17, %v5544_v16 }
  0x39   : > { %630 = vmatprep.mubr.f32.mxu0 %v6571_v7  ;;  %5396 = vmatmul.mubr.msk.f32.gmra.mrb[10].mxu1 %vm439_vm0, %v6996_v23 }
  0x3a   : > { %1107 = vmatprep.mubr.f32.mxu1 %v6571_v7 }
  0x3b   : > { %6069 = vmatpush1.bf16.msra.mxu1 %v6068_v30 }
  0x3c   : > { %5346 = vmatmul.mubr.msk.f32.gmra.mrb[14].mxu0 %vm439_vm0, %v7011_v28 }
  0x3d   : > { %636 = vmatprep.mubr.f32.mxu0 %v6571_v7  ;;  %5397 = vmatmul.mubr.msk.f32.gmra.mrb[12].mxu1 %vm439_vm0, %v7011_v28 }
  0x3e   : > { %1113 = vmatprep.mubr.f32.mxu1 %v6571_v7 }
  0x40   : > { %5347 = vmatmul.mubr.msk.f32.gmra.mrb[16].mxu0 %vm439_vm0, %v7020_v31 }
  0x41   : > { %642 = vmatprep.mubr.f32.mxu0 %v6571_v7  ;;  %5398 = vmatmul.mubr.msk.f32.gmra.mrb[14].mxu1 %vm439_vm0, %v7020_v31 }
  0x42   : > { %1119 = vmatprep.mubr.f32.mxu1 %v6571_v7 }
  0x44   : > { %5348 = vmatmul.mubr.msk.f32.gmra.mrb[18].mxu0 %vm439_vm0, %v7029_v32 }
  0x45   : > { %648 = vmatprep.mubr.f32.mxu0 %v6571_v7  ;;  %5399 = vmatmul.mubr.msk.f32.gmra.mrb[16].mxu1 %vm439_vm0, %v7029_v32 }
  0x46   : > { %1125 = vmatprep.mubr.f32.mxu1 %v6571_v7 }
  0x48   : > { %5349 = vmatmul.mubr.msk.f32.gmra.mrb[20].mxu0 %vm439_vm0, %v7038_v33 }
  0x49   : > { %654 = vmatprep.mubr.f32.mxu0 %v6571_v7  ;;  %5400 = vmatmul.mubr.msk.f32.gmra.mrb[18].mxu1 %vm439_vm0, %v7038_v33 }
  0x4a   : > { %1131 = vmatprep.mubr.f32.mxu1 %v6571_v7 }
  0x4c   : > { %5350 = vmatmul.mubr.msk.f32.gmra.mrb[22].mxu0 %vm439_vm0, %v7047_v34 }
  0x4d   : > { %660 = vmatprep.mubr.f32.mxu0 %v6571_v7  ;;  %5401 = vmatmul.mubr.msk.f32.gmra.mrb[20].mxu1 %vm439_vm0, %v7047_v34 }
  0x4e   : > { %1137 = vmatprep.mubr.f32.mxu1 %v6571_v7 }
  0x50   : > { %5351 = vmatmul.mubr.msk.f32.gmra.mrb[24].mxu0 %vm439_vm0, %v7056_v35 }
  0x51   : > { %666 = vmatprep.mubr.f32.mxu0 %v6571_v7  ;;  %5402 = vmatmul.mubr.msk.f32.gmra.mrb[22].mxu1 %vm439_vm0, %v7056_v35 }
  0x52   : > { %1143 = vmatprep.mubr.f32.mxu1 %v6571_v7 }
  0x54   : > { %5352 = vmatmul.mubr.msk.f32.gmra.mrb[26].mxu0 %vm439_vm0, %v7065_v36 }
  0x55   : > { %672 = vmatprep.mubr.f32.mxu0 %v6571_v7  ;;  %5403 = vmatmul.mubr.msk.f32.gmra.mrb[24].mxu1 %vm439_vm0, %v7065_v36 }
  0x56   : > { %1149 = vmatprep.mubr.f32.mxu1 %v6571_v7 }
  0x58   : > { %5353 = vmatmul.mubr.msk.f32.gmra.mrb[28].mxu0 %vm439_vm0, %v7074_v37 }
  0x59   : > { %678 = vmatprep.mubr.f32.mxu0 %v6571_v7  ;;  %5404 = vmatmul.mubr.msk.f32.gmra.mrb[26].mxu1 %vm439_vm0, %v7074_v37 }
  0x5a   : > { %1155 = vmatprep.mubr.f32.mxu1 %v6571_v7 }
  0x5c   : > { %5354 = vmatmul.mubr.msk.f32.gmra.mrb[30].mxu0 %vm439_vm0, %v7083_v38 }
  0x5d   : > { %684 = vmatprep.mubr.f32.mxu0 %v6571_v7  ;;  %5405 = vmatmul.mubr.msk.f32.gmra.mrb[28].mxu1 %vm439_vm0, %v7083_v38 }
  0x5e   : > { %1161 = vmatprep.mubr.f32.mxu1 %v6571_v7 }
  0x60   : > { %5355 = vmatmul.mubr.msk.f32.gmra.mrb[32].mxu0 %vm439_vm0, %v7092_v39 }
  0x61   : > { %690 = vmatprep.mubr.f32.mxu0 %v6571_v7  ;;  %5406 = vmatmul.mubr.msk.f32.gmra.mrb[30].mxu1 %vm439_vm0, %v7092_v39 }
  0x62   : > { %1167 = vmatprep.mubr.f32.mxu1 %v6571_v7 }
  0x64   : > { %5356 = vmatmul.mubr.msk.f32.gmra.mrb[34].mxu0 %vm439_vm0, %v7101_v40 }
  0x65   : > { %696 = vmatprep.mubr.f32.mxu0 %v6571_v7  ;;  %5407 = vmatmul.mubr.msk.f32.gmra.mrb[32].mxu1 %vm439_vm0, %v7101_v40 }
  0x66   : > { %1173 = vmatprep.mubr.f32.mxu1 %v6571_v7 }
  0x68   : > { %5357 = vmatmul.mubr.msk.f32.gmra.mrb[36].mxu0 %vm439_vm0, %v7110_v41 }
  0x69   : > { %702 = vmatprep.mubr.f32.mxu0 %v6571_v7  ;;  %5408 = vmatmul.mubr.msk.f32.gmra.mrb[34].mxu1 %vm439_vm0, %v7110_v41 }
  0x6a   : > { %1179 = vmatprep.mubr.f32.mxu1 %v6571_v7 }
  0x6c   : > { %5358 = vmatmul.mubr.msk.f32.gmra.mrb[38].mxu0 %vm439_vm0, %v7119_v42 }
  0x6d   : > { %708 = vmatprep.mubr.f32.mxu0 %v6571_v7  ;;  %5409 = vmatmul.mubr.msk.f32.gmra.mrb[36].mxu1 %vm439_vm0, %v7119_v42 }
  0x6e   : > { %1185 = vmatprep.mubr.f32.mxu1 %v6571_v7 }
  0x70   : > { %5359 = vmatmul.mubr.msk.f32.gmra.mrb[40].mxu0 %vm439_vm0, %v7128_v43 }
  0x71   : > { %714 = vmatprep.mubr.f32.mxu0 %v6571_v7  ;;  %5410 = vmatmul.mubr.msk.f32.gmra.mrb[38].mxu1 %vm439_vm0, %v7128_v43 }
  0x72   : > { %1191 = vmatprep.mubr.f32.mxu1 %v6571_v7 }
  0x74   : > { %5360 = vmatmul.mubr.msk.f32.gmra.mrb[42].mxu0 %vm439_vm0, %v7137_v44 }
  0x75   : > { %720 = vmatprep.mubr.f32.mxu0 %v6571_v7  ;;  %5411 = vmatmul.mubr.msk.f32.gmra.mrb[40].mxu1 %vm439_vm0, %v7137_v44 }
  0x76   : > { %1197 = vmatprep.mubr.f32.mxu1 %v6571_v7 }
  0x78   : > { %5361 = vmatmul.mubr.msk.f32.gmra.mrb[44].mxu0 %vm439_vm0, %v7146_v45 }
  0x79   : > { %726 = vmatprep.mubr.f32.mxu0 %v6571_v7  ;;  %5412 = vmatmul.mubr.msk.f32.gmra.mrb[42].mxu1 %vm439_vm0, %v7146_v45 }
  0x7a   : > { %1203 = vmatprep.mubr.f32.mxu1 %v6571_v7 }
  0x7c   : > { %5362 = vmatmul.mubr.msk.f32.gmra.mrb[46].mxu0 %vm439_vm0, %v7155_v46 }
  0x7d   : > { %732 = vmatprep.mubr.f32.mxu0 %v6571_v7  ;;  %5413 = vmatmul.mubr.msk.f32.gmra.mrb[44].mxu1 %vm439_vm0, %v7155_v46 }
  0x7e   : > { %1209 = vmatprep.mubr.f32.mxu1 %v6571_v7 }
  0x80   : > { %5363 = vmatmul.mubr.msk.f32.gmra.mrb[48].mxu0 %vm439_vm0, %v7164_v47 }
  0x81   : > { %738 = vmatprep.mubr.f32.mxu0 %v6571_v7  ;;  %5414 = vmatmul.mubr.msk.f32.gmra.mrb[46].mxu1 %vm439_vm0, %v7164_v47 }
  0x82   : > { %1215 = vmatprep.mubr.f32.mxu1 %v6571_v7 }
  0x84   : > { %5364 = vmatmul.mubr.msk.f32.gmra.mrb[50].mxu0 %vm439_vm0, %v7173_v48 }
  0x85   : > { %744 = vmatprep.mubr.f32.mxu0 %v6571_v7  ;;  %5415 = vmatmul.mubr.msk.f32.gmra.mrb[48].mxu1 %vm439_vm0, %v7173_v48 }
  0x86   : > { %1221 = vmatprep.mubr.f32.mxu1 %v6571_v7 }
  0x88   : > { %5365 = vmatmul.mubr.msk.f32.gmra.mrb[52].mxu0 %vm439_vm0, %v7182_v49 }
  0x89   : > { %750 = vmatprep.mubr.f32.mxu0 %v6571_v7  ;;  %5416 = vmatmul.mubr.msk.f32.gmra.mrb[50].mxu1 %vm439_vm0, %v7182_v49 }
  0x8a   : > { %1227 = vmatprep.mubr.f32.mxu1 %v6571_v7 }
  0x8c   : > { %5366 = vmatmul.mubr.msk.f32.gmra.mrb[54].mxu0 %vm439_vm0, %v7191_v50 }
  0x8d   : > { %1609 = vmatprep.mubr.f32.mxu0 %v6571_v7  ;;  %5417 = vmatmul.mubr.msk.f32.gmra.mrb[52].mxu1 %vm439_vm0, %v7191_v50 }
  0x8e   : > { %1233 = vmatprep.mubr.f32.mxu1 %v6571_v7 }
  0x90   : > { %5443 = vmatmul.mubr.msk.f32.vlgmr.msra.gmra.mrb[56].mxu0 %vm439_vm0, %v6850_v29  ;;  %v5536_v29 = vld [vmem:[%s9444_s1 + $0x368] sm:$0xff] }
  0x91   : > { %6073 = vmatpush1.bf16.msra.mxu0 %v6072_v56  ;;  %1615 = vmatprep.mubr.f32.mxu0 %v6571_v7  ;;  %v6082_v6 = vpack.c.bf16 %v5538_v4, %v5536_v29  ;;  %v2488_v4 = vld [vmem:[%s6806_s29 + $0x40] sm:$0xff] }
  0x92   : > { %5418 = vmatmul.mubr.msk.f32.gmra.mrb[54].mxu1 %vm439_vm0, %v7219_v60  ;;  %6075 = vmatprep.subr.bf16.mxu0 %v6074_v57 }
  0x93   : > { %2147 = vmatprep.mubr.f32.mxu1 %v6571_v7 }
  0x94   : > { %5444 = vmatmul.mubr.msk.f32.gmra.mrb[58].mxu0 %vm439_vm0, %v6909_v51 }
  0x95   : > { %1621 = vmatprep.mubr.f32.mxu0 %v6571_v7  ;;  %6077 = vmatpush1.bf16.msra.mxu0 %v6076_v63 }
  0x96   : > { %5495 = vmatmul.mubr.msk.f32.vlgmr.msra.gmra.mrb[56].mxu1 %vm439_vm0, %v6909_v51  ;;  %6079 = vmatprep.subr.bf16.mxu0 %v6078_v1  ;;  %v5542_v51 = vld [vmem:[%s9444_s1 + $0x398] sm:$0xff] }
  0x97   : > { %2153 = vmatprep.mubr.f32.mxu1 %v6571_v7  ;;  %v6086_v12 = vpack.c.bf16 %v5542_v51, %v5540_v10 }
  0x98   : > { %5445 = vmatmul.mubr.msk.f32.gmra.mrb[60].mxu0 %vm439_vm0, %v6942_v0 }
  0x99   : > { %1627 = vmatprep.mubr.f32.mxu0 %v6571_v7  ;;  %6081 = vmatpush1.bf16.msra.mxu0 %v6080_v5 }
  0x9a   : > { %5496 = vmatmul.mubr.msk.f32.gmra.mrb[58].mxu1 %vm439_vm0, %v6942_v0  ;;  %6083 = vmatprep.subr.bf16.mxu0 %v6082_v6 }
  0x9b   : > { %2159 = vmatprep.mubr.f32.mxu1 %v6571_v7 }
  0x9c   : > { %5446 = vmatmul.mubr.msk.f32.gmra.mrb[62].mxu0 %vm439_vm0, %v6975_v14 }
  0x9d   : > { %1633 = vmatprep.mubr.f32.mxu0 %v6571_v7  ;;  %6085 = vmatpush1.bf16.msra.mxu0 %v6084_v11  ;;  %v2489_v11 = vld [vmem:[%s6806_s29 + $0x48] sm:$0xff] }
  0x9e   : > { %5497 = vmatmul.mubr.msk.f32.gmra.mrb[60].mxu1 %vm439_vm0, %v6975_v14  ;;  %6087 = vmatprep.subr.bf16.mxu0 %v6086_v12 }
  0x9f   : > { %2165 = vmatprep.mubr.f32.mxu1 %v6571_v7 }
  0xa0   : > { %5447 = vmatmul.mubr.msk.f32.gmra.mrb[64].mxu0 %vm439_vm0, %v6996_v23 }
  0xa1   : > { %1639 = vmatprep.mubr.f32.mxu0 %v6571_v7  ;;  %6089 = vmatpush1.bf16.msra.mxu0 %v6088_v18 }
  0xa2   : > { %5498 = vmatmul.mubr.msk.f32.gmra.mrb[62].mxu1 %vm439_vm0, %v6996_v23  ;;  %6091 = vmatprep.subr.bf16.mxu0 %v6090_v19 }
  0xa3   : > { %2171 = vmatprep.mubr.f32.mxu1 %v6571_v7 }
  0xa4   : > { %5448 = vmatmul.mubr.msk.f32.gmra.mrb[66].mxu0 %vm439_vm0, %v7011_v28 }
  0xa5   : > { %1645 = vmatprep.mubr.f32.mxu0 %v6571_v7  ;;  %6093 = vmatpush1.bf16.msra.mxu0 %v6092_v22 }
  0xa6   : > { %5499 = vmatmul.mubr.msk.f32.gmra.mrb[64].mxu1 %vm439_vm0, %v7011_v28 }
  0xa7   : > { %2177 = vmatprep.mubr.f32.mxu1 %v6571_v7 }
  0xa8   : > { %5449 = vmatmul.mubr.msk.f32.gmra.mrb[68].mxu0 %vm439_vm0, %v7020_v31 }
  0xa9   : > { %1651 = vmatprep.mubr.f32.mxu0 %v6571_v7 }
  0xaa   : > { %5500 = vmatmul.mubr.msk.f32.gmra.mrb[66].mxu1 %vm439_vm0, %v7020_v31 }
  0xab   : > { %2183 = vmatprep.mubr.f32.mxu1 %v6571_v7 }
  0xac   : > { %5450 = vmatmul.mubr.msk.f32.gmra.mrb[70].mxu0 %vm439_vm0, %v7029_v32 }
  0xad   : > { %1657 = vmatprep.mubr.f32.mxu0 %v6571_v7 }
  0xae   : > { %5501 = vmatmul.mubr.msk.f32.gmra.mrb[68].mxu1 %vm439_vm0, %v7029_v32 }
  0xaf   : > { %2189 = vmatprep.mubr.f32.mxu1 %v6571_v7 }
  0xb0   : > { %5451 = vmatmul.mubr.msk.f32.gmra.mrb[72].mxu0 %vm439_vm0, %v7038_v33 }
  0xb1   : > { %1663 = vmatprep.mubr.f32.mxu0 %v6571_v7 }
  0xb2   : > { %5502 = vmatmul.mubr.msk.f32.gmra.mrb[70].mxu1 %vm439_vm0, %v7038_v33 }
  0xb3   : > { %2195 = vmatprep.mubr.f32.mxu1 %v6571_v7 }
  0xb4   : > { %5452 = vmatmul.mubr.msk.f32.gmra.mrb[74].mxu0 %vm439_vm0, %v7047_v34 }
  0xb5   : > { %1669 = vmatprep.mubr.f32.mxu0 %v6571_v7 }
  0xb6   : > { %5503 = vmatmul.mubr.msk.f32.gmra.mrb[72].mxu1 %vm439_vm0, %v7047_v34  ;;  %v7435_v34 = vld [vmem:[%s6806_s29 + $0xe8] sm:$0xff] }
  0xb7   : > { %2201 = vmatprep.mubr.f32.mxu1 %v6571_v7 }
  0xb8   : > { %5453 = vmatmul.mubr.msk.f32.gmra.mrb[76].mxu0 %vm439_vm0, %v7056_v35 }
  0xb9   : > { %1675 = vmatprep.mubr.f32.mxu0 %v6571_v7 }
  0xba   : > { %5504 = vmatmul.mubr.msk.f32.gmra.mrb[74].mxu1 %vm439_vm0, %v7056_v35 }
  0xbb   : > { %2207 = vmatprep.mubr.f32.mxu1 %v6571_v7 }
  0xbc   : > { %5454 = vmatmul.mubr.msk.f32.gmra.mrb[78].mxu0 %vm439_vm0, %v7065_v36 }
  0xbd   : > { %1681 = vmatprep.mubr.f32.mxu0 %v6571_v7 }
  0xbe   : > { %5505 = vmatmul.mubr.msk.f32.gmra.mrb[76].mxu1 %vm439_vm0, %v7065_v36 }
  0xbf   : > { %2213 = vmatprep.mubr.f32.mxu1 %v6571_v7 }
  0xc0   : > { %5455 = vmatmul.mubr.msk.f32.gmra.mrb[80].mxu0 %vm439_vm0, %v7074_v37 }
  0xc1   : > { %1687 = vmatprep.mubr.f32.mxu0 %v6571_v7 }
  0xc2   : > { %5506 = vmatmul.mubr.msk.f32.gmra.mrb[78].mxu1 %vm439_vm0, %v7074_v37 }
  0xc3   : > { %2219 = vmatprep.mubr.f32.mxu1 %v6571_v7 }
  0xc4   : > { %5456 = vmatmul.mubr.msk.f32.gmra.mrb[82].mxu0 %vm439_vm0, %v7083_v38 }
  0xc5   : > { %1693 = vmatprep.mubr.f32.mxu0 %v6571_v7 }
  0xc6   : > { %5507 = vmatmul.mubr.msk.f32.gmra.mrb[80].mxu1 %vm439_vm0, %v7083_v38 }
  0xc7   : > { %2225 = vmatprep.mubr.f32.mxu1 %v6571_v7 }
  0xc8   : > { %5457 = vmatmul.mubr.msk.f32.gmra.mrb[84].mxu0 %vm439_vm0, %v7092_v39 }
  0xc9   : > { %1699 = vmatprep.mubr.f32.mxu0 %v6571_v7 }
  0xca   : > { %5508 = vmatmul.mubr.msk.f32.gmra.mrb[82].mxu1 %vm439_vm0, %v7092_v39 }
  0xcb   : > { %2231 = vmatprep.mubr.f32.mxu1 %v6571_v7 }
  0xcc   : > { %5458 = vmatmul.mubr.msk.f32.gmra.mrb[86].mxu0 %vm439_vm0, %v7101_v40 }
  0xcd   : > { %1705 = vmatprep.mubr.f32.mxu0 %v6571_v7 }
  0xce   : > { %5509 = vmatmul.mubr.msk.f32.gmra.mrb[84].mxu1 %vm439_vm0, %v7101_v40 }
  0xcf   : > { %2237 = vmatprep.mubr.f32.mxu1 %v6571_v7 }
  0xd0   : > { %5459 = vmatmul.mubr.msk.f32.gmra.mrb[88].mxu0 %vm439_vm0, %v7110_v41 }
  0xd1   : > { %1711 = vmatprep.mubr.f32.mxu0 %v6571_v7 }
  0xd2   : > { %5510 = vmatmul.mubr.msk.f32.gmra.mrb[86].mxu1 %vm439_vm0, %v7110_v41 }
  0xd3   : > { %2243 = vmatprep.mubr.f32.mxu1 %v6571_v7 }
  0xd4   : > { %5460 = vmatmul.mubr.msk.f32.gmra.mrb[90].mxu0 %vm439_vm0, %v7119_v42 }
  0xd5   : > { %1717 = vmatprep.mubr.f32.mxu0 %v6571_v7 }
  0xd6   : > { %5511 = vmatmul.mubr.msk.f32.gmra.mrb[88].mxu1 %vm439_vm0, %v7119_v42  ;;  %v7449_v42 = vld [vmem:[%s6806_s29 + $0xf0] sm:$0xff] }
  0xd7   : > { %2249 = vmatprep.mubr.f32.mxu1 %v6571_v7 }
  0xd8   : > { %5461 = vmatmul.mubr.msk.f32.gmra.mrb[92].mxu0 %vm439_vm0, %v7128_v43 }
  0xd9   : > { %1723 = vmatprep.mubr.f32.mxu0 %v6571_v7 }
  0xda   : > { %5512 = vmatmul.mubr.msk.f32.gmra.mrb[90].mxu1 %vm439_vm0, %v7128_v43 }
  0xdb   : > { %2255 = vmatprep.mubr.f32.mxu1 %v6571_v7 }
  0xdc   : > { %5462 = vmatmul.mubr.msk.f32.gmra.mrb[94].mxu0 %vm439_vm0, %v7137_v44 }
  0xdd   : > { %1729 = vmatprep.mubr.f32.mxu0 %v6571_v7 }
  0xde   : > { %5513 = vmatmul.mubr.msk.f32.gmra.mrb[92].mxu1 %vm439_vm0, %v7137_v44 }
  0xdf   : > { %2261 = vmatprep.mubr.f32.mxu1 %v6571_v7 }
  0xe0   : > { %5463 = vmatmul.mubr.msk.f32.gmra.mrb[96].mxu0 %vm439_vm0, %v7146_v45 }
  0xe1   : > { %1735 = vmatprep.mubr.f32.mxu0 %v6571_v7 }
  0xe2   : > { %5514 = vmatmul.mubr.msk.f32.gmra.mrb[94].mxu1 %vm439_vm0, %v7146_v45 }
  0xe3   : > { %2267 = vmatprep.mubr.f32.mxu1 %v6571_v7 }
  0xe4   : > { %5464 = vmatmul.mubr.msk.f32.gmra.mrb[98].mxu0 %vm439_vm0, %v7155_v46 }
  0xe5   : > { %1741 = vmatprep.mubr.f32.mxu0 %v6571_v7 }
  0xe6   : > { %5515 = vmatmul.mubr.msk.f32.gmra.mrb[96].mxu1 %vm439_vm0, %v7155_v46 }
  0xe7   : > { %2273 = vmatprep.mubr.f32.mxu1 %v6571_v7 }
  0xe8   : > { %5465 = vmatmul.mubr.msk.f32.gmra.mrb[100].mxu0 %vm439_vm0, %v7164_v47 }
  0xe9   : > { %1747 = vmatprep.mubr.f32.mxu0 %v6571_v7 }
  0xea   : > { %5516 = vmatmul.mubr.msk.f32.gmra.mrb[98].mxu1 %vm439_vm0, %v7164_v47 }
  0xeb   : > { %2279 = vmatprep.mubr.f32.mxu1 %v6571_v7 }
  0xec   : > { %5466 = vmatmul.mubr.msk.f32.gmra.mrb[102].mxu0 %vm439_vm0, %v7173_v48 }
  0xed   : > { %1753 = vmatprep.mubr.f32.mxu0 %v6571_v7 }
  0xee   : > { %5517 = vmatmul.mubr.msk.f32.gmra.mrb[100].mxu1 %vm439_vm0, %v7173_v48 }
  0xef   : > { %2285 = vmatprep.mubr.f32.mxu1 %v6571_v7 }
  0xf0   : > { %5467 = vmatmul.mubr.msk.f32.gmra.mrb[104].mxu0 %vm439_vm0, %v7182_v49 }
  0xf1   : > { %1759 = vmatprep.mubr.f32.mxu0 %v6571_v7 }
  0xf2   : > { %5518 = vmatmul.mubr.msk.f32.gmra.mrb[102].mxu1 %vm439_vm0, %v7182_v49 }
  0xf3   : > { %v590_v24 = vpop.f32.mrb[0].mxu0  ;;  %2291 = vmatprep.mubr.f32.mxu1 %v6571_v7 }
  0xf4   : > { %v592_v25 = vpop.f32.mrb[1].mxu0  ;;  %5468 = vmatmul.mubr.msk.f32.gmra.mrb[106].mxu0 %vm439_vm0, %v7191_v50 }
  0xf5   : > { %759 = vst.msk [vmem:[#allocation2 + $0x8] sm:$0xff] %vm758_vm1, %v592_v25  ;;  %1765 = vmatprep.mubr.f32.mxu0 %v6571_v7 }
  0xf6   : > { %5519 = vmatmul.mubr.msk.f32.gmra.mrb[104].mxu1 %vm439_vm0, %v7191_v50 }
  0xf7   : > { %v596_v26 = vpop.f32.mrb[2].mxu0  ;;  %2297 = vmatprep.mubr.f32.mxu1 %v6571_v7 }
  0xf8   : > { %v598_v27 = vpop.f32.mrb[3].mxu0  ;;  %5469 = vmatmul.mubr.msk.f32.gmra.mrb[108].mxu0 %vm439_vm0, %v7219_v60  ;;  %v1073_v30 = vpop.f32.mrb[0].mxu1 }
  0xf9   : > { %761 = vst.msk [vmem:[#allocation2 + $0x18] sm:$0xff] %vm758_vm1, %v598_v27  ;;  %v7429_v31 = vadd.f32 %v1073_v30, %v590_v24  ;;  %1771 = vmatprep.mubr.f32.mxu0 %v6571_v7  ;;  %v1075_v32 = vpop.f32.mrb[1].mxu1 }
  0xfa   : > { %5520 = vmatmul.mubr.msk.f32.gmra.mrb[106].mxu1 %vm439_vm0, %v7219_v60 }
  0xfb   : > { %v602_v33 = vpop.f32.mrb[4].mxu0  ;;  %2303 = vmatprep.mubr.f32.mxu1 %v6571_v7 }
  0xfc   : > { %v604_v35 = vpop.f32.mrb[5].mxu0  ;;  %v815_v36 = vld [vmem:[#allocation2 + $0x8] sm:$0xff]  ;;  %5470 = vmatmul.mubr.msk.f32.gmra.mrb[110].mxu0 %vm439_vm0, %v7435_v34  ;;  %v1079_v37 = vpop.f32.mrb[2].mxu1 }
  0xfd   : > { %763 = vst.msk [vmem:[#allocation2 + $0x28] sm:$0xff] %vm758_vm1, %v604_v35  ;;  %v1241_v38 = vadd.f32 %v1075_v32, %v815_v36  ;;  %v7441_v39 = vadd.f32 %v1079_v37, %v596_v26  ;;  %2685 = vmatprep.mubr.f32.mxu0 %v6571_v7  ;;  %v1081_v40 = vpop.f32.mrb[3].mxu1  ;;  %v2491_v32 = vld [vmem:[%s6806_s29 + $0x58] sm:$0xff] }
  0xfe   : > { %5521 = vmatmul.mubr.msk.f32.gmra.mrb[108].mxu1 %vm439_vm0, %v7435_v34 }
  0xff   : > { %1297 = vst.msk [vmem:[#allocation2 + $0x8] sm:$0xff] %vm758_vm1, %v1241_v38  ;;  %v608_v41 = vpop.f32.mrb[6].mxu0  ;;  %2309 = vmatprep.mubr.f32.mxu1 %v6571_v7 }
 0x100   : > { %v610_v43 = vpop.f32.mrb[7].mxu0  ;;  %v817_v44 = vld [vmem:[#allocation2 + $0x18] sm:$0xff]  ;;  %5547 = vmatmul.mubr.msk.f32.vlgmr.msra.gmra.mrb[112].mxu0 %vm439_vm0, %v6942_v0  ;;  %v1085_v45 = vpop.f32.mrb[4].mxu1 }
 0x101   : > { %765 = vst.msk [vmem:[#allocation2 + $0x38] sm:$0xff] %vm758_vm1, %v610_v43  ;;  %v1243_v46 = vadd.f32 %v1081_v40, %v817_v44  ;;  %v7454_v47 = vadd.f32 %v1085_v45, %v602_v33  ;;  %2691 = vmatprep.mubr.f32.mxu0 %v6571_v7  ;;  %v1087_v48 = vpop.f32.mrb[5].mxu1  ;;  %v2492_v43 = vld [vmem:[%s6806_s29 + $0x60] sm:$0xff] }
 0x102   : > { %5522 = vmatmul.mubr.msk.f32.gmra.mrb[110].mxu1 %vm439_vm0, %v7449_v42 }
 0x103   : > { %1299 = vst.msk [vmem:[#allocation2 + $0x18] sm:$0xff] %vm758_vm1, %v1243_v46  ;;  %v614_v49 = vpop.f32.mrb[8].mxu0 }
 0x104   : > { %v616_v50 = vpop.f32.mrb[9].mxu0  ;;  %v819_v52 = vld [vmem:[#allocation2 + $0x28] sm:$0xff]  ;;  %5548 = vmatmul.mubr.msk.f32.gmra.mrb[114].mxu0 %vm439_vm0, %v6975_v14  ;;  %v1091_v0 = vpop.f32.mrb[6].mxu1 }
 0x105   : > { %767 = vst.msk [vmem:[#allocation2 + $0x48] sm:$0xff] %vm758_vm1, %v616_v50  ;;  %v1245_v53 = vadd.f32 %v1087_v48, %v819_v52  ;;  %v7463_v54 = vadd.f32 %v1091_v0, %v608_v41  ;;  %2697 = vmatprep.mubr.f32.mxu0 %v6571_v7  ;;  %v1093_v55 = vpop.f32.mrb[7].mxu1  ;;  %v2493_v0 = vld [vmem:[%s6806_s29 + $0x68] sm:$0xff] }
 0x107   : > { %1301 = vst.msk [vmem:[#allocation2 + $0x28] sm:$0xff] %vm758_vm1, %v1245_v53  ;;  %v620_v56 = vpop.f32.mrb[10].mxu0 }
 0x108   : > { %v622_v57 = vpop.f32.mrb[11].mxu0  ;;  %v821_v58 = vld [vmem:[#allocation2 + $0x38] sm:$0xff]  ;;  %5549 = vmatmul.mubr.msk.f32.gmra.mrb[116].mxu0 %vm439_vm0, %v6996_v23  ;;  %v1097_v59 = vpop.f32.mrb[8].mxu1 }
 0x109   : > { %769 = vst.msk [vmem:[#allocation2 + $0x58] sm:$0xff] %vm758_vm1, %v622_v57  ;;  %v1247_v14 = vadd.f32 %v1093_v55, %v821_v58  ;;  %v7470_v60 = vadd.f32 %v1097_v59, %v614_v49  ;;  %2703 = vmatprep.mubr.f32.mxu0 %v6571_v7  ;;  %v1099_v61 = vpop.f32.mrb[9].mxu1 }
 0x10b   : > { %1303 = vst.msk [vmem:[#allocation2 + $0x38] sm:$0xff] %vm758_vm1, %v1247_v14  ;;  %v626_v62 = vpop.f32.mrb[12].mxu0 }
 0x10c   : > { %v628_v63 = vpop.f32.mrb[13].mxu0  ;;  %v823_v1 = vld [vmem:[#allocation2 + $0x48] sm:$0xff]  ;;  %5550 = vmatmul.mubr.msk.f32.gmra.mrb[118].mxu0 %vm439_vm0, %v7011_v28  ;;  %v1103_v2 = vpop.f32.mrb[10].mxu1 }
 0x10d   : > { %771 = vst.msk [vmem:[#allocation2 + $0x68] sm:$0xff] %vm758_vm1, %v628_v63  ;;  %v1249_v23 = vadd.f32 %v1099_v61, %v823_v1  ;;  %v7477_v3 = vadd.f32 %v1103_v2, %v620_v56  ;;  %2709 = vmatprep.mubr.f32.mxu0 %v6571_v7  ;;  %v1105_v29 = vpop.f32.mrb[11].mxu1  ;;  %v2494_v61 = vld [vmem:[%s6806_s29 + $0x70] sm:$0xff] }
 0x10f   : > { %1305 = vst.msk [vmem:[#allocation2 + $0x48] sm:$0xff] %vm758_vm1, %v1249_v23  ;;  %v632_v5 = vpop.f32.mrb[14].mxu0 }
 0x110   : > { %v634_v6 = vpop.f32.mrb[15].mxu0  ;;  %v825_v8 = vld [vmem:[#allocation2 + $0x58] sm:$0xff]  ;;  %5551 = vmatmul.mubr.msk.f32.gmra.mrb[120].mxu0 %vm439_vm0, %v2488_v4  ;;  %v1109_v9 = vpop.f32.mrb[12].mxu1 }
 0x111   : > { %773 = vst.msk [vmem:[#allocation2 + $0x78] sm:$0xff] %vm758_vm1, %v634_v6  ;;  %v1251_v28 = vadd.f32 %v1105_v29, %v825_v8  ;;  %v7484_v10 = vadd.f32 %v1109_v9, %v626_v62  ;;  %2715 = vmatprep.mubr.f32.mxu0 %v6571_v7  ;;  %v1111_v51 = vpop.f32.mrb[13].mxu1 }
 0x113   : > { %1307 = vst.msk [vmem:[#allocation2 + $0x58] sm:$0xff] %vm758_vm1, %v1251_v28  ;;  %v638_v12 = vpop.f32.mrb[16].mxu0 }
 0x114   : > { %v640_v13 = vpop.f32.mrb[17].mxu0  ;;  %v827_v15 = vld [vmem:[#allocation2 + $0x68] sm:$0xff]  ;;  %5552 = vmatmul.mubr.msk.f32.gmra.mrb[122].mxu0 %vm439_vm0, %v2489_v11  ;;  %v1115_v16 = vpop.f32.mrb[14].mxu1 }
 0x115   : > { %775 = vst.msk [vmem:[#allocation2 + $0x88] sm:$0xff] %vm758_vm1, %v640_v13  ;;  %v1253_v17 = vadd.f32 %v1111_v51, %v827_v15  ;;  %v7491_v18 = vadd.f32 %v1115_v16, %v632_v5  ;;  %2721 = vmatprep.mubr.f32.mxu0 %v6571_v7  ;;  %v1117_v19 = vpop.f32.mrb[15].mxu1  ;;  %v2495_v5 = vld [vmem:[%s6806_s29 + $0x78] sm:$0xff]  ;;  %v2496_v13 = vld [vmem:[%s6806_s29 + $0x80] sm:$0xff] }
 0x117   : > { %1309 = vst.msk [vmem:[#allocation2 + $0x68] sm:$0xff] %vm758_vm1, %v1253_v17  ;;  %v644_v21 = vpop.f32.mrb[18].mxu0 }
 0x118   : > { %v646_v22 = vpop.f32.mrb[19].mxu0  ;;  %v829_v24 = vld [vmem:[#allocation2 + $0x78] sm:$0xff]  ;;  %5553 = vmatmul.mubr.msk.f32.gmra.mrb[124].mxu0 %vm439_vm0, %v2490_v20  ;;  %v1121_v25 = vpop.f32.mrb[16].mxu1 }
 0x119   : > { %777 = vst.msk [vmem:[#allocation2 + $0x98] sm:$0xff] %vm758_vm1, %v646_v22  ;;  %v1255_v26 = vadd.f32 %v1117_v19, %v829_v24  ;;  %v7498_v27 = vadd.f32 %v1121_v25, %v638_v12  ;;  %2727 = vmatprep.mubr.f32.mxu0 %v6571_v7  ;;  %v1123_v30 = vpop.f32.mrb[17].mxu1  ;;  %v2497_v24 = vld [vmem:[%s6806_s29 + $0x88] sm:$0xff] }
 0x11b   : > { %1311 = vst.msk [vmem:[#allocation2 + $0x78] sm:$0xff] %vm758_vm1, %v1255_v26  ;;  %v650_v33 = vpop.f32.mrb[20].mxu0 }
 0x11c   : > { %v652_v35 = vpop.f32.mrb[21].mxu0  ;;  %v831_v36 = vld [vmem:[#allocation2 + $0x88] sm:$0xff]  ;;  %5554 = vmatmul.mubr.msk.f32.gmra.mrb[126].mxu0 %vm439_vm0, %v2491_v32  ;;  %v1127_v37 = vpop.f32.mrb[18].mxu1 }
 0x11d   : > { %779 = vst.msk [vmem:[#allocation2 + $0xa8] sm:$0xff] %vm758_vm1, %v652_v35  ;;  %v1257_v38 = vadd.f32 %v1123_v30, %v831_v36  ;;  %v7505_v40 = vadd.f32 %v1127_v37, %v644_v21  ;;  %2733 = vmatprep.mubr.f32.mxu0 %v6571_v7  ;;  %v1129_v41 = vpop.f32.mrb[19].mxu1  ;;  %v2498_v37 = vld [vmem:[%s6806_s29 + $0x90] sm:$0xff] }
 0x11f   : > { %1313 = vst.msk [vmem:[#allocation2 + $0x88] sm:$0xff] %vm758_vm1, %v1257_v38  ;;  %v656_v44 = vpop.f32.mrb[22].mxu0 }
 0x120   : > { %v658_v45 = vpop.f32.mrb[23].mxu0  ;;  %v833_v46 = vld [vmem:[#allocation2 + $0x98] sm:$0xff]  ;;  %5555 = vmatmul.mubr.msk.f32.gmra.mrb[128].mxu0 %vm439_vm0, %v2492_v43  ;;  %v1133_v48 = vpop.f32.mrb[20].mxu1 }
 0x121   : > { %781 = vst.msk [vmem:[#allocation2 + $0xb8] sm:$0xff] %vm758_vm1, %v658_v45  ;;  %v1259_v49 = vadd.f32 %v1129_v41, %v833_v46  ;;  %v7512_v50 = vadd.f32 %v1133_v48, %v650_v33  ;;  %2739 = vmatprep.mubr.f32.mxu0 %v6571_v7  ;;  %v1135_v52 = vpop.f32.mrb[21].mxu1 }
 0x123   : > { %1315 = vst.msk [vmem:[#allocation2 + $0x98] sm:$0xff] %vm758_vm1, %v1259_v49  ;;  %v662_v53 = vpop.f32.mrb[24].mxu0  ;;  %v2499_v49 = vld [vmem:[%s6806_s29 + $0x98] sm:$0xff] }
 0x124   : > { %v664_v55 = vpop.f32.mrb[25].mxu0  ;;  %v835_v56 = vld [vmem:[#allocation2 + $0xa8] sm:$0xff]  ;;  %5556 = vmatmul.mubr.msk.f32.gmra.mrb[130].mxu0 %vm439_vm0, %v2493_v0  ;;  %v1139_v57 = vpop.f32.mrb[22].mxu1 }
 0x125   : > { %783 = vst.msk [vmem:[#allocation2 + $0xc8] sm:$0xff] %vm758_vm1, %v664_v55  ;;  %v1261_v58 = vadd.f32 %v1135_v52, %v835_v56  ;;  %v7519_v59 = vadd.f32 %v1139_v57, %v656_v44  ;;  %2745 = vmatprep.mubr.f32.mxu0 %v6571_v7  ;;  %v1141_v14 = vpop.f32.mrb[23].mxu1 }
 0x127   : > { %1317 = vst.msk [vmem:[#allocation2 + $0xa8] sm:$0xff] %vm758_vm1, %v1261_v58  ;;  %v668_v62 = vpop.f32.mrb[26].mxu0 }
 0x128   : > { %v670_v63 = vpop.f32.mrb[27].mxu0  ;;  %v837_v1 = vld [vmem:[#allocation2 + $0xb8] sm:$0xff]  ;;  %5557 = vmatmul.mubr.msk.f32.gmra.mrb[132].mxu0 %vm439_vm0, %v2494_v61  ;;  %v1145_v2 = vpop.f32.mrb[24].mxu1 }
 0x129   : > { %785 = vst.msk [vmem:[#allocation2 + $0xd8] sm:$0xff] %vm758_vm1, %v670_v63  ;;  %v1263_v23 = vadd.f32 %v1141_v14, %v837_v1  ;;  %v7526_v29 = vadd.f32 %v1145_v2, %v662_v53  ;;  %2751 = vmatprep.mubr.f32.mxu0 %v6571_v7  ;;  %v1147_v4 = vpop.f32.mrb[25].mxu1  ;;  %v2500_v14 = vld [vmem:[%s6806_s29 + $0xa0] sm:$0xff] }
 0x12b   : > { %1319 = vst.msk [vmem:[#allocation2 + $0xb8] sm:$0xff] %vm758_vm1, %v1263_v23  ;;  %v674_v6 = vpop.f32.mrb[28].mxu0 }
 0x12c   : > { %v676_v8 = vpop.f32.mrb[29].mxu0  ;;  %v839_v9 = vld [vmem:[#allocation2 + $0xc8] sm:$0xff]  ;;  %5558 = vmatmul.mubr.msk.f32.gmra.mrb[134].mxu0 %vm439_vm0, %v2495_v5  ;;  %v1151_v28 = vpop.f32.mrb[26].mxu1 }
 0x12d   : > { %787 = vst.msk [vmem:[#allocation2 + $0xe8] sm:$0xff] %vm758_vm1, %v676_v8  ;;  %v1265_v51 = vadd.f32 %v1147_v4, %v839_v9  ;;  %v7533_v11 = vadd.f32 %v1151_v28, %v668_v62  ;;  %2757 = vmatprep.mubr.f32.mxu0 %v6571_v7  ;;  %v1153_v12 = vpop.f32.mrb[27].mxu1  ;;  %v2501_v5 = vld [vmem:[%s6806_s29 + $0xa8] sm:$0xff] }
 0x12f   : > { %1321 = vst.msk [vmem:[#allocation2 + $0xc8] sm:$0xff] %vm758_vm1, %v1265_v51  ;;  %v680_v15 = vpop.f32.mrb[30].mxu0 }
 0x130   : > { %v682_v16 = vpop.f32.mrb[31].mxu0  ;;  %v841_v17 = vld [vmem:[#allocation2 + $0xd8] sm:$0xff]  ;;  %5559 = vmatmul.mubr.msk.f32.gmra.mrb[136].mxu0 %vm439_vm0, %v2496_v13  ;;  %v1157_v19 = vpop.f32.mrb[28].mxu1 }
 0x131   : > { %789 = vst.msk [vmem:[#allocation2 + $0xf8] sm:$0xff] %vm758_vm1, %v682_v16  ;;  %v1267_v20 = vadd.f32 %v1153_v12, %v841_v17  ;;  %v7540_v21 = vadd.f32 %v1157_v19, %v674_v6  ;;  %2763 = vmatprep.mubr.f32.mxu0 %v6571_v7  ;;  %v1159_v22 = vpop.f32.mrb[29].mxu1 }
 0x133   : > { %1323 = vst.msk [vmem:[#allocation2 + $0xd8] sm:$0xff] %vm758_vm1, %v1267_v20  ;;  %v686_v25 = vpop.f32.mrb[32].mxu0 }
 0x134   : > { %v688_v26 = vpop.f32.mrb[33].mxu0  ;;  %v843_v30 = vld [vmem:[#allocation2 + $0xe8] sm:$0xff]  ;;  %5560 = vmatmul.mubr.msk.f32.gmra.mrb[138].mxu0 %vm439_vm0, %v2497_v24  ;;  %v1163_v32 = vpop.f32.mrb[30].mxu1 }
 0x135   : > { %791 = vst.msk [vmem:[#allocation2 + $0x108] sm:$0xff] %vm758_vm1, %v688_v26  ;;  %v1269_v33 = vadd.f32 %v1159_v22, %v843_v30  ;;  %v7547_v35 = vadd.f32 %v1163_v32, %v680_v15  ;;  %2769 = vmatprep.mubr.f32.mxu0 %v6571_v7  ;;  %v1165_v36 = vpop.f32.mrb[31].mxu1  ;;  %v2502_v15 = vld [vmem:[%s6806_s29 + $0xb0] sm:$0xff]  ;;  %v2503_v26 = vld [vmem:[%s6806_s29 + $0xb8] sm:$0xff] }
 0x137   : > { %1325 = vst.msk [vmem:[#allocation2 + $0xe8] sm:$0xff] %vm758_vm1, %v1269_v33  ;;  %v692_v38 = vpop.f32.mrb[34].mxu0 }
 0x138   : > { %v694_v41 = vpop.f32.mrb[35].mxu0  ;;  %v845_v43 = vld [vmem:[#allocation2 + $0xf8] sm:$0xff]  ;;  %5561 = vmatmul.mubr.msk.f32.gmra.mrb[140].mxu0 %vm439_vm0, %v2498_v37  ;;  %v1169_v44 = vpop.f32.mrb[32].mxu1 }
 0x139   : > { %793 = vst.msk [vmem:[#allocation2 + $0x118] sm:$0xff] %vm758_vm1, %v694_v41  ;;  %v1271_v45 = vadd.f32 %v1165_v36, %v845_v43  ;;  %v7554_v46 = vadd.f32 %v1169_v44, %v686_v25  ;;  %2775 = vmatprep.mubr.f32.mxu0 %v6571_v7  ;;  %v1171_v48 = vpop.f32.mrb[33].mxu1  ;;  %v2504_v43 = vld [vmem:[%s6806_s29 + $0xc0] sm:$0xff] }
 0x13b   : > { %1327 = vst.msk [vmem:[#allocation2 + $0xf8] sm:$0xff] %vm758_vm1, %v1271_v45  ;;  %v698_v52 = vpop.f32.mrb[36].mxu0 }
 0x13c   : > { %v700_v0 = vpop.f32.mrb[37].mxu0  ;;  %v847_v53 = vld [vmem:[#allocation2 + $0x108] sm:$0xff]  ;;  %5562 = vmatmul.mubr.msk.f32.gmra.mrb[142].mxu0 %vm439_vm0, %v2499_v49  ;;  %v1175_v55 = vpop.f32.mrb[34].mxu1 }
 0x13d   : > { %795 = vst.msk [vmem:[#allocation2 + $0x128] sm:$0xff] %vm758_vm1, %v700_v0  ;;  %v1273_v56 = vadd.f32 %v1171_v48, %v847_v53  ;;  %v7561_v57 = vadd.f32 %v1175_v55, %v692_v38  ;;  %2781 = vmatprep.mubr.f32.mxu0 %v6571_v7  ;;  %v1177_v58 = vpop.f32.mrb[35].mxu1  ;;  %v2505_v55 = vld [vmem:[%s6806_s29 + $0xc8] sm:$0xff] }
 0x13f   : > { %1329 = vst.msk [vmem:[#allocation2 + $0x108] sm:$0xff] %vm758_vm1, %v1273_v56  ;;  %v704_v61 = vpop.f32.mrb[38].mxu0 }
 0x140   : > { %v706_v62 = vpop.f32.mrb[39].mxu0  ;;  %v849_v63 = vld [vmem:[#allocation2 + $0x118] sm:$0xff]  ;;  %5563 = vmatmul.mubr.msk.f32.gmra.mrb[144].mxu0 %vm439_vm0, %v2500_v14  ;;  %v1181_v1 = vpop.f32.mrb[36].mxu1 }
 0x141   : > { %797 = vst.msk [vmem:[#allocation2 + $0x138] sm:$0xff] %vm758_vm1, %v706_v62  ;;  %v1275_v2 = vadd.f32 %v1177_v58, %v849_v63  ;;  %v7568_v23 = vadd.f32 %v1181_v1, %v698_v52  ;;  %2787 = vmatprep.mubr.f32.mxu0 %v6571_v7  ;;  %v1183_v4 = vpop.f32.mrb[37].mxu1 }
 0x143   : > { %1331 = vst.msk [vmem:[#allocation2 + $0x118] sm:$0xff] %vm758_vm1, %v1275_v2  ;;  %v710_v6 = vpop.f32.mrb[40].mxu0  ;;  %v2506_v2 = vld [vmem:[%s6806_s29 + $0xd0] sm:$0xff] }
 0x144   : > { %v712_v8 = vpop.f32.mrb[41].mxu0  ;;  %v851_v9 = vld [vmem:[#allocation2 + $0x128] sm:$0xff]  ;;  %5564 = vmatmul.mubr.msk.f32.gmra.mrb[146].mxu0 %vm439_vm0, %v2501_v5  ;;  %v1187_v28 = vpop.f32.mrb[38].mxu1 }
 0x145   : > { %799 = vst.msk [vmem:[#allocation2 + $0x148] sm:$0xff] %vm758_vm1, %v712_v8  ;;  %v1277_v51 = vadd.f32 %v1183_v4, %v851_v9  ;;  %v7575_v12 = vadd.f32 %v1187_v28, %v704_v61  ;;  %2793 = vmatprep.mubr.f32.mxu0 %v6571_v7  ;;  %v1189_v13 = vpop.f32.mrb[39].mxu1 }
 0x147   : > { %1333 = vst.msk [vmem:[#allocation2 + $0x128] sm:$0xff] %vm758_vm1, %v1277_v51  ;;  %v716_v16 = vpop.f32.mrb[42].mxu0 }
 0x148   : > { %v718_v17 = vpop.f32.mrb[43].mxu0  ;;  %v853_v19 = vld [vmem:[#allocation2 + $0x138] sm:$0xff]  ;;  %5565 = vmatmul.mubr.msk.f32.gmra.mrb[148].mxu0 %vm439_vm0, %v2502_v15  ;;  %v1193_v20 = vpop.f32.mrb[40].mxu1 }
 0x149   : > { %801 = vst.msk [vmem:[#allocation2 + $0x158] sm:$0xff] %vm758_vm1, %v718_v17  ;;  %v1279_v22 = vadd.f32 %v1189_v13, %v853_v19  ;;  %v7582_v24 = vadd.f32 %v1193_v20, %v710_v6  ;;  %2799 = vmatprep.mubr.f32.mxu0 %v6571_v7  ;;  %v1195_v25 = vpop.f32.mrb[41].mxu1  ;;  %v2507_v13 = vld [vmem:[%s6806_s29 + $0xd8] sm:$0xff] }
 0x14b   : > { %1335 = vst.msk [vmem:[#allocation2 + $0x138] sm:$0xff] %vm758_vm1, %v1279_v22  ;;  %v722_v30 = vpop.f32.mrb[44].mxu0 }
 0x14c   : > { %v724_v32 = vpop.f32.mrb[45].mxu0  ;;  %v855_v33 = vld [vmem:[#allocation2 + $0x148] sm:$0xff]  ;;  %5566 = vmatmul.mubr.msk.f32.gmra.mrb[150].mxu0 %vm439_vm0, %v2503_v26  ;;  %v1199_v36 = vpop.f32.mrb[42].mxu1  ;;  %v2508_v26 = vld [vmem:[%s6806_s29 + $0xe0] sm:$0xff] }
 0x14d   : > { %803 = vst.msk [vmem:[#allocation2 + $0x168] sm:$0xff] %vm758_vm1, %v724_v32  ;;  %v1281_v37 = vadd.f32 %v1195_v25, %v855_v33  ;;  %v7589_v38 = vadd.f32 %v1199_v36, %v716_v16  ;;  %2805 = vmatprep.mubr.f32.mxu0 %v6571_v7  ;;  %v1201_v41 = vpop.f32.mrb[43].mxu1 }
 0x14f   : > { %1337 = vst.msk [vmem:[#allocation2 + $0x148] sm:$0xff] %vm758_vm1, %v1281_v37  ;;  %v728_v44 = vpop.f32.mrb[46].mxu0 }
 0x150   : > { %v730_v45 = vpop.f32.mrb[47].mxu0  ;;  %v857_v48 = vld [vmem:[#allocation2 + $0x158] sm:$0xff]  ;;  %5567 = vmatmul.mubr.msk.f32.gmra.mrb[152].mxu0 %vm439_vm0, %v2504_v43  ;;  %v1205_v49 = vpop.f32.mrb[44].mxu1 }
 0x151   : > { %805 = vst.msk [vmem:[#allocation2 + $0x178] sm:$0xff] %vm758_vm1, %v730_v45  ;;  %v1283_v52 = vadd.f32 %v1201_v41, %v857_v48  ;;  %v7596_v0 = vadd.f32 %v1205_v49, %v722_v30  ;;  %2811 = vmatprep.mubr.f32.mxu0 %v6571_v7  ;;  %v1207_v53 = vpop.f32.mrb[45].mxu1  ;;  %v1353_v49 = vld [vmem:[#allocation2 + $0x8] sm:$0xff] }
 0x153   : > { %1339 = vst.msk [vmem:[#allocation2 + $0x158] sm:$0xff] %vm758_vm1, %v1283_v52  ;;  %v734_v56 = vpop.f32.mrb[48].mxu0 }
 0x154   : > { %v736_v58 = vpop.f32.mrb[49].mxu0  ;;  %v859_v14 = vld [vmem:[#allocation2 + $0x168] sm:$0xff]  ;;  %5568 = vmatmul.mubr.msk.f32.gmra.mrb[154].mxu0 %vm439_vm0, %v2505_v55  ;;  %v1211_v61 = vpop.f32.mrb[46].mxu1 }
 0x155   : > { %807 = vst.msk [vmem:[#allocation2 + $0x188] sm:$0xff] %vm758_vm1, %v736_v58  ;;  %v1285_v62 = vadd.f32 %v1207_v53, %v859_v14  ;;  %v7603_v63 = vadd.f32 %v1211_v61, %v728_v44  ;;  %2817 = vmatprep.mubr.f32.mxu0 %v6571_v7  ;;  %v1213_v1 = vpop.f32.mrb[47].mxu1 }
 0x157   : > { %1341 = vst.msk [vmem:[#allocation2 + $0x168] sm:$0xff] %vm758_vm1, %v1285_v62  ;;  %v740_v4 = vpop.f32.mrb[50].mxu0 }
 0x158   : > { %v742_v5 = vpop.f32.mrb[51].mxu0  ;;  %v861_v6 = vld [vmem:[#allocation2 + $0x178] sm:$0xff]  ;;  %5569 = vmatmul.mubr.msk.f32.gmra.mrb[156].mxu0 %vm439_vm0, %v2506_v2  ;;  %v1217_v8 = vpop.f32.mrb[48].mxu1 }
 0x159   : > { %809 = vst.msk [vmem:[#allocation2 + $0x198] sm:$0xff] %vm758_vm1, %v742_v5  ;;  %v1287_v9 = vadd.f32 %v1213_v1, %v861_v6  ;;  %v7610_v28 = vadd.f32 %v1217_v8, %v734_v56  ;;  %2823 = vmatprep.mubr.f32.mxu0 %v6571_v7  ;;  %v1219_v51 = vpop.f32.mrb[49].mxu1  ;;  %v1355_v1 = vld [vmem:[#allocation2 + $0x18] sm:$0xff] }
 0x15a   : > { %v2511_v5 = vld [vmem:[%s6806_s29 + $0xf8] sm:$0xff] }
 0x15b   : > { %1343 = vst.msk [vmem:[#allocation2 + $0x178] sm:$0xff] %vm758_vm1, %v1287_v9  ;;  %v746_v15 = vpop.f32.mrb[52].mxu0 }
 0x15c   : > { %v748_v16 = vpop.f32.mrb[53].mxu0  ;;  %v863_v17 = vld [vmem:[#allocation2 + $0x188] sm:$0xff]  ;;  %5570 = vmatmul.mubr.msk.f32.gmra.mrb[158].mxu0 %vm439_vm0, %v2507_v13  ;;  %v1223_v19 = vpop.f32.mrb[50].mxu1 }
 0x15d   : > { %811 = vst.msk [vmem:[#allocation2 + $0x1a8] sm:$0xff] %vm758_vm1, %v748_v16  ;;  %v1289_v20 = vadd.f32 %v1219_v51, %v863_v17  ;;  %v7617_v22 = vadd.f32 %v1223_v19, %v740_v4  ;;  %2829 = vmatprep.mubr.f32.mxu0 %v6571_v7  ;;  %v1225_v25 = vpop.f32.mrb[51].mxu1  ;;  %v1357_v13 = vld [vmem:[#allocation2 + $0x28] sm:$0xff] }
 0x15f   : > { %1345 = vst.msk [vmem:[#allocation2 + $0x188] sm:$0xff] %vm758_vm1, %v1289_v20  ;;  %v752_v30 = vpop.f32.mrb[54].mxu0 }
 0x160   : > { %v754_v32 = vpop.f32.mrb[55].mxu0  ;;  %v865_v33 = vld [vmem:[#allocation2 + $0x198] sm:$0xff]  ;;  %5571 = vmatmul.mubr.msk.f32.gmra.mrb[160].mxu0 %vm439_vm0, %v2508_v26  ;;  %v1229_v36 = vpop.f32.mrb[52].mxu1 }
 0x161   : > { %813 = vst.msk [vmem:[#allocation2 + $0x1b8] sm:$0xff] %vm758_vm1, %v754_v32  ;;  %v1291_v37 = vadd.f32 %v1225_v25, %v865_v33  ;;  %v7624_v41 = vadd.f32 %v1229_v36, %v746_v15  ;;  %2835 = vmatprep.mubr.f32.mxu0 %v6571_v7  ;;  %v1231_v43 = vpop.f32.mrb[53].mxu1  ;;  %v1359_v32 = vld [vmem:[#allocation2 + $0x38] sm:$0xff] }
 0x163   : > { %1347 = vst.msk [vmem:[#allocation2 + $0x198] sm:$0xff] %vm758_vm1, %v1291_v37  ;;  %v1611_v44 = vpop.f32.mrb[56].mxu0 }
 0x164   : > { %v1778_v45 = vadd.f32 %v1611_v44, %v7429_v31  ;;  %v867_v48 = vld [vmem:[#allocation2 + $0x1a8] sm:$0xff]  ;;  %v1613_v52 = vpop.f32.mrb[57].mxu0  ;;  %5572 = vmatmul.mubr.msk.f32.gmra.mrb[162].mxu0 %vm439_vm0, %v7435_v34 }
 0x165   : > { %v1293_v53 = vadd.f32 %v1231_v43, %v867_v48  ;;  %v1779_v55 = vadd.f32 %v1613_v52, %v1353_v49  ;;  %v1235_v56 = vpop.f32.mrb[54].mxu1  ;;  %2841 = vmatprep.mubr.f32.mxu0 %v6571_v7  ;;  %v1361_v52 = vld [vmem:[#allocation2 + $0x48] sm:$0xff] }
 0x166   : > { %v7632_v58 = vadd.f32 %v1235_v56, %v752_v30  ;;  %v1237_v14 = vpop.f32.mrb[55].mxu1 }
 0x167   : > { %1349 = vst.msk [vmem:[#allocation2 + $0x1a8] sm:$0xff] %vm758_vm1, %v1293_v53  ;;  %1835 = vst.msk [vmem:[#allocation2 + $0x8] sm:$0xff] %vm758_vm1, %v1779_v55  ;;  %v1617_v31 = vpop.f32.mrb[58].mxu0 }
 0x168   : > { %v1780_v61 = vadd.f32 %v1617_v31, %v7441_v39  ;;  %v869_v62 = vld [vmem:[#allocation2 + $0x1b8] sm:$0xff]  ;;  %v1619_v2 = vpop.f32.mrb[59].mxu0  ;;  %5573 = vmatmul.mubr.msk.f32.gmra.mrb[164].mxu0 %vm439_vm0, %v7449_v42 }
 0x169   : > { %v1295_v34 = vadd.f32 %v1237_v14, %v869_v62  ;;  %v1781_v4 = vadd.f32 %v1619_v2, %v1355_v1  ;;  %2847 = vmatprep.mubr.f32.mxu0 %v6571_v7  ;;  %v2149_v6 = vpop.f32.mrb[56].mxu1  ;;  %v1363_v2 = vld [vmem:[#allocation2 + $0x58] sm:$0xff] }
 0x16a   : > { %v7641_v8 = vadd.f32 %v2149_v6, %v1778_v45  ;;  %v2151_v9 = vpop.f32.mrb[57].mxu1 }
 0x16b   : > { %1351 = vst.msk [vmem:[#allocation2 + $0x1b8] sm:$0xff] %vm758_vm1, %v1295_v34  ;;  %1837 = vst.msk [vmem:[#allocation2 + $0x18] sm:$0xff] %vm758_vm1, %v1781_v4  ;;  %v1623_v39 = vpop.f32.mrb[60].mxu0 }
 0x16c   : > { %v1782_v51 = vadd.f32 %v1623_v39, %v7454_v47  ;;  %v1625_v15 = vpop.f32.mrb[61].mxu0  ;;  %5574 = vmatmul.mubr.msk.f32.gmra.mrb[166].mxu0 %vm439_vm0, %v2511_v5 }
 0x16d   : > { %v1783_v42 = vadd.f32 %v1625_v15, %v1357_v13  ;;  %v2155_v16 = vpop.f32.mrb[58].mxu1  ;;  %v1365_v15 = vld [vmem:[#allocation2 + $0x68] sm:$0xff] }
 0x16e   : > { %v1891_v17 = vld [vmem:[#allocation2 + $0x8] sm:$0xff]  ;;  %v7647_v19 = vadd.f32 %v2155_v16, %v1780_v61  ;;  %v2157_v20 = vpop.f32.mrb[59].mxu1 }
 0x16f   : > { %1839 = vst.msk [vmem:[#allocation2 + $0x28] sm:$0xff] %vm758_vm1, %v1783_v42  ;;  %v2317_v25 = vadd.f32 %v2151_v9, %v1891_v17  ;;  %v1629_v26 = vpop.f32.mrb[62].mxu0 }
 0x170   : > { %v1784_v30 = vadd.f32 %v1629_v26, %v7463_v54  ;;  %v1631_v33 = vpop.f32.mrb[63].mxu0 }
 0x171   : > { %2373 = vst.msk [vmem:[#allocation2 + $0x8] sm:$0xff] %vm758_vm1, %v2317_v25  ;;  %v1785_v47 = vadd.f32 %v1631_v33, %v1359_v32  ;;  %v2161_v36 = vpop.f32.mrb[60].mxu1  ;;  %v1367_v33 = vld [vmem:[#allocation2 + $0x78] sm:$0xff] }
 0x172   : > { %v1893_v37 = vld [vmem:[#allocation2 + $0x18] sm:$0xff]  ;;  %v7652_v43 = vadd.f32 %v2161_v36, %v1782_v51  ;;  %v2163_v44 = vpop.f32.mrb[61].mxu1 }
 0x173   : > { %1841 = vst.msk [vmem:[#allocation2 + $0x38] sm:$0xff] %vm758_vm1, %v1785_v47  ;;  %v2319_v45 = vadd.f32 %v2157_v20, %v1893_v37  ;;  %v1635_v48 = vpop.f32.mrb[64].mxu0 }
 0x174   : > { %v1786_v49 = vadd.f32 %v1635_v48, %v7470_v60  ;;  %v1637_v53 = vpop.f32.mrb[65].mxu0 }
 0x175   : > { %2375 = vst.msk [vmem:[#allocation2 + $0x18] sm:$0xff] %vm758_vm1, %v2319_v45  ;;  %v1787_v54 = vadd.f32 %v1637_v53, %v1361_v52  ;;  %v2167_v55 = vpop.f32.mrb[62].mxu1  ;;  %v1369_v53 = vld [vmem:[#allocation2 + $0x88] sm:$0xff] }
 0x176   : > { %v1895_v56 = vld [vmem:[#allocation2 + $0x28] sm:$0xff]  ;;  %v7657_v14 = vadd.f32 %v2167_v55, %v1784_v30  ;;  %v2169_v31 = vpop.f32.mrb[63].mxu1 }
 0x177   : > { %1843 = vst.msk [vmem:[#allocation2 + $0x48] sm:$0xff] %vm758_vm1, %v1787_v54  ;;  %v2321_v61 = vadd.f32 %v2163_v44, %v1895_v56  ;;  %v1641_v62 = vpop.f32.mrb[66].mxu0 }
 0x178   : > { %v1788_v1 = vadd.f32 %v1641_v62, %v7477_v3  ;;  %v1643_v34 = vpop.f32.mrb[67].mxu0 }
 0x179   : > { %2377 = vst.msk [vmem:[#allocation2 + $0x28] sm:$0xff] %vm758_vm1, %v2321_v61  ;;  %v1789_v60 = vadd.f32 %v1643_v34, %v1363_v2  ;;  %v2173_v4 = vpop.f32.mrb[64].mxu1  ;;  %v1371_v34 = vld [vmem:[#allocation2 + $0x98] sm:$0xff] }
 0x17a   : > { %v1897_v5 = vld [vmem:[#allocation2 + $0x38] sm:$0xff]  ;;  %v7662_v6 = vadd.f32 %v2173_v4, %v1786_v49  ;;  %v2175_v9 = vpop.f32.mrb[65].mxu1 }
 0x17b   : > { %1845 = vst.msk [vmem:[#allocation2 + $0x58] sm:$0xff] %vm758_vm1, %v1789_v60  ;;  %v2323_v39 = vadd.f32 %v2169_v31, %v1897_v5  ;;  %v1647_v51 = vpop.f32.mrb[68].mxu0 }
 0x17c   : > { %v1790_v13 = vadd.f32 %v1647_v51, %v7484_v10  ;;  %v1649_v42 = vpop.f32.mrb[69].mxu0 }
 0x17d   : > { %2379 = vst.msk [vmem:[#allocation2 + $0x38] sm:$0xff] %vm758_vm1, %v2323_v39  ;;  %v1791_v3 = vadd.f32 %v1649_v42, %v1365_v15  ;;  %v2179_v16 = vpop.f32.mrb[66].mxu1  ;;  %v1373_v42 = vld [vmem:[#allocation2 + $0xa8] sm:$0xff] }
 0x17e   : > { %v1899_v17 = vld [vmem:[#allocation2 + $0x48] sm:$0xff]  ;;  %v7667_v20 = vadd.f32 %v2179_v16, %v1788_v1  ;;  %v2181_v25 = vpop.f32.mrb[67].mxu1 }
 0x17f   : > { %1847 = vst.msk [vmem:[#allocation2 + $0x68] sm:$0xff] %vm758_vm1, %v1791_v3  ;;  %v2325_v26 = vadd.f32 %v2175_v9, %v1899_v17  ;;  %v1653_v30 = vpop.f32.mrb[70].mxu0 }
 0x180   : > { %v1792_v32 = vadd.f32 %v1653_v30, %v7491_v18  ;;  %v1655_v47 = vpop.f32.mrb[71].mxu0 }
 0x181   : > { %2381 = vst.msk [vmem:[#allocation2 + $0x48] sm:$0xff] %vm758_vm1, %v2325_v26  ;;  %v1793_v10 = vadd.f32 %v1655_v47, %v1367_v33  ;;  %v2185_v36 = vpop.f32.mrb[68].mxu1  ;;  %v1375_v47 = vld [vmem:[#allocation2 + $0xb8] sm:$0xff] }
 0x182   : > { %v1901_v37 = vld [vmem:[#allocation2 + $0x58] sm:$0xff]  ;;  %v7672_v44 = vadd.f32 %v2185_v36, %v1790_v13  ;;  %v2187_v45 = vpop.f32.mrb[69].mxu1 }
 0x183   : > { %1849 = vst.msk [vmem:[#allocation2 + $0x78] sm:$0xff] %vm758_vm1, %v1793_v10  ;;  %v2327_v48 = vadd.f32 %v2181_v25, %v1901_v37  ;;  %v1659_v49 = vpop.f32.mrb[72].mxu0 }
 0x184   : > { %v1794_v52 = vadd.f32 %v1659_v49, %v7498_v27  ;;  %v1661_v54 = vpop.f32.mrb[73].mxu0 }
 0x185   : > { %2383 = vst.msk [vmem:[#allocation2 + $0x58] sm:$0xff] %vm758_vm1, %v2327_v48  ;;  %v1795_v18 = vadd.f32 %v1661_v54, %v1369_v53  ;;  %v2191_v55 = vpop.f32.mrb[70].mxu1  ;;  %v1377_v54 = vld [vmem:[#allocation2 + $0xc8] sm:$0xff] }
 0x186   : > { %v1903_v56 = vld [vmem:[#allocation2 + $0x68] sm:$0xff]  ;;  %v7677_v31 = vadd.f32 %v2191_v55, %v1792_v32  ;;  %v2193_v61 = vpop.f32.mrb[71].mxu1 }
 0x187   : > { %1851 = vst.msk [vmem:[#allocation2 + $0x88] sm:$0xff] %vm758_vm1, %v1795_v18  ;;  %v2329_v62 = vadd.f32 %v2187_v45, %v1903_v56  ;;  %v1665_v1 = vpop.f32.mrb[74].mxu0 }
 0x188   : > { %v1796_v2 = vadd.f32 %v1665_v1, %v7505_v40  ;;  %v1667_v60 = vpop.f32.mrb[75].mxu0 }
 0x189   : > { %2385 = vst.msk [vmem:[#allocation2 + $0x68] sm:$0xff] %vm758_vm1, %v2329_v62  ;;  %v1797_v27 = vadd.f32 %v1667_v60, %v1371_v34  ;;  %v2197_v4 = vpop.f32.mrb[72].mxu1  ;;  %v1379_v60 = vld [vmem:[#allocation2 + $0xd8] sm:$0xff] }
 0x18a   : > { %v1905_v5 = vld [vmem:[#allocation2 + $0x78] sm:$0xff]  ;;  %v7682_v9 = vadd.f32 %v2197_v4, %v1794_v52  ;;  %v2199_v39 = vpop.f32.mrb[73].mxu1 }
 0x18b   : > { %1853 = vst.msk [vmem:[#allocation2 + $0x98] sm:$0xff] %vm758_vm1, %v1797_v27  ;;  %v2331_v51 = vadd.f32 %v2193_v61, %v1905_v5  ;;  %v1671_v13 = vpop.f32.mrb[76].mxu0 }
 0x18c   : > { %v1798_v15 = vadd.f32 %v1671_v13, %v7512_v50  ;;  %v1673_v3 = vpop.f32.mrb[77].mxu0 }
 0x18d   : > { %2387 = vst.msk [vmem:[#allocation2 + $0x78] sm:$0xff] %vm758_vm1, %v2331_v51  ;;  %v1799_v40 = vadd.f32 %v1673_v3, %v1373_v42  ;;  %v2203_v16 = vpop.f32.mrb[74].mxu1  ;;  %v1381_v3 = vld [vmem:[#allocation2 + $0xe8] sm:$0xff] }
 0x18e   : > { %v1907_v17 = vld [vmem:[#allocation2 + $0x88] sm:$0xff]  ;;  %v7687_v25 = vadd.f32 %v2203_v16, %v1796_v2  ;;  %v2205_v26 = vpop.f32.mrb[75].mxu1 }
 0x18f   : > { %1855 = vst.msk [vmem:[#allocation2 + $0xa8] sm:$0xff] %vm758_vm1, %v1799_v40  ;;  %v2333_v30 = vadd.f32 %v2199_v39, %v1907_v17  ;;  %v1677_v32 = vpop.f32.mrb[78].mxu0 }
 0x190   : > { %v1800_v33 = vadd.f32 %v1677_v32, %v7519_v59  ;;  %v1679_v10 = vpop.f32.mrb[79].mxu0 }
 0x191   : > { %2389 = vst.msk [vmem:[#allocation2 + $0x88] sm:$0xff] %vm758_vm1, %v2333_v30  ;;  %v1801_v50 = vadd.f32 %v1679_v10, %v1375_v47  ;;  %v2209_v36 = vpop.f32.mrb[76].mxu1  ;;  %v1383_v10 = vld [vmem:[#allocation2 + $0xf8] sm:$0xff] }
 0x192   : > { %v1909_v37 = vld [vmem:[#allocation2 + $0x98] sm:$0xff]  ;;  %v7692_v45 = vadd.f32 %v2209_v36, %v1798_v15  ;;  %v2211_v48 = vpop.f32.mrb[77].mxu1 }
 0x193   : > { %1857 = vst.msk [vmem:[#allocation2 + $0xb8] sm:$0xff] %vm758_vm1, %v1801_v50  ;;  %v2335_v49 = vadd.f32 %v2205_v26, %v1909_v37  ;;  %v1683_v52 = vpop.f32.mrb[80].mxu0 }
 0x194   : > { %v1802_v53 = vadd.f32 %v1683_v52, %v7526_v29  ;;  %v1685_v18 = vpop.f32.mrb[81].mxu0 }
 0x195   : > { %2391 = vst.msk [vmem:[#allocation2 + $0x98] sm:$0xff] %vm758_vm1, %v2335_v49  ;;  %v1803_v59 = vadd.f32 %v1685_v18, %v1377_v54  ;;  %v2215_v55 = vpop.f32.mrb[78].mxu1  ;;  %v5576_v54 = vld [vmem:[%s9446_s3 + $0x158] sm:$0xff] }
 0x196   : > { %v1911_v56 = vld [vmem:[#allocation2 + $0xa8] sm:$0xff]  ;;  %v7697_v61 = vadd.f32 %v2215_v55, %v1800_v33  ;;  %v2217_v62 = vpop.f32.mrb[79].mxu1 }
 0x197   : > { %1859 = vst.msk [vmem:[#allocation2 + $0xc8] sm:$0xff] %vm758_vm1, %v1803_v59  ;;  %v2337_v1 = vadd.f32 %v2211_v48, %v1911_v56  ;;  %v1689_v2 = vpop.f32.mrb[82].mxu0  ;;  %v1385_v59 = vld [vmem:[#allocation2 + $0x108] sm:$0xff] }
 0x198   : > { %v1804_v34 = vadd.f32 %v1689_v2, %v7533_v11  ;;  %v1691_v27 = vpop.f32.mrb[83].mxu0 }
 0x199   : > { %2393 = vst.msk [vmem:[#allocation2 + $0xa8] sm:$0xff] %vm758_vm1, %v2337_v1  ;;  %v1805_v29 = vadd.f32 %v1691_v27, %v1379_v60  ;;  %v2221_v4 = vpop.f32.mrb[80].mxu1  ;;  %v5575_v27 = vld [vmem:[%s9446_s3 + $0x150] sm:$0xff] }
 0x19a   : > { %v1913_v5 = vld [vmem:[#allocation2 + $0xb8] sm:$0xff]  ;;  %v7702_v39 = vadd.f32 %v2221_v4, %v1802_v53  ;;  %v2223_v51 = vpop.f32.mrb[81].mxu1 }
 0x19b   : > { %1861 = vst.msk [vmem:[#allocation2 + $0xd8] sm:$0xff] %vm758_vm1, %v1805_v29  ;;  %v2339_v13 = vadd.f32 %v2217_v62, %v1913_v5  ;;  %v1695_v15 = vpop.f32.mrb[84].mxu0 }
 0x19c   : > { %v1806_v42 = vadd.f32 %v1695_v15, %v7540_v21  ;;  %v1697_v40 = vpop.f32.mrb[85].mxu0 }
 0x19d   : > { %2395 = vst.msk [vmem:[#allocation2 + $0xb8] sm:$0xff] %vm758_vm1, %v2339_v13  ;;  %v1807_v11 = vadd.f32 %v1697_v40, %v1381_v3  ;;  %v2227_v16 = vpop.f32.mrb[82].mxu1  ;;  %v1387_v13 = vld [vmem:[#allocation2 + $0x118] sm:$0xff] }
 0x19e   : > { %v1915_v17 = vld [vmem:[#allocation2 + $0xc8] sm:$0xff]  ;;  %v7707_v26 = vadd.f32 %v2227_v16, %v1804_v34  ;;  %v2229_v30 = vpop.f32.mrb[83].mxu1 }
 0x19f   : > { %1863 = vst.msk [vmem:[#allocation2 + $0xe8] sm:$0xff] %vm758_vm1, %v1807_v11  ;;  %v2341_v32 = vadd.f32 %v2223_v51, %v1915_v17  ;;  %v1701_v33 = vpop.f32.mrb[86].mxu0 }
 0x1a0   : > { %v1808_v47 = vadd.f32 %v1701_v33, %v7547_v35  ;;  %v1703_v50 = vpop.f32.mrb[87].mxu0  ;;  %v5578_v35 = vld [vmem:[%s9446_s3 + $0x168] sm:$0xff] }
 0x1a1   : > { %2397 = vst.msk [vmem:[#allocation2 + $0xc8] sm:$0xff] %vm758_vm1, %v2341_v32  ;;  %v1809_v21 = vadd.f32 %v1703_v50, %v1383_v10  ;;  %v2233_v36 = vpop.f32.mrb[84].mxu1  ;;  %v6094_v56 = vpack.c.bf16 %v5578_v35, %v5576_v54  ;;  %v1389_v33 = vld [vmem:[#allocation2 + $0x128] sm:$0xff]  ;;  %v1391_v35 = vld [vmem:[#allocation2 + $0x138] sm:$0xff] }
 0x1a2   : > { %v1917_v37 = vld [vmem:[#allocation2 + $0xd8] sm:$0xff]  ;;  %v7712_v48 = vadd.f32 %v2233_v36, %v1806_v42  ;;  %v2235_v49 = vpop.f32.mrb[85].mxu1 }
 0x1a3   : > { %1865 = vst.msk [vmem:[#allocation2 + $0xf8] sm:$0xff] %vm758_vm1, %v1809_v21  ;;  %v2343_v52 = vadd.f32 %v2229_v30, %v1917_v37  ;;  %v1707_v53 = vpop.f32.mrb[88].mxu0  ;;  %6095 = vmatprep.subr.bf16.mxu1 %v6094_v56 }
 0x1a4   : > { %v1810_v18 = vadd.f32 %v1707_v53, %v7554_v46  ;;  %v1709_v55 = vpop.f32.mrb[89].mxu0  ;;  %v5577_v46 = vld [vmem:[%s9446_s3 + $0x160] sm:$0xff]  ;;  %v5579_v53 = vld [vmem:[%s9446_s3 + $0x170] sm:$0xff] }
 0x1a5   : > { %2399 = vst.msk [vmem:[#allocation2 + $0xd8] sm:$0xff] %vm758_vm1, %v2343_v52  ;;  %v1811_v62 = vadd.f32 %v1709_v55, %v1385_v59  ;;  %v2239_v1 = vpop.f32.mrb[86].mxu1  ;;  %v6096_v5 = vpack.c.bf16 %v5577_v46, %v5575_v27  ;;  %v5580_v52 = vld [vmem:[%s9446_s3 + $0x178] sm:$0xff]  ;;  %v5581_v55 = vld [vmem:[%s9446_s3 + $0x180] sm:$0xff] }
 0x1a6   : > { %v1919_v2 = vld [vmem:[#allocation2 + $0xe8] sm:$0xff]  ;;  %v7723_v34 = vadd.f32 %v2239_v1, %v1808_v47  ;;  %v2241_v60 = vpop.f32.mrb[87].mxu1  ;;  %v6100_v1 = vpack.c.bf16 %v5581_v55, %v5579_v53 }
 0x1a7   : > { %1867 = vst.msk [vmem:[#allocation2 + $0x108] sm:$0xff] %vm758_vm1, %v1811_v62  ;;  %v2345_v29 = vadd.f32 %v2235_v49, %v1919_v2  ;;  %v1713_v4 = vpop.f32.mrb[90].mxu0  ;;  %6097 = vmatpush1.bf16.msra.mxu1 %v6096_v5 }
 0x1a8   : > { %v1812_v51 = vadd.f32 %v1713_v4, %v7561_v57  ;;  %v1715_v15 = vpop.f32.mrb[91].mxu0  ;;  %v1393_v4 = vld [vmem:[#allocation2 + $0x148] sm:$0xff] }
 0x1a9   : > { %2401 = vst.msk [vmem:[#allocation2 + $0xe8] sm:$0xff] %vm758_vm1, %v2345_v29  ;;  %v1813_v42 = vadd.f32 %v1715_v15, %v1387_v13  ;;  %v2245_v3 = vpop.f32.mrb[88].mxu1 }
 0x1aa   : > { %v1921_v40 = vld [vmem:[#allocation2 + $0xf8] sm:$0xff]  ;;  %v7734_v11 = vadd.f32 %v2245_v3, %v1810_v18  ;;  %v2247_v16 = vpop.f32.mrb[89].mxu1 }
 0x1ab   : > { %1869 = vst.msk [vmem:[#allocation2 + $0x118] sm:$0xff] %vm758_vm1, %v1813_v42  ;;  %v2347_v17 = vadd.f32 %v2241_v60, %v1921_v40  ;;  %v1719_v30 = vpop.f32.mrb[92].mxu0 }
 0x1ac   : > { %v1814_v32 = vadd.f32 %v1719_v30, %v7568_v23  ;;  %v1721_v47 = vpop.f32.mrb[93].mxu0  ;;  %v5582_v23 = vld [vmem:[%s9446_s3 + $0x188] sm:$0xff]  ;;  %v1395_v30 = vld [vmem:[#allocation2 + $0x158] sm:$0xff] }
 0x1ad   : > { %2403 = vst.msk [vmem:[#allocation2 + $0xf8] sm:$0xff] %vm758_vm1, %v2347_v17  ;;  %v1815_v57 = vadd.f32 %v1721_v47, %v1389_v33  ;;  %v2251_v10 = vpop.f32.mrb[90].mxu1  ;;  %v6098_v59 = vpack.c.bf16 %v5582_v23, %v5580_v52  ;;  %v5583_v52 = vld [vmem:[%s9446_s3 + $0x190] sm:$0xff]  ;;  %v5585_v23 = vld [vmem:[%s9446_s3 + $0x1a0] sm:$0xff] }
 0x1ae   : > { %v1923_v50 = vld [vmem:[#allocation2 + $0x108] sm:$0xff]  ;;  %v7739_v21 = vadd.f32 %v2251_v10, %v1812_v51  ;;  %v2253_v36 = vpop.f32.mrb[91].mxu1 }
 0x1af   : > { %1871 = vst.msk [vmem:[#allocation2 + $0x128] sm:$0xff] %vm758_vm1, %v1815_v57  ;;  %v2349_v37 = vadd.f32 %v2247_v16, %v1923_v50  ;;  %v1725_v49 = vpop.f32.mrb[94].mxu0  ;;  %6099 = vmatprep.subr.bf16.mxu1 %v6098_v59  ;;  %v5584_v50 = vld [vmem:[%s9446_s3 + $0x198] sm:$0xff] }
 0x1b0   : > { %v1816_v54 = vadd.f32 %v1725_v49, %v7575_v12  ;;  %v1727_v18 = vpop.f32.mrb[95].mxu0  ;;  %6101 = vmatpush1.bf16.msra.mxu1 %v6100_v1 }
 0x1b1   : > { %2405 = vst.msk [vmem:[#allocation2 + $0x108] sm:$0xff] %vm758_vm1, %v2349_v37  ;;  %v1817_v56 = vadd.f32 %v1727_v18, %v1391_v35  ;;  %v2257_v62 = vpop.f32.mrb[92].mxu1  ;;  %v6104_v18 = vpack.c.bf16 %v5585_v23, %v5583_v52  ;;  %v1403_v23 = vld [vmem:[#allocation2 + $0x198] sm:$0xff] }
 0x1b2   : > { %v1925_v2 = vld [vmem:[#allocation2 + $0x118] sm:$0xff]  ;;  %v7756_v60 = vadd.f32 %v2257_v62, %v1814_v32  ;;  %v2259_v27 = vpop.f32.mrb[93].mxu1 }
 0x1b3   : > { %1873 = vst.msk [vmem:[#allocation2 + $0x138] sm:$0xff] %vm758_vm1, %v1817_v56  ;;  %v2351_v12 = vadd.f32 %v2253_v36, %v1925_v2  ;;  %v1731_v46 = vpop.f32.mrb[96].mxu0  ;;  %v5586_v36 = vld [vmem:[%s9446_s3 + $0x1a8] sm:$0xff] }
 0x1b4   : > { %v1818_v29 = vadd.f32 %v1731_v46, %v7582_v24  ;;  %v1733_v5 = vpop.f32.mrb[97].mxu0  ;;  %v6102_v49 = vpack.c.bf16 %v5586_v36, %v5584_v50 }
 0x1b5   : > { %2407 = vst.msk [vmem:[#allocation2 + $0x118] sm:$0xff] %vm758_vm1, %v2351_v12  ;;  %v1819_v51 = vadd.f32 %v1733_v5, %v1393_v4  ;;  %v2263_v13 = vpop.f32.mrb[94].mxu1 }
 0x1b6   : > { %v1927_v15 = vld [vmem:[#allocation2 + $0x128] sm:$0xff]  ;;  %v7761_v42 = vadd.f32 %v2263_v13, %v1816_v54  ;;  %v2265_v3 = vpop.f32.mrb[95].mxu1  ;;  %6103 = vmatprep.subr.bf16.mxu1 %v6102_v49 }
 0x1b7   : > { %1875 = vst.msk [vmem:[#allocation2 + $0x148] sm:$0xff] %vm758_vm1, %v1819_v51  ;;  %v2353_v40 = vadd.f32 %v2259_v27, %v1927_v15  ;;  %v1737_v16 = vpop.f32.mrb[98].mxu0  ;;  %v1397_v54 = vld [vmem:[#allocation2 + $0x168] sm:$0xff]  ;;  %6105 = vmatpush1.bf16.msra.mxu1 %v6104_v18 }
 0x1b8   : > { %v1820_v17 = vadd.f32 %v1737_v16, %v7589_v38  ;;  %v1739_v32 = vpop.f32.mrb[99].mxu0  ;;  %v5587_v16 = vld [vmem:[%s9446_s3 + $0x1b0] sm:$0xff] }
 0x1b9   : > { %2409 = vst.msk [vmem:[#allocation2 + $0x128] sm:$0xff] %vm758_vm1, %v2353_v40  ;;  %v1821_v24 = vadd.f32 %v1739_v32, %v1395_v30  ;;  %v2269_v33 = vpop.f32.mrb[96].mxu1  ;;  %v5588_v40 = vld [vmem:[%s9446_s3 + $0x1b8] sm:$0xff]  ;;  %v1401_v30 = vld [vmem:[#allocation2 + $0x188] sm:$0xff] }
 0x1ba   : > { %v1929_v47 = vld [vmem:[#allocation2 + $0x138] sm:$0xff]  ;;  %v7766_v57 = vadd.f32 %v2269_v33, %v1818_v29  ;;  %v2271_v10 = vpop.f32.mrb[97].mxu1  ;;  %v5589_v33 = vld [vmem:[%s9446_s3 + $0x1c0] sm:$0xff] }
 0x1bb   : > { %1877 = vst.msk [vmem:[#allocation2 + $0x158] sm:$0xff] %vm758_vm1, %v1821_v24  ;;  %v2355_v38 = vadd.f32 %v2265_v3, %v1929_v47  ;;  %v1743_v37 = vpop.f32.mrb[100].mxu0  ;;  %v6108_v50 = vpack.c.bf16 %v5589_v33, %v5587_v16 }
 0x1bc   : > { %v1822_v53 = vadd.f32 %v1743_v37, %v7596_v0  ;;  %v1745_v35 = vpop.f32.mrb[101].mxu0  ;;  %v1399_v0 = vld [vmem:[#allocation2 + $0x178] sm:$0xff] }
 0x1bd   : > { %2411 = vst.msk [vmem:[#allocation2 + $0x138] sm:$0xff] %vm758_vm1, %v2355_v38  ;;  %v1823_v59 = vadd.f32 %v1745_v35, %v1397_v54  ;;  %v2275_v55 = vpop.f32.mrb[98].mxu1  ;;  %v3024_v54 = vlaneseq }
 0x1be   : > { %v1931_v56 = vld [vmem:[#allocation2 + $0x148] sm:$0xff]  ;;  %v7783_v62 = vadd.f32 %v2275_v55, %v1820_v17  ;;  %v2277_v1 = vpop.f32.mrb[99].mxu1 }
 0x1bf   : > { %1879 = vst.msk [vmem:[#allocation2 + $0x168] sm:$0xff] %vm758_vm1, %v1823_v59  ;;  %v2357_v2 = vadd.f32 %v2271_v10, %v1931_v56  ;;  %v1749_v27 = vpop.f32.mrb[102].mxu0  ;;  %v5592_v59 = vld [vmem:[%s9446_s3 + $0x1d8] sm:$0xff]  ;;  %v5594_v55 = vld [vmem:[%s9446_s3 + $0x1e8] sm:$0xff]  ;;  %v5591_v56 = vld [vmem:[%s9446_s3 + $0x1d0] sm:$0xff] }
 0x1c0   : > { %v1824_v12 = vadd.f32 %v1749_v27, %v7603_v63  ;;  %v1751_v46 = vpop.f32.mrb[103].mxu0  ;;  %v5590_v63 = vld [vmem:[%s9446_s3 + $0x1c8] sm:$0xff]  ;;  %v6110_v27 = vpack.c.bf16 %v5594_v55, %v5592_v59 }
 0x1c1   : > { %2413 = vst.msk [vmem:[#allocation2 + $0x148] sm:$0xff] %vm758_vm1, %v2357_v2  ;;  %v1825_v29 = vadd.f32 %v1751_v46, %v1399_v0  ;;  %v2281_v4 = vpop.f32.mrb[100].mxu1  ;;  %v6106_v24 = vpack.c.bf16 %v5590_v63, %v5588_v40 }
 0x1c2   : > { %v1933_v5 = vld [vmem:[#allocation2 + $0x158] sm:$0xff]  ;;  %v7788_v51 = vadd.f32 %v2281_v4, %v1822_v53  ;;  %v2283_v13 = vpop.f32.mrb[101].mxu1 }
 0x1c3   : > { %1881 = vst.msk [vmem:[#allocation2 + $0x178] sm:$0xff] %vm758_vm1, %v1825_v29  ;;  %v2359_v15 = vadd.f32 %v2277_v1, %v1933_v5  ;;  %v1755_v3 = vpop.f32.mrb[104].mxu0  ;;  %6107 = vmatprep.subr.bf16.mxu1 %v6106_v24  ;;  %v1405_v5 = vld [vmem:[#allocation2 + $0x1a8] sm:$0xff]  ;;  %v1407_v24 = vld [vmem:[#allocation2 + $0x1b8] sm:$0xff] }
 0x1c4   : > { %v1826_v17 = vadd.f32 %v1755_v3, %v7610_v28  ;;  %v1757_v32 = vpop.f32.mrb[105].mxu0  ;;  %6109 = vmatpush1.bf16.msra.mxu1 %v6108_v50 }
 0x1c5   : > { %2415 = vst.msk [vmem:[#allocation2 + $0x158] sm:$0xff] %vm758_vm1, %v2359_v15  ;;  %v1827_v47 = vadd.f32 %v1757_v32, %v1401_v30  ;;  %v2287_v10 = vpop.f32.mrb[102].mxu1  ;;  %v7826_v15 = vshrl.u32 %v3024_v54, 7  ;;  %6111 = vmatprep.subr.bf16.mxu1 %v6110_v27  ;;  %v5597_v54 = vld [vmem:[%s9446_s3 + $0x200] sm:$0xff] }
 0x1c6   : > { %v1935_v36 = vld [vmem:[#allocation2 + $0x168] sm:$0xff]  ;;  %v7805_v38 = vadd.f32 %v2287_v10, %v1824_v12  ;;  %v2289_v37 = vpop.f32.mrb[103].mxu1  ;;  %v5593_v12 = vld [vmem:[%s9446_s3 + $0x1e0] sm:$0xff] }
 0x1c7   : > { %1883 = vst.msk [vmem:[#allocation2 + $0x188] sm:$0xff] %vm758_vm1, %v1827_v47  ;;  %v2361_v28 = vadd.f32 %v2283_v13, %v1935_v36  ;;  %v1761_v49 = vpop.f32.mrb[106].mxu0  ;;  %v6112_v29 = vpack.c.bf16 %v5593_v12, %v5591_v56  ;;  %v7836_v47 = vld [vmem:[%s9445_s2] sm:$0x3]  ;;  %v3026_v10 = vsub.s32 0, %v7826_v15  ;;  %v5602_v56 = vld [vmem:[%s9446_s3 + $0x228] sm:$0xff] }
 0x1c8   : > { %v1828_v52 = vadd.f32 %v1761_v49, %v7617_v22  ;;  %v1763_v53 = vpop.f32.mrb[107].mxu0  ;;  %v2429_v12 = vld [vmem:[#allocation2 + $0x8] sm:$0xff] }
 0x1c9   : > { %2417 = vst.msk [vmem:[#allocation2 + $0x168] sm:$0xff] %vm758_vm1, %v2361_v28  ;;  %v1829_v35 = vadd.f32 %v1763_v53, %v1403_v23  ;;  %v2293_v18 = vpop.f32.mrb[104].mxu1  ;;  %6113 = vmatpush1.bf16.msra.mxu1 %v6112_v29  ;;  %v5595_v28 = vld [vmem:[%s9446_s3 + $0x1f0] sm:$0xff] }
 0x1ca   : > { %v1937_v22 = vld [vmem:[#allocation2 + $0x178] sm:$0xff]  ;;  %v7819_v1 = vadd.f32 %v2293_v18, %v1826_v17  ;;  %v2295_v2 = vpop.f32.mrb[105].mxu1  ;;  %v6116_v55 = vpack.c.bf16 %v5597_v54, %v5595_v28 }
 0x1cb   : > { %1885 = vst.msk [vmem:[#allocation2 + $0x198] sm:$0xff] %vm758_vm1, %v1829_v35  ;;  %v2363_v0 = vadd.f32 %v2289_v37, %v1937_v22  ;;  %v1767_v46 = vpop.f32.mrb[108].mxu0  ;;  %v5596_v37 = vld [vmem:[%s9446_s3 + $0x1f8] sm:$0xff]  ;;  %v5599_v22 = vld [vmem:[%s9446_s3 + $0x210] sm:$0xff] }
 0x1cc   : > { %v1830_v4 = vadd.f32 %v1767_v46, %v7624_v41  ;;  %v1769_v13 = vpop.f32.mrb[109].mxu0  ;;  %v5600_v35 = vld [vmem:[%s9446_s3 + $0x218] sm:$0xff]  ;;  %v7871_v46 = vrot.slane %v7836_v47, %v3026_v10 }
 0x1cd   : > { %2419 = vst.msk [vmem:[#allocation2 + $0x178] sm:$0xff] %vm758_vm1, %v2363_v0  ;;  %v1831_v3 = vadd.f32 %v1769_v13, %v1405_v5  ;;  %v2299_v40 = vpop.f32.mrb[106].mxu1  ;;  %v6118_v29 = vpack.c.bf16 %v5602_v56, %v5600_v35  ;;  %v2433_v35 = vld [vmem:[#allocation2 + $0x28] sm:$0xff] }
 0x1ce   : > { %v1939_v63 = vld [vmem:[#allocation2 + $0x188] sm:$0xff]  ;;  %v7829_v16 = vadd.f32 %v2299_v40, %v1828_v52  ;;  %v2301_v17 = vpop.f32.mrb[107].mxu1 }
 0x1cf   : > { %1887 = vst.msk [vmem:[#allocation2 + $0x1a8] sm:$0xff] %vm758_vm1, %v1831_v3  ;;  %v2365_v30 = vadd.f32 %v2295_v2, %v1939_v63  ;;  %v1773_v32 = vpop.f32.mrb[110].mxu0  ;;  %v5601_v2 = vld [vmem:[%s9446_s3 + $0x220] sm:$0xff] }
 0x1d0   : > { %v1832_v41 = vadd.f32 %v1773_v32, %v7632_v58  ;;  %v1775_v33 = vpop.f32.mrb[111].mxu0  ;;  %v5598_v58 = vld [vmem:[%s9446_s3 + $0x208] sm:$0xff]  ;;  %v6120_v13 = vpack.c.bf16 %v5601_v2, %v5599_v22  ;;  %v2431_v32 = vld [vmem:[#allocation2 + $0x18] sm:$0xff] }
 0x1d1   : > { %2421 = vst.msk [vmem:[#allocation2 + $0x188] sm:$0xff] %vm758_vm1, %v2365_v30  ;;  %v1833_v50 = vadd.f32 %v1775_v33, %v1407_v24  ;;  %v2305_v36 = vpop.f32.mrb[108].mxu1  ;;  %v6114_v53 = vpack.c.bf16 %v5598_v58, %v5596_v37  ;;  %v5604_v37 = vld [vmem:[%s9446_s3 + $0x238] sm:$0xff]  ;;  %v5606_v58 = vld [vmem:[%s9446_s3 + $0x248] sm:$0xff] }
 0x1d2   : > { %v1941_v49 = vld [vmem:[#allocation2 + $0x198] sm:$0xff]  ;;  %v7849_v52 = vadd.f32 %v2305_v36, %v1830_v4  ;;  %v2307_v23 = vpop.f32.mrb[109].mxu1 }
 0x1d3   : > { %1889 = vst.msk [vmem:[#allocation2 + $0x1b8] sm:$0xff] %vm758_vm1, %v1833_v50  ;;  %v2367_v18 = vadd.f32 %v2301_v17, %v1941_v49  ;;  %v2687_v59 = vpop.f32.mrb[112].mxu0  ;;  %6115 = vmatprep.subr.bf16.mxu1 %v6114_v53  ;;  %v6122_v49 = vpack.c.bf16 %v5606_v58, %v5604_v37  ;;  %v5605_v53 = vld [vmem:[%s9446_s3 + $0x240] sm:$0xff]  ;;  %v5610_v37 = vld [vmem:[%s9446_s3 + $0x268] sm:$0xff]  ;;  %v5607_v58 = vld [vmem:[%s9446_s3 + $0x250] sm:$0xff] }
 0x1d4   : > { %v2854_v27 = vadd.f32 %v2687_v59, %v7641_v8  ;;  %v2689_v0 = vpop.f32.mrb[113].mxu0  ;;  %6117 = vmatpush1.bf16.msra.mxu1 %v6116_v55 }
 0x1d5   : > { %2423 = vst.msk [vmem:[#allocation2 + $0x198] sm:$0xff] %vm758_vm1, %v2367_v18  ;;  %v2855_v4 = vadd.f32 %v2689_v0, %v2429_v12  ;;  %v2311_v5 = vpop.f32.mrb[110].mxu1  ;;  %6119 = vmatprep.subr.bf16.mxu1 %v6118_v29  ;;  %v2435_v0 = vld [vmem:[#allocation2 + $0x38] sm:$0xff] }
 0x1d6   : > { %v1943_v3 = vld [vmem:[#allocation2 + $0x1a8] sm:$0xff]  ;;  %v7874_v40 = vadd.f32 %v2311_v5, %v1832_v41  ;;  %v2313_v63 = vpop.f32.mrb[111].mxu1  ;;  %v3034_v33 = vadd.f32 %v7871_v46, %v2854_v27 }
 0x1d7   : > { %2911 = vst.msk [vmem:[#allocation2 + $0x8] sm:$0xff] %vm758_vm1, %v2855_v4  ;;  %v2369_v8 = vadd.f32 %v2307_v23, %v1943_v3  ;;  %v2693_v17 = vpop.f32.mrb[114].mxu0  ;;  %v5603_v23 = vld [vmem:[%s9446_s3 + $0x230] sm:$0xff]  ;;  %v3030_v3 = vsub.s32 1, %v7826_v15 }
 0x1d8   : > { %v2856_v30 = vadd.f32 %v2693_v17, %v7647_v19  ;;  %v2695_v24 = vpop.f32.mrb[115].mxu0  ;;  %6121 = vmatpush1.bf16.msra.mxu1 %v6120_v13  ;;  %v3090_v59 = vmax.f32 %v3034_v33, 0.0  ;;  %v6124_v56 = vpack.c.bf16 %v5605_v53, %v5603_v23  ;;  %v5609_v23 = vld [vmem:[%s9446_s3 + $0x260] sm:$0xff]  ;;  %v5612_v53 = vld [vmem:[%s9446_s3 + $0x278] sm:$0xff] }
 0x1d9   : > { %2425 = vst.msk [vmem:[#allocation2 + $0x1a8] sm:$0xff] %vm758_vm1, %v2369_v8  ;;  %v2857_v50 = vadd.f32 %v2695_v24, %v2431_v32  ;;  %6123 = vmatprep.subr.bf16.mxu1 %v6122_v49  ;;  %v2437_v8 = vld [vmem:[#allocation2 + $0x48] sm:$0xff] }
 0x1da   : > { %v1945_v36 = vld [vmem:[#allocation2 + $0x1b8] sm:$0xff]  ;;  %v3036_v41 = vadd.f32 %v7871_v46, %v2856_v30 }
 0x1db   : > { %2913 = vst.msk [vmem:[#allocation2 + $0x18] sm:$0xff] %vm758_vm1, %v2857_v50  ;;  %v2371_v19 = vadd.f32 %v2313_v63, %v1945_v36  ;;  %v2699_v28 = vpop.f32.mrb[116].mxu0 }
 0x1dc   : > { %v2858_v54 = vadd.f32 %v2699_v28, %v7652_v43  ;;  %v2701_v18 = vpop.f32.mrb[117].mxu0  ;;  %v3092_v55 = vmax.f32 %v3036_v41, 0.0  ;;  %6125 = vmatpush1.bf16.msra.mxu1 %v6124_v56  ;;  %v7911_v41 = vrot.slane %v7836_v47, %v3030_v3  ;;  %v5613_v56 = vld [vmem:[%s9446_s3 + $0x280] sm:$0xff] }
 0x1dd   : > { %2427 = vst.msk [vmem:[#allocation2 + $0x1b8] sm:$0xff] %vm758_vm1, %v2371_v19  ;;  %v2859_v22 = vadd.f32 %v2701_v18, %v2433_v35  ;;  %v6128_v18 = vpack.c.bf16 %v5609_v23, %v5607_v58 }
 0x1de   : > { %v7896_v2 = vmax.f32 %v3090_v59, %v3092_v55  ;;  %v3038_v43 = vadd.f32 %v7871_v46, %v2858_v54  ;;  %v5611_v55 = vld [vmem:[%s9446_s3 + $0x270] sm:$0xff] }
 0x1df   : > { %2915 = vst.msk [vmem:[#allocation2 + $0x28] sm:$0xff] %vm758_vm1, %v2859_v22  ;;  %v2705_v27 = vpop.f32.mrb[118].mxu0 }
 0x1e0   : > { %v2860_v12 = vadd.f32 %v2705_v27, %v7657_v14  ;;  %v2707_v29 = vpop.f32.mrb[119].mxu0  ;;  %v3094_v30 = vmax.f32 %v3038_v43, 0.0  ;;  %v2439_v14 = vld [vmem:[#allocation2 + $0x58] sm:$0xff] }
 0x1e1   : > { %v2861_v4 = vadd.f32 %v2707_v29, %v2435_v0  ;;  %v6132_v29 = vpack.c.bf16 %v5613_v56, %v5611_v55 }
 0x1e2   : > { %v3040_v5 = vadd.f32 %v7871_v46, %v2860_v12 }
 0x1e3   : > { %2917 = vst.msk [vmem:[#allocation2 + $0x38] sm:$0xff] %vm758_vm1, %v2861_v4  ;;  %v2711_v13 = vpop.f32.mrb[120].mxu0  ;;  %v2441_v4 = vld [vmem:[#allocation2 + $0x68] sm:$0xff] }
 0x1e4   : > { %v2862_v63 = vadd.f32 %v2711_v13, %v7662_v6  ;;  %v2713_v17 = vpop.f32.mrb[121].mxu0  ;;  %v3096_v32 = vmax.f32 %v3040_v5, 0.0  ;;  %v5608_v6 = vld [vmem:[%s9446_s3 + $0x258] sm:$0xff] }
 0x1e5   : > { %v2863_v24 = vadd.f32 %v2713_v17, %v2437_v8  ;;  %v6126_v49 = vpack.c.bf16 %v5610_v37, %v5608_v6  ;;  %v2443_v6 = vld [vmem:[#allocation2 + $0x78] sm:$0xff] }
 0x1e6   : > { %v7905_v33 = vmax.f32 %v3094_v30, %v3096_v32  ;;  %v2971_v50 = vld [vmem:[#allocation2 + $0x28] sm:$0xff]  ;;  %v3042_v47 = vadd.f32 %v7871_v46, %v2862_v63 }
 0x1e7   : > { %2919 = vst.msk [vmem:[#allocation2 + $0x48] sm:$0xff] %vm758_vm1, %v2863_v24  ;;  %v2717_v36 = vpop.f32.mrb[122].mxu0  ;;  %v3039_v35 = vadd.f32 %v7911_v41, %v2971_v50  ;;  %6127 = vmatprep.subr.bf16.mxu1 %v6126_v49 }
 0x1e8   : > { %v2864_v19 = vadd.f32 %v2717_v36, %v7667_v20  ;;  %v2719_v28 = vpop.f32.mrb[123].mxu0  ;;  %3206 = vrot.lane.b32.xlu0 %v7905_v33, %s6572_s24  ;;  %v5614_v20 = vld [vmem:[%s9446_s3 + $0x288] sm:$0xff]  ;;  %6129 = vmatpush1.bf16.msra.mxu1 %v6128_v18  ;;  %v3098_v13 = vmax.f32 %v3042_v47, 0.0 }
 0x1e9   : > { %v2865_v54 = vadd.f32 %v2719_v28, %v2439_v14  ;;  %v6130_v59 = vpack.c.bf16 %v5614_v20, %v5612_v53  ;;  %v3095_v17 = vmax.f32 %v3039_v35, 0.0 }
 0x1ea   : > { %v2973_v22 = vld [vmem:[#allocation2 + $0x38] sm:$0xff]  ;;  %v3044_v27 = vadd.f32 %v7871_v46, %v2864_v19  ;;  %v5615_v19 = vld [vmem:[%s9446_s3 + $0x290] sm:$0x3] }
 0x1eb   : > { %2921 = vst.msk [vmem:[#allocation2 + $0x58] sm:$0xff] %vm758_vm1, %v2865_v54  ;;  %v2723_v12 = vpop.f32.mrb[124].mxu0  ;;  %v3041_v0 = vadd.f32 %v7911_v41, %v2973_v22  ;;  %6131 = vmatprep.subr.bf16.mxu1 %v6130_v59  ;;  %v2445_v54 = vld [vmem:[#allocation2 + $0x88] sm:$0xff] }
 0x1ec   : > { %v2866_v43 = vadd.f32 %v2723_v12, %v7672_v44  ;;  %v2725_v5 = vpop.f32.mrb[125].mxu0  ;;  %v3100_v63 = vmax.f32 %v3044_v27, 0.0  ;;  %6133 = vmatpush1.bf16.msra.mxu1 %v6132_v29  ;;  %v5616_v44 = vld [vmem:[%s9446_s3 + $0x298] sm:$0x3] }
 0x1ed   : > { %v2867_v8 = vadd.f32 %v2725_v5, %v2441_v4  ;;  %v3097_v30 = vmax.f32 %v3041_v0, 0.0  ;;  %5617 = vmatprep.subr.msk.mxu1 %vm3495_vm2, %v5616_v44  ;;  %v2447_v4 = vld [vmem:[#allocation2 + $0x98] sm:$0xff] }
 0x1ee   : > { %v7946_v32 = vmax.f32 %v3098_v13, %v3100_v63  ;;  %v2975_v24 = vld [vmem:[#allocation2 + $0x48] sm:$0xff]  ;;  %v3046_v58 = vadd.f32 %v7871_v46, %v2866_v43 }
 0x1ef   : > { %2923 = vst.msk [vmem:[#allocation2 + $0x68] sm:$0xff] %vm758_vm1, %v2867_v8  ;;  %v2729_v14 = vpop.f32.mrb[126].mxu0  ;;  %v7949_v50 = vmax.f32 %v3095_v17, %v3097_v30  ;;  %v3043_v47 = vadd.f32 %v7911_v41, %v2975_v24 }
 0x1f0   : > { %v2868_v36 = vadd.f32 %v2729_v14, %v7677_v31  ;;  %v2731_v37 = vpop.f32.mrb[127].mxu0  ;;  %3210 = vrot.lane.b32.xlu1 %v7946_v32, %s6572_s24  ;;  %5618 = vmatpush1.msk.msra.mxu1 %vm3495_vm2, %v5615_v19  ;;  %v3102_v18 = vmax.f32 %v3046_v58, 0.0  ;;  %v2449_v14 = vld [vmem:[#allocation2 + $0xa8] sm:$0xff] }
 0x1f1   : > { %v2869_v28 = vadd.f32 %v2731_v37, %v2443_v6  ;;  %3208 = vrot.lane.b32.xlu0 %v7949_v50, %s6572_s24  ;;  %v3099_v56 = vmax.f32 %v3043_v47, 0.0 }
 0x1f2   : > { %v2977_v31 = vld [vmem:[#allocation2 + $0x58] sm:$0xff]  ;;  %v3048_v49 = vadd.f32 %v7871_v46, %v2868_v36 }
 0x1f3   : > { %2925 = vst.msk [vmem:[#allocation2 + $0x78] sm:$0xff] %vm758_vm1, %v2869_v28  ;;  %v2735_v23 = vpop.f32.mrb[128].mxu0  ;;  %v3045_v53 = vadd.f32 %v7911_v41, %v2977_v31 }
 0x1f4   : > { %v2870_v20 = vadd.f32 %v2735_v23, %v7682_v9  ;;  %v2737_v35 = vpop.f32.mrb[129].mxu0  ;;  %v3104_v59 = vmax.f32 %v3048_v49, 0.0 }
 0x1f5   : > { %v2871_v55 = vadd.f32 %v2737_v35, %v2445_v54  ;;  %v3101_v22 = vmax.f32 %v3045_v53, 0.0  ;;  %v2451_v53 = vld [vmem:[#allocation2 + $0xb8] sm:$0xff] }
 0x1f6   : > { %v7970_v27 = vmax.f32 %v3102_v18, %v3104_v59  ;;  %v2979_v12 = vld [vmem:[#allocation2 + $0x68] sm:$0xff]  ;;  %v3050_v9 = vadd.f32 %v7871_v46, %v2870_v20 }
 0x1f7   : > { %2927 = vst.msk [vmem:[#allocation2 + $0x88] sm:$0xff] %vm758_vm1, %v2871_v55  ;;  %v2741_v0 = vpop.f32.mrb[130].mxu0  ;;  %v7973_v29 = vmax.f32 %v3099_v56, %v3101_v22  ;;  %v3047_v63 = vadd.f32 %v7911_v41, %v2979_v12  ;;  %v2453_v22 = vld [vmem:[#allocation2 + $0xc8] sm:$0xff] }
 0x1f8   : > { %v2872_v43 = vadd.f32 %v2741_v0, %v7687_v25  ;;  %v2743_v5 = vpop.f32.mrb[131].mxu0  ;;  %3214 = vrot.lane.b32.xlu0 %v7970_v27, %s6572_s24  ;;  %v3106_v36 = vmax.f32 %v3050_v9, 0.0 }
 0x1f9   : > { %v2873_v13 = vadd.f32 %v2743_v5, %v2447_v4  ;;  %3212 = vrot.lane.b32.xlu1 %v7973_v29, %s6572_s24  ;;  %v3103_v58 = vmax.f32 %v3047_v63, 0.0 }
 0x1fa   : > { %v2981_v8 = vld [vmem:[#allocation2 + $0x78] sm:$0xff]  ;;  %v3052_v17 = vadd.f32 %v7871_v46, %v2872_v43 }
 0x1fb   : > { %2929 = vst.msk [vmem:[#allocation2 + $0x98] sm:$0xff] %vm758_vm1, %v2873_v13  ;;  %v2747_v30 = vpop.f32.mrb[132].mxu0  ;;  %v3049_v25 = vadd.f32 %v7911_v41, %v2981_v8 }
 0x1fc   : > { %v2874_v24 = vadd.f32 %v2747_v30, %v7692_v45  ;;  %v2749_v44 = vpop.f32.mrb[133].mxu0  ;;  %v3108_v6 = vmax.f32 %v3052_v17, 0.0 }
 0x1fd   : > { %v2875_v37 = vadd.f32 %v2749_v44, %v2449_v14  ;;  %v3105_v19 = vmax.f32 %v3049_v25, 0.0  ;;  %v2455_v25 = vld [vmem:[#allocation2 + $0xd8] sm:$0xff] }
 0x1fe   : > { %v7986_v28 = vmax.f32 %v3106_v36, %v3108_v6  ;;  %v2983_v47 = vld [vmem:[#allocation2 + $0x88] sm:$0xff]  ;;  %v3054_v45 = vadd.f32 %v7871_v46, %v2874_v24 }
 0x1ff   : > { %2931 = vst.msk [vmem:[#allocation2 + $0xa8] sm:$0xff] %vm758_vm1, %v2875_v37  ;;  %v2753_v31 = vpop.f32.mrb[134].mxu0  ;;  %v7989_v49 = vmax.f32 %v3103_v58, %v3105_v19  ;;  %v3051_v35 = vadd.f32 %v7911_v41, %v2983_v47  ;;  %v2457_v19 = vld [vmem:[#allocation2 + $0xe8] sm:$0xff] }
 0x200   : > { %v2876_v23 = vadd.f32 %v2753_v31, %v7697_v61  ;;  %v2755_v20 = vpop.f32.mrb[135].mxu0  ;;  %3218 = vrot.lane.b32.xlu0 %v7986_v28, %s6572_s24  ;;  %v3110_v0 = vmax.f32 %v3054_v45, 0.0 }
 0x201   : > { %v2877_v54 = vadd.f32 %v2755_v20, %v2451_v53  ;;  %3216 = vrot.lane.b32.xlu1 %v7989_v49, %s6572_s24  ;;  %v3107_v5 = vmax.f32 %v3051_v35, 0.0 }
 0x202   : > { %v2985_v18 = vld [vmem:[#allocation2 + $0x98] sm:$0xff]  ;;  %v3056_v59 = vadd.f32 %v7871_v46, %v2876_v23 }
 0x203   : > { %2933 = vst.msk [vmem:[#allocation2 + $0xb8] sm:$0xff] %vm758_vm1, %v2877_v54  ;;  %v2759_v55 = vpop.f32.mrb[136].mxu0  ;;  %v3053_v61 = vadd.f32 %v7911_v41, %v2985_v18 }
 0x204   : > { %v2878_v56 = vadd.f32 %v2759_v55, %v7702_v39  ;;  %v2761_v12 = vpop.f32.mrb[137].mxu0  ;;  %v3112_v43 = vmax.f32 %v3056_v59, 0.0  ;;  %v3379_v55 = vld [vmem:[%s9446_s3 + $0x8] sm:$0xff] }
 0x205   : > { %v2879_v4 = vadd.f32 %v2761_v12, %v2453_v22  ;;  %v3109_v9 = vmax.f32 %v3053_v61, 0.0 }
 0x206   : > { %v8002_v13 = vmax.f32 %v3110_v0, %v3112_v43  ;;  %v2987_v63 = vld [vmem:[#allocation2 + $0xa8] sm:$0xff]  ;;  %v3058_v39 = vadd.f32 %v7871_v46, %v2878_v56  ;;  %v2459_v56 = vld [vmem:[#allocation2 + $0xf8] sm:$0xff] }
 0x207   : > { %2935 = vst.msk [vmem:[#allocation2 + $0xc8] sm:$0xff] %vm758_vm1, %v2879_v4  ;;  %v2765_v8 = vpop.f32.mrb[138].mxu0  ;;  %v8005_v17 = vmax.f32 %v3107_v5, %v3109_v9  ;;  %v3055_v44 = vadd.f32 %v7911_v41, %v2987_v63 }
 0x208   : > { %v2880_v30 = vadd.f32 %v2765_v8, %v7707_v26  ;;  %v2767_v24 = vpop.f32.mrb[139].mxu0  ;;  %3222 = vrot.lane.b32.xlu0 %v8002_v13, %s6572_s24  ;;  %v3114_v31 = vmax.f32 %v3058_v39, 0.0 }
 0x209   : > { %v2881_v14 = vadd.f32 %v2767_v24, %v2455_v25  ;;  %3220 = vrot.lane.b32.xlu1 %v8005_v17, %s6572_s24  ;;  %v3111_v20 = vmax.f32 %v3055_v44, 0.0 }
 0x20a   : > { %v2989_v36 = vld [vmem:[#allocation2 + $0xb8] sm:$0xff]  ;;  %v3060_v6 = vadd.f32 %v7871_v46, %v2880_v30  ;;  %v2461_v30 = vld [vmem:[#allocation2 + $0x108] sm:$0xff] }
 0x20b   : > { %2937 = vst.msk [vmem:[#allocation2 + $0xd8] sm:$0xff] %vm758_vm1, %v2881_v14  ;;  %v2771_v37 = vpop.f32.mrb[140].mxu0  ;;  %v3057_v26 = vadd.f32 %v7911_v41, %v2989_v36 }
 0x20c   : > { %v2882_v58 = vadd.f32 %v2771_v37, %v7712_v48  ;;  %v2773_v47 = vpop.f32.mrb[141].mxu0  ;;  %v3116_v23 = vmax.f32 %v3060_v6, 0.0  ;;  %v3381_v48 = vld [vmem:[%s9446_s3 + $0x18] sm:$0xff] }
 0x20d   : > { %v2883_v53 = vadd.f32 %v2773_v47, %v2457_v19  ;;  %v3113_v45 = vmax.f32 %v3057_v26, 0.0  ;;  %v6134_v0 = vpack.c.bf16 %v3381_v48, %v3379_v55  ;;  %v2463_v47 = vld [vmem:[#allocation2 + $0x118] sm:$0xff]  ;;  %v2465_v55 = vld [vmem:[#allocation2 + $0x128] sm:$0xff] }
 0x20e   : > { %v8018_v54 = vmax.f32 %v3114_v31, %v3116_v23  ;;  %v2991_v35 = vld [vmem:[#allocation2 + $0xc8] sm:$0xff]  ;;  %v3062_v12 = vadd.f32 %v7871_v46, %v2882_v58 }
 0x20f   : > { %2939 = vst.msk [vmem:[#allocation2 + $0xe8] sm:$0xff] %vm758_vm1, %v2883_v53  ;;  %v2777_v18 = vpop.f32.mrb[142].mxu0  ;;  %v8021_v59 = vmax.f32 %v3111_v20, %v3113_v45  ;;  %v3059_v4 = vadd.f32 %v7911_v41, %v2991_v35  ;;  %6135 = vmatprep.subr.bf16.mxu1 %v6134_v0 }
 0x210   : > { %v2884_v61 = vadd.f32 %v2777_v18, %v7723_v34  ;;  %v2779_v22 = vpop.f32.mrb[143].mxu0  ;;  %3226 = vrot.lane.b32.xlu0 %v8018_v54, %s6572_s24  ;;  %v3118_v24 = vmax.f32 %v3062_v12, 0.0 }
 0x211   : > { %v2885_v43 = vadd.f32 %v2779_v22, %v2459_v56  ;;  %3224 = vrot.lane.b32.xlu1 %v8021_v59, %s6572_s24  ;;  %v3115_v44 = vmax.f32 %v3059_v4, 0.0 }
 0x212   : > { %v2993_v5 = vld [vmem:[#allocation2 + $0xd8] sm:$0xff]  ;;  %v3064_v9 = vadd.f32 %v7871_v46, %v2884_v61 }
 0x213   : > { %2941 = vst.msk [vmem:[#allocation2 + $0xf8] sm:$0xff] %vm758_vm1, %v2885_v43  ;;  %v2783_v34 = vpop.f32.mrb[144].mxu0  ;;  %v3061_v63 = vadd.f32 %v7911_v41, %v2993_v5 }
 0x214   : > { %v2886_v8 = vadd.f32 %v2783_v34, %v7734_v11  ;;  %v2785_v25 = vpop.f32.mrb[145].mxu0  ;;  %v3120_v39 = vmax.f32 %v3064_v9, 0.0 }
 0x215   : > { %v2887_v14 = vadd.f32 %v2785_v25, %v2461_v30  ;;  %v3117_v36 = vmax.f32 %v3061_v63, 0.0  ;;  %v2467_v63 = vld [vmem:[#allocation2 + $0x138] sm:$0xff] }
 0x216   : > { %v8040_v6 = vmax.f32 %v3118_v24, %v3120_v39  ;;  %v2995_v37 = vld [vmem:[#allocation2 + $0xe8] sm:$0xff]  ;;  %v3066_v11 = vadd.f32 %v7871_v46, %v2886_v8 }
 0x217   : > { %2943 = vst.msk [vmem:[#allocation2 + $0x108] sm:$0xff] %vm758_vm1, %v2887_v14  ;;  %v2789_v26 = vpop.f32.mrb[146].mxu0  ;;  %v8043_v58 = vmax.f32 %v3115_v44, %v3117_v36  ;;  %v3063_v53 = vadd.f32 %v7911_v41, %v2995_v37  ;;  %v2469_v36 = vld [vmem:[#allocation2 + $0x148] sm:$0xff] }
 0x218   : > { %v2888_v19 = vadd.f32 %v2789_v26, %v7739_v21  ;;  %v2791_v31 = vpop.f32.mrb[147].mxu0  ;;  %3230 = vrot.lane.b32.xlu0 %v8040_v6, %s6572_s24  ;;  %v3122_v61 = vmax.f32 %v3066_v11, 0.0 }
 0x219   : > { %v2889_v23 = vadd.f32 %v2791_v31, %v2463_v47  ;;  %3228 = vrot.lane.b32.xlu1 %v8043_v58, %s6572_s24  ;;  %v3119_v12 = vmax.f32 %v3063_v53, 0.0 }
 0x21a   : > { %v2997_v20 = vld [vmem:[#allocation2 + $0xf8] sm:$0xff]  ;;  %v3068_v45 = vadd.f32 %v7871_v46, %v2888_v19 }
 0x21b   : > { %2945 = vst.msk [vmem:[#allocation2 + $0x118] sm:$0xff] %vm758_vm1, %v2889_v23  ;;  %v2795_v35 = vpop.f32.mrb[148].mxu0  ;;  %v3065_v21 = vadd.f32 %v7911_v41, %v2997_v20 }
 0x21c   : > { %v2890_v18 = vadd.f32 %v2795_v35, %v7756_v60  ;;  %v2797_v48 = vpop.f32.mrb[149].mxu0  ;;  %v3124_v56 = vmax.f32 %v3068_v45, 0.0 }
 0x21d   : > { %v2891_v22 = vadd.f32 %v2797_v48, %v2465_v55  ;;  %v3121_v0 = vmax.f32 %v3065_v21, 0.0  ;;  %v2471_v21 = vld [vmem:[#allocation2 + $0x158] sm:$0xff] }
 0x21e   : > { %v8056_v43 = vmax.f32 %v3122_v61, %v3124_v56  ;;  %v2999_v4 = vld [vmem:[#allocation2 + $0x108] sm:$0xff]  ;;  %v3070_v60 = vadd.f32 %v7871_v46, %v2890_v18 }
 0x21f   : > { %2947 = vst.msk [vmem:[#allocation2 + $0x128] sm:$0xff] %vm758_vm1, %v2891_v22  ;;  %v2801_v5 = vpop.f32.mrb[150].mxu0  ;;  %v8059_v9 = vmax.f32 %v3119_v12, %v3121_v0  ;;  %v3067_v25 = vadd.f32 %v7911_v41, %v2999_v4  ;;  %v2473_v0 = vld [vmem:[#allocation2 + $0x168] sm:$0xff] }
 0x220   : > { %v2892_v34 = vadd.f32 %v2801_v5, %v7761_v42  ;;  %v2803_v8 = vpop.f32.mrb[151].mxu0  ;;  %3234 = vrot.lane.b32.xlu0 %v8056_v43, %s6572_s24  ;;  %v3126_v26 = vmax.f32 %v3070_v60, 0.0 }
 0x221   : > { %v2893_v30 = vadd.f32 %v2803_v8, %v2467_v63  ;;  %3232 = vrot.lane.b32.xlu1 %v8059_v9, %s6572_s24  ;;  %v3123_v31 = vmax.f32 %v3067_v25, 0.0 }
 0x222   : > { %v3001_v24 = vld [vmem:[#allocation2 + $0x118] sm:$0xff]  ;;  %v3072_v39 = vadd.f32 %v7871_v46, %v2892_v34 }
 0x223   : > { %2949 = vst.msk [vmem:[#allocation2 + $0x138] sm:$0xff] %vm758_vm1, %v2893_v30  ;;  %v2807_v14 = vpop.f32.mrb[152].mxu0  ;;  %v3069_v42 = vadd.f32 %v7911_v41, %v3001_v24 }
 0x224   : > { %v2894_v44 = vadd.f32 %v2807_v14, %v7766_v57  ;;  %v2809_v37 = vpop.f32.mrb[153].mxu0  ;;  %v3128_v19 = vmax.f32 %v3072_v39, 0.0 }
 0x225   : > { %v2895_v47 = vadd.f32 %v2809_v37, %v2469_v36  ;;  %v3125_v11 = vmax.f32 %v3069_v42, 0.0  ;;  %v2475_v42 = vld [vmem:[#allocation2 + $0x178] sm:$0xff] }
 0x226   : > { %v8072_v23 = vmax.f32 %v3126_v26, %v3128_v19  ;;  %v3003_v53 = vld [vmem:[#allocation2 + $0x128] sm:$0xff]  ;;  %v3074_v57 = vadd.f32 %v7871_v46, %v2894_v44 }
 0x227   : > { %2951 = vst.msk [vmem:[#allocation2 + $0x148] sm:$0xff] %vm758_vm1, %v2895_v47  ;;  %v2813_v20 = vpop.f32.mrb[154].mxu0  ;;  %v8075_v45 = vmax.f32 %v3123_v31, %v3125_v11  ;;  %v3071_v48 = vadd.f32 %v7911_v41, %v3003_v53  ;;  %v2967_v47 = vld [vmem:[#allocation2 + $0x8] sm:$0xff] }
 0x228   : > { %v2896_v35 = vadd.f32 %v2813_v20, %v7783_v62  ;;  %v2815_v18 = vpop.f32.mrb[155].mxu0  ;;  %3238 = vrot.lane.b32.xlu0 %v8072_v23, %s6572_s24  ;;  %v3130_v5 = vmax.f32 %v3074_v57, 0.0 }
 0x229   : > { %v2897_v55 = vadd.f32 %v2815_v18, %v2471_v21  ;;  %3236 = vrot.lane.b32.xlu1 %v8075_v45, %s6572_s24  ;;  %v3127_v8 = vmax.f32 %v3071_v48, 0.0 }
 0x22a   : > { %v3005_v61 = vld [vmem:[#allocation2 + $0x138] sm:$0xff]  ;;  %v3076_v56 = vadd.f32 %v7871_v46, %v2896_v35  ;;  %v2477_v35 = vld [vmem:[#allocation2 + $0x188] sm:$0xff] }
 0x22b   : > { %2953 = vst.msk [vmem:[#allocation2 + $0x158] sm:$0xff] %vm758_vm1, %v2897_v55  ;;  %v2819_v22 = vpop.f32.mrb[156].mxu0  ;;  %v3073_v62 = vadd.f32 %v7911_v41, %v3005_v61 }
 0x22c   : > { %v2898_v12 = vadd.f32 %v2819_v22, %v7788_v51  ;;  %v2821_v4 = vpop.f32.mrb[157].mxu0  ;;  %v3132_v34 = vmax.f32 %v3076_v56, 0.0  ;;  %v2969_v51 = vld [vmem:[#allocation2 + $0x18] sm:$0xff]  ;;  %v3035_v56 = vadd.f32 %v7911_v41, %v2967_v47 }
 0x22d   : > { %v2899_v63 = vadd.f32 %v2821_v4, %v2473_v0  ;;  %v3129_v60 = vmax.f32 %v3073_v62, 0.0  ;;  %v3037_v53 = vadd.f32 %v7911_v41, %v2969_v51 }
 0x22e   : > { %v8088_v30 = vmax.f32 %v3130_v5, %v3132_v34  ;;  %v3007_v25 = vld [vmem:[#allocation2 + $0x148] sm:$0xff]  ;;  %v3078_v36 = vadd.f32 %v7871_v46, %v2898_v12  ;;  %v2479_v5 = vld [vmem:[#allocation2 + $0x198] sm:$0xff] }
 0x22f   : > { %2955 = vst.msk [vmem:[#allocation2 + $0x168] sm:$0xff] %vm758_vm1, %v2899_v63  ;;  %v2825_v24 = vpop.f32.mrb[158].mxu0  ;;  %v8091_v39 = vmax.f32 %v3127_v8, %v3129_v60  ;;  %v3075_v26 = vadd.f32 %v7911_v41, %v3007_v25  ;;  %v3091_v60 = vmax.f32 %v3035_v56, 0.0 }
 0x230   : > { %v2900_v14 = vadd.f32 %v2825_v24, %v7805_v38  ;;  %v2827_v44 = vpop.f32.mrb[159].mxu0  ;;  %3242 = vrot.lane.b32.xlu0 %v8088_v30, %s6572_s24  ;;  %v3134_v18 = vmax.f32 %v3078_v36, 0.0  ;;  %v2481_v36 = vld [vmem:[#allocation2 + $0x1a8] sm:$0xff] }
 0x231   : > { %v2901_v37 = vadd.f32 %v2827_v44, %v2475_v42  ;;  %3240 = vrot.lane.b32.xlu1 %v8091_v39, %s6572_s24  ;;  %v3131_v48 = vmax.f32 %v3075_v26, 0.0 }
 0x232   : > { %v3009_v19 = vld [vmem:[#allocation2 + $0x158] sm:$0xff]  ;;  %v3080_v31 = vadd.f32 %v7871_v46, %v2900_v14 }
 0x233   : > { %2957 = vst.msk [vmem:[#allocation2 + $0x178] sm:$0xff] %vm758_vm1, %v2901_v37  ;;  %v2831_v38 = vpop.f32.mrb[160].mxu0  ;;  %v3077_v11 = vadd.f32 %v7911_v41, %v3009_v19 }
 0x234   : > { %v2902_v20 = vadd.f32 %v2831_v38, %v7819_v1  ;;  %v2833_v21 = vpop.f32.mrb[161].mxu0  ;;  %3202 = vrot.lane.b32.xlu0 %v7896_v2, %s6572_s24  ;;  %v3136_v57 = vmax.f32 %v3080_v31, 0.0  ;;  %v3093_v1 = vmax.f32 %v3037_v53, 0.0 }
 0x235   : > { %v2903_v55 = vadd.f32 %v2833_v21, %v2477_v35  ;;  %v3133_v61 = vmax.f32 %v3077_v11, 0.0  ;;  %v2483_v21 = vld [vmem:[#allocation2 + $0x1b8] sm:$0xff] }
 0x236   : > { %v8108_v22 = vmax.f32 %v3134_v18, %v3136_v57  ;;  %v3011_v62 = vld [vmem:[#allocation2 + $0x168] sm:$0xff]  ;;  %v3082_v63 = vadd.f32 %v7871_v46, %v2902_v20  ;;  %v8122_v42 = vmax.f32 %v3091_v60, %v3093_v1 }
 0x237   : > { %2959 = vst.msk [vmem:[#allocation2 + $0x188] sm:$0xff] %vm758_vm1, %v2903_v55  ;;  %v2837_v12 = vpop.f32.mrb[162].mxu0  ;;  %v8111_v0 = vmax.f32 %v3131_v48, %v3133_v61  ;;  %v3079_v25 = vadd.f32 %v7911_v41, %v3011_v62 }
 0x238   : > { %v2904_v4 = vadd.f32 %v2837_v12, %v7829_v16  ;;  %v2839_v34 = vpop.f32.mrb[163].mxu0  ;;  %3246 = vrot.lane.b32.xlu0 %v8108_v22, %s6572_s24  ;;  %v3138_v26 = vmax.f32 %v3082_v63, 0.0 }
 0x239   : > { %v2905_v8 = vadd.f32 %v2839_v34, %v2479_v5  ;;  %3244 = vrot.lane.b32.xlu1 %v8111_v0, %s6572_s24  ;;  %v3135_v31 = vmax.f32 %v3079_v25, 0.0 }
 0x23a   : > { %v3013_v24 = vld [vmem:[#allocation2 + $0x178] sm:$0xff]  ;;  %v3084_v14 = vadd.f32 %v7871_v46, %v2904_v4 }
 0x23b   : > { %2961 = vst.msk [vmem:[#allocation2 + $0x198] sm:$0xff] %vm758_vm1, %v2905_v8  ;;  %v2843_v16 = vpop.f32.mrb[164].mxu0  ;;  %v3081_v44 = vadd.f32 %v7911_v41, %v3013_v24 }
 0x23c   : > { %v2906_v51 = vadd.f32 %v2843_v16, %v7849_v52  ;;  %v2845_v37 = vpop.f32.mrb[165].mxu0  ;;  %v3140_v19 = vmax.f32 %v3084_v14, 0.0 }
 0x23d   : > { %v2907_v47 = vadd.f32 %v2845_v37, %v2481_v36  ;;  %3204 = vrot.lane.b32.xlu1 %v8122_v42, %s6572_s24  ;;  %v3137_v38 = vmax.f32 %v3081_v44, 0.0 }
 0x23e   : > { %v8128_v11 = vmax.f32 %v3138_v26, %v3140_v19  ;;  %v3015_v53 = vld [vmem:[#allocation2 + $0x188] sm:$0xff]  ;;  %v3086_v57 = vadd.f32 %v7871_v46, %v2906_v51  ;;  %v3378_v26 = vld [vmem:[%s9446_s3] sm:$0xff]  ;;  %v3380_v19 = vld [vmem:[%s9446_s3 + $0x10] sm:$0xff] }
 0x23f   : > { %2963 = vst.msk [vmem:[#allocation2 + $0x1a8] sm:$0xff] %vm758_vm1, %v2907_v47  ;;  %v2849_v20 = vpop.f32.mrb[166].mxu0  ;;  %v8131_v35 = vmax.f32 %v3135_v31, %v3137_v38  ;;  %v3083_v48 = vadd.f32 %v7911_v41, %v3015_v53  ;;  %v3383_v47 = vld [vmem:[%s9446_s3 + $0x28] sm:$0xff]  ;;  %v6136_v53 = vpack.c.bf16 %v3380_v19, %v3378_v26  ;;  %v3401_v19 = vld [vmem:[%s9446_s3 + $0xb8] sm:$0xff] }
 0x240   : > { %v2908_v52 = vadd.f32 %v2849_v20, %v7874_v40  ;;  %v2851_v18 = vpop.f32.mrb[167].mxu0  ;;  %3250 = vrot.lane.b32.xlu0 %v8128_v11, %s6572_s24  ;;  %v3142_v62 = vmax.f32 %v3086_v57, 0.0  ;;  %v3384_v57 = vld [vmem:[%s9446_s3 + $0x30] sm:$0xff]  ;;  %v3399_v26 = vld [vmem:[%s9446_s3 + $0xa8] sm:$0xff] }
 0x241   : > { %v2909_v55 = vadd.f32 %v2851_v18, %v2483_v21  ;;  %3248 = vrot.lane.b32.xlu1 %v8131_v35, %s6572_s24  ;;  %v3139_v1 = vmax.f32 %v3083_v48, 0.0  ;;  %v3382_v18 = vld [vmem:[%s9446_s3 + $0x20] sm:$0xff] }
 0x242   : > { %v3017_v61 = vld [vmem:[#allocation2 + $0x198] sm:$0xff]  ;;  %v3088_v56 = vadd.f32 %v7871_v46, %v2908_v52 }
 0x243   : > { %2965 = vst.msk [vmem:[#allocation2 + $0x1b8] sm:$0xff] %vm758_vm1, %v2909_v55  ;;  %v3085_v40 = vadd.f32 %v7911_v41, %v3017_v61  ;;  %v6140_v55 = vpack.c.bf16 %v3384_v57, %v3382_v18  ;;  %v3386_v61 = vld [vmem:[%s9446_s3 + $0x40] sm:$0xff]  ;;  %v6154_v18 = vpack.c.bf16 %v3401_v19, %v3399_v26  ;;  %v3417_v26 = vld [vmem:[%s9446_s3 + $0x138] sm:$0xff] }
 0x244   : > { %v3144_v12 = vmax.f32 %v3088_v56, 0.0  ;;  %v3388_v56 = vld [vmem:[%s9446_s3 + $0x50] sm:$0xff]  ;;  %v3398_v57 = vld [vmem:[%s9446_s3 + $0xa0] sm:$0xff] }
 0x245   : > { %v3141_v4 = vmax.f32 %v3085_v40, 0.0  ;;  %v3391_v40 = vld [vmem:[%s9446_s3 + $0x68] sm:$0xff] }
 0x246   : > { %v8143_v5 = vmax.f32 %v3142_v62, %v3144_v12  ;;  %v3019_v34 = vld [vmem:[#allocation2 + $0x1a8] sm:$0xff]  ;;  %v3393_v62 = vld [vmem:[%s9446_s3 + $0x78] sm:$0xff] }
 0x247   : > { %v8145_v63 = vmax.f32 %v3139_v1, %v3141_v4  ;;  %v3087_v46 = vadd.f32 %v7911_v41, %v3019_v34 }
 0x248   : > { %3254 = vrot.lane.b32.xlu0 %v8143_v5, %s6572_s24 }
 0x249   : > { %3252 = vrot.lane.b32.xlu1 %v8145_v63, %s6572_s24  ;;  %v3143_v25 = vmax.f32 %v3087_v46, 0.0  ;;  %v6144_v46 = vpack.c.bf16 %v3388_v56, %v3386_v61  ;;  %v3404_v61 = vld [vmem:[%s9446_s3 + $0xd0] sm:$0xff]  ;;  %v3407_v56 = vld [vmem:[%s9446_s3 + $0xe8] sm:$0xff] }
 0x24a   : > { %v3021_v8 = vld [vmem:[#allocation2 + $0x1b8] sm:$0xff] }
 0x24b   : > { %v3089_v60 = vadd.f32 %v7911_v41, %v3021_v8 }
 0x24d   : > { %v3145_v24 = vmax.f32 %v3089_v60, 0.0 }
 0x24f   : > { %v8153_v14 = vmax.f32 %v3143_v25, %v3145_v24  ;;  %v6146_v25 = vpack.c.bf16 %v3393_v62, %v3391_v40  ;;  %v3390_v24 = vld [vmem:[%s9446_s3 + $0x60] sm:$0xff]  ;;  %v3409_v40 = vld [vmem:[%s9446_s3 + $0xf8] sm:$0xff] }
 0x251   : > { %3256 = vrot.lane.b32.xlu1 %v8153_v14, %s6572_s24 }
 0x25a   : > { %v3207_v16 = vpop.permute.xlu0 %3206 }
 0x262   : > { %v3211_v41 = vpop.permute.xlu1 %3210 }
 0x263   : > { %v3209_v44 = vpop.permute.xlu0 %3208 }
 0x264   : > { %v3260_v51 = vsel %vm3258_vm3, %v3207_v16, %v3209_v44  ;;  %v3304_v36 = vmax.f32 %v7949_v50, %v3209_v44  ;;  %v3392_v16 = vld [vmem:[%s9446_s3 + $0x70] sm:$0xff] }
 0x265   : > { %v8160_v37 = vmax.f32 %v7905_v33, %v3260_v51  ;;  %v3385_v33 = vld [vmem:[%s9446_s3 + $0x38] sm:$0xff]  ;;  %v6148_v44 = vpack.c.bf16 %v3392_v16, %v3390_v24  ;;  %v6162_v24 = vpack.c.bf16 %v3409_v40, %v3407_v56  ;;  %v3406_v16 = vld [vmem:[%s9446_s3 + $0xe0] sm:$0xff] }
 0x266   : > { %3333 = vst.msk [vmem:[#allocation3 + $0x18] sm:$0xff] %vm3330_vm4, %v3304_v36  ;;  %v6138_v21 = vpack.c.bf16 %v3385_v33, %v3383_v47  ;;  %v3394_v36 = vld [vmem:[%s9446_s3 + $0x80] sm:$0xff] }
 0x26a   : > { %v3215_v12 = vpop.permute.xlu0 %3214 }
 0x26b   : > { %v3213_v50 = vpop.permute.xlu1 %3212 }
 0x26c   : > { %v3261_v31 = vsel %vm3258_vm3, %v3211_v41, %v3213_v50  ;;  %v3306_v38 = vmax.f32 %v7973_v29, %v3213_v50  ;;  %v3389_v29 = vld [vmem:[%s9446_s3 + $0x58] sm:$0xff]  ;;  %v3396_v41 = vld [vmem:[%s9446_s3 + $0x90] sm:$0xff] }
 0x26d   : > { %v8178_v20 = vmax.f32 %v7946_v32, %v3261_v31  ;;  %v8180_v52 = vld [vmem:[#allocation3 + $0x18] sm:$0xff]  ;;  %v3387_v32 = vld [vmem:[%s9446_s3 + $0x48] sm:$0xff] }
 0x26e   : > { %3335 = vst.msk [vmem:[#allocation3 + $0x28] sm:$0xff] %vm3330_vm4, %v3306_v38  ;;  %5619 = vmatprep.mubr.msk.f32.mxu1 %vm3330_vm4, %v8180_v52  ;;  %v6142_v48 = vpack.c.bf16 %v3389_v29, %v3387_v32  ;;  %v6152_v38 = vpack.c.bf16 %v3396_v41, %v3394_v36  ;;  %v3400_v32 = vld [vmem:[%s9446_s3 + $0xb0] sm:$0xff]  ;;  %v3415_v41 = vld [vmem:[%s9446_s3 + $0x128] sm:$0xff] }
 0x26f   : > { %3567 = vmatmul.mubr.f32.vlgmr.msra.gmra.mrb[112].mxu1 %v8160_v37  ;;  %v6156_v29 = vpack.c.bf16 %v3400_v32, %v3398_v57  ;;  %v3412_v36 = vld [vmem:[%s9446_s3 + $0x110] sm:$0xff]  ;;  %v6170_v57 = vpack.c.bf16 %v3417_v26, %v3415_v41  ;;  %v3414_v32 = vld [vmem:[%s9446_s3 + $0x120] sm:$0xff] }
 0x270   : > { %6137 = vmatpush1.bf16.msra.mxu1 %v6136_v53 }
 0x271   : > { %6139 = vmatprep.subr.bf16.mxu1 %v6138_v21 }
 0x272   : > { %v3219_v47 = vpop.permute.xlu0 %3218 }
 0x273   : > { %v3217_v1 = vpop.permute.xlu1 %3216 }
 0x274   : > { %v3262_v4 = vsel %vm3258_vm3, %v3215_v12, %v3217_v1  ;;  %v3308_v34 = vmax.f32 %v7989_v49, %v3217_v1  ;;  %6141 = vmatpush1.bf16.msra.mxu1 %v6140_v55  ;;  %v3397_v49 = vld [vmem:[%s9446_s3 + $0x98] sm:$0xff] }
 0x275   : > { %v8213_v8 = vmax.f32 %v7970_v27, %v3262_v4  ;;  %v8215_v60 = vld [vmem:[#allocation3 + $0x28] sm:$0xff]  ;;  %6143 = vmatprep.subr.bf16.mxu1 %v6142_v48  ;;  %v3402_v48 = vld [vmem:[%s9446_s3 + $0xc0] sm:$0xff] }
 0x276   : > { %3337 = vst.msk [vmem:[#allocation3 + $0x38] sm:$0xff] %vm3330_vm4, %v3308_v34  ;;  %5620 = vmatprep.mubr.msk.f32.mxu1 %vm3330_vm4, %v8215_v60  ;;  %v3395_v27 = vld [vmem:[%s9446_s3 + $0x88] sm:$0xff]  ;;  %v6160_v34 = vpack.c.bf16 %v3404_v61, %v3402_v48 }
 0x277   : > { %3573 = vmatmul.mubr.f32.gmra.mrb[114].mxu1 %v8178_v20  ;;  %v6150_v51 = vpack.c.bf16 %v3397_v49, %v3395_v27  ;;  %v3408_v27 = vld [vmem:[%s9446_s3 + $0xf0] sm:$0xff] }
 0x278   : > { %6145 = vmatpush1.bf16.msra.mxu1 %v6144_v46  ;;  %v6164_v49 = vpack.c.bf16 %v3408_v27, %v3406_v16 }
 0x279   : > { %6147 = vmatprep.subr.bf16.mxu1 %v6146_v25 }
 0x27a   : > { %v3223_v62 = vpop.permute.xlu0 %3222 }
 0x27b   : > { %v3221_v33 = vpop.permute.xlu1 %3220 }
 0x27c   : > { %v3263_v50 = vsel %vm3258_vm3, %v3219_v47, %v3221_v33  ;;  %v3310_v31 = vmax.f32 %v8005_v17, %v3221_v33  ;;  %6149 = vmatpush1.bf16.msra.mxu1 %v6148_v44  ;;  %v3405_v17 = vld [vmem:[%s9446_s3 + $0xd8] sm:$0xff] }
 0x27d   : > { %v8248_v53 = vmax.f32 %v7986_v28, %v3263_v50  ;;  %v8250_v21 = vld [vmem:[#allocation3 + $0x38] sm:$0xff]  ;;  %6151 = vmatprep.subr.bf16.mxu1 %v6150_v51  ;;  %v3403_v28 = vld [vmem:[%s9446_s3 + $0xc8] sm:$0xff]  ;;  %v3410_v51 = vld [vmem:[%s9446_s3 + $0x100] sm:$0xff] }
 0x27e   : > { %3339 = vst.msk [vmem:[#allocation3 + $0x48] sm:$0xff] %vm3330_vm4, %v3310_v31  ;;  %5621 = vmatprep.mubr.msk.f32.mxu1 %vm3330_vm4, %v8250_v21  ;;  %v6158_v55 = vpack.c.bf16 %v3405_v17, %v3403_v28  ;;  %v6168_v31 = vpack.c.bf16 %v3412_v36, %v3410_v51  ;;  %v3416_v28 = vld [vmem:[%s9446_s3 + $0x130] sm:$0xff]  ;;  %v5642_v17 = vld [vmem:[%s9446_s3 + $0x2a8] sm:$0xff] }
 0x27f   : > { %3338 = vst [vmem:[#allocation3 + $0x40] sm:$0xff] %v8248_v53  ;;  %3579 = vmatmul.mubr.f32.gmra.mrb[116].mxu1 %v8213_v8 }
 0x280   : > { %6153 = vmatpush1.bf16.msra.mxu1 %v6152_v38 }
 0x281   : > { %6155 = vmatprep.subr.bf16.mxu1 %v6154_v18 }
 0x282   : > { %v3227_v19 = vpop.permute.xlu0 %3226 }
 0x283   : > { %v3225_v12 = vpop.permute.xlu1 %3224 }
 0x284   : > { %v3264_v1 = vsel %vm3258_vm3, %v3223_v62, %v3225_v12  ;;  %v3312_v4 = vmax.f32 %v8021_v59, %v3225_v12  ;;  %6157 = vmatpush1.bf16.msra.mxu1 %v6156_v29  ;;  %v3413_v59 = vld [vmem:[%s9446_s3 + $0x118] sm:$0xff]  ;;  %v3418_v12 = vld [vmem:[%s9446_s3 + $0x140] sm:$0x3] }
 0x285   : > { %v8284_v46 = vmax.f32 %v8002_v13, %v3264_v1  ;;  %v8286_v25 = vld [vmem:[#allocation3 + $0x48] sm:$0xff]  ;;  %6159 = vmatprep.subr.bf16.mxu1 %v6158_v55  ;;  %v5644_v29 = vld [vmem:[%s9446_s3 + $0x2b8] sm:$0xff] }
 0x286   : > { %3341 = vst.msk [vmem:[#allocation3 + $0x58] sm:$0xff] %vm3330_vm4, %v3312_v4  ;;  %5622 = vmatprep.mubr.msk.f32.mxu1 %vm3330_vm4, %v8286_v25  ;;  %v3411_v13 = vld [vmem:[%s9446_s3 + $0x108] sm:$0xff]  ;;  %v6174_v1 = vpack.c.bf16 %v5644_v29, %v5642_v17  ;;  %v5645_v29 = vld [vmem:[%s9446_s3 + $0x2c0] sm:$0xff] }
 0x287   : > { %3340 = vst [vmem:[#allocation3 + $0x50] sm:$0xff] %v8284_v46  ;;  %3585 = vmatmul.mubr.f32.gmra.mrb[118].mxu1 %v8248_v53  ;;  %v6166_v44 = vpack.c.bf16 %v3413_v59, %v3411_v13 }
 0x288   : > { %6161 = vmatpush1.bf16.msra.mxu1 %v6160_v34 }
 0x289   : > { %6163 = vmatprep.subr.bf16.mxu1 %v6162_v24 }
 0x28a   : > { %v3231_v55 = vpop.permute.xlu0 %3230 }
 0x28b   : > { %v3229_v47 = vpop.permute.xlu1 %3228 }
 0x28c   : > { %v3265_v33 = vsel %vm3258_vm3, %v3227_v19, %v3229_v47  ;;  %v3314_v50 = vmax.f32 %v8043_v58, %v3229_v47  ;;  %6165 = vmatpush1.bf16.msra.mxu1 %v6164_v49  ;;  %v3419_v58 = vld [vmem:[%s9446_s3 + $0x148] sm:$0x3] }
 0x28d   : > { %v8320_v38 = vmax.f32 %v8018_v54, %v3265_v33  ;;  %v8322_v18 = vld [vmem:[#allocation3 + $0x58] sm:$0xff]  ;;  %6167 = vmatprep.subr.bf16.mxu1 %v6166_v44  ;;  %v6172_v54 = vpack.c.bf16 %v3416_v28, %v3414_v32 }
 0x28e   : > { %3343 = vst.msk [vmem:[#allocation3 + $0x68] sm:$0xff] %vm3330_vm4, %v3314_v50  ;;  %5623 = vmatprep.mubr.msk.f32.mxu1 %vm3330_vm4, %v8322_v18 }
 0x28f   : > { %3342 = vst [vmem:[#allocation3 + $0x60] sm:$0xff] %v8320_v38  ;;  %3591 = vmatmul.mubr.f32.gmra.mrb[120].mxu1 %v8284_v46 }
 0x290   : > { %6169 = vmatpush1.bf16.msra.mxu1 %v6168_v31 }
 0x291   : > { %6171 = vmatprep.subr.bf16.mxu1 %v6170_v57 }
 0x293   : > { %v3233_v48 = vpop.permute.xlu1 %3232 }
 0x294   : > { %v3266_v61 = vsel %vm3258_vm3, %v3231_v55, %v3233_v48  ;;  %v3316_v56 = vmax.f32 %v8059_v9, %v3233_v48  ;;  %6173 = vmatpush1.bf16.msra.mxu1 %v6172_v54  ;;  %v5641_v54 = vld [vmem:[%s9446_s3 + $0x2a0] sm:$0xff]  ;;  %v5647_v55 = vld [vmem:[%s9446_s3 + $0x2d0] sm:$0xff]  ;;  %v5650_v48 = vld [vmem:[%s9446_s3 + $0x2e8] sm:$0xff] }
 0x295   : > { %v8347_v40 = vmax.f32 %v8040_v6, %v3266_v61  ;;  %v8349_v62 = vld [vmem:[#allocation3 + $0x68] sm:$0xff]  ;;  %5629 = vmatprep.subr.msk.mxu1 %vm3495_vm2, %v3419_v58  ;;  %v3235_v6 = vpop.permute.xlu0 %3234  ;;  %v5652_v61 = vld [vmem:[%s9446_s3 + $0x2f8] sm:$0xff] }
 0x296   : > { %3345 = vst.msk [vmem:[#allocation3 + $0x78] sm:$0xff] %vm3330_vm4, %v3316_v56  ;;  %5624 = vmatprep.mubr.msk.f32.mxu1 %vm3330_vm4, %v8349_v62 }
 0x297   : > { %3344 = vst [vmem:[#allocation3 + $0x70] sm:$0xff] %v8347_v40  ;;  %3597 = vmatmul.mubr.f32.gmra.mrb[122].mxu1 %v8320_v38 }
 0x298   : > { %5630 = vmatpush1.msk.msra.mxu1 %vm3495_vm2, %v3418_v12 }
 0x299   : > { %6175 = vmatprep.subr.bf16.mxu1 %v6174_v1 }
 0x29a   : > { %v3239_v27 = vpop.permute.xlu0 %3238 }
 0x29b   : > { %v3237_v9 = vpop.permute.xlu1 %3236 }
 0x29c   : > { %v3267_v4 = vsel %vm3258_vm3, %v3235_v6, %v3237_v9  ;;  %v3318_v34 = vmax.f32 %v8075_v45, %v3237_v9  ;;  %v6180_v9 = vpack.c.bf16 %v5647_v55, %v5645_v29  ;;  %v5665_v29 = vld [vmem:[%s9446_s3 + $0x360] sm:$0xff]  ;;  %v5667_v55 = vld [vmem:[%s9446_s3 + $0x370] sm:$0xff] }
 0x29d   : > { %v8364_v24 = vmax.f32 %v8056_v43, %v3267_v4  ;;  %v8366_v16 = vld [vmem:[#allocation3 + $0x78] sm:$0xff] }
 0x29e   : > { %3347 = vst.msk [vmem:[#allocation3 + $0x88] sm:$0xff] %vm3330_vm4, %v3318_v34  ;;  %5625 = vmatprep.mubr.msk.f32.mxu1 %vm3330_vm4, %v8366_v16  ;;  %v6182_v34 = vpack.c.bf16 %v5652_v61, %v5650_v48  ;;  %v5670_v48 = vld [vmem:[%s9446_s3 + $0x388] sm:$0xff]  ;;  %v5672_v61 = vld [vmem:[%s9446_s3 + $0x398] sm:$0xff] }
 0x29f   : > { %3603 = vmatmul.mubr.f32.gmra.mrb[124].mxu1 %v8347_v40 }
 0x2a2   : > { %v3243_v44 = vpop.permute.xlu0 %3242 }
 0x2a3   : > { %v3241_v13 = vpop.permute.xlu1 %3240 }
 0x2a4   : > { %v3268_v59 = vsel %vm3258_vm3, %v3239_v27, %v3241_v13  ;;  %v3320_v49 = vmax.f32 %v8091_v39, %v3241_v13  ;;  %v5649_v27 = vld [vmem:[%s9446_s3 + $0x2e0] sm:$0xff]  ;;  %v5651_v13 = vld [vmem:[%s9446_s3 + $0x2f0] sm:$0xff] }
 0x2a5   : > { %v8375_v45 = vmax.f32 %v8072_v23, %v3268_v59  ;;  %v8377_v43 = vld [vmem:[#allocation3 + $0x88] sm:$0xff] }
 0x2a6   : > { %3349 = vst.msk [vmem:[#allocation3 + $0x98] sm:$0xff] %vm3330_vm4, %v3320_v49  ;;  %5626 = vmatprep.mubr.msk.f32.mxu1 %vm3330_vm4, %v8377_v43  ;;  %v3203_v26 = vpop.permute.xlu0 %3202  ;;  %v5653_v49 = vld [vmem:[%s9446_s3 + $0x300] sm:$0xff] }
 0x2a7   : > { %3609 = vmatmul.mubr.f32.gmra.mrb[126].mxu1 %v8364_v24 }
 0x2ab   : > { %v3245_v51 = vpop.permute.xlu1 %3244 }
 0x2ac   : > { %v3269_v36 = vsel %vm3258_vm3, %v3243_v44, %v3245_v51  ;;  %v3322_v41 = vmax.f32 %v8111_v0, %v3245_v51  ;;  %v5655_v44 = vld [vmem:[%s9446_s3 + $0x310] sm:$0xff]  ;;  %v5658_v51 = vld [vmem:[%s9446_s3 + $0x328] sm:$0xff] }
 0x2ad   : > { %v8386_v39 = vmax.f32 %v8088_v30, %v3269_v36  ;;  %v8388_v23 = vld [vmem:[#allocation3 + $0x98] sm:$0xff]  ;;  %v3247_v30 = vpop.permute.xlu0 %3246 }
 0x2ae   : > { %3351 = vst.msk [vmem:[#allocation3 + $0xa8] sm:$0xff] %vm3330_vm4, %v3322_v41  ;;  %5627 = vmatprep.mubr.msk.f32.mxu1 %vm3330_vm4, %v8388_v23 }
 0x2af   : > { %3615 = vmatmul.mubr.f32.gmra.mrb[128].mxu1 %v8375_v45  ;;  %v3205_v19 = vpop.permute.xlu1 %3204 }
 0x2b0   : > { %v3259_v47 = vsel %vm3258_vm3, %v3203_v26, %v3205_v19  ;;  %v3302_v33 = vmax.f32 %v8122_v42, %v3205_v19  ;;  %v5648_v42 = vld [vmem:[%s9446_s3 + $0x2d8] sm:$0xff] }
 0x2b1   : > { %v3301_v0 = vmax.f32 %v7896_v2, %v3259_v47  ;;  %v5643_v2 = vld [vmem:[%s9446_s3 + $0x2b0] sm:$0xff]  ;;  %v6188_v47 = vpack.c.bf16 %v5655_v44, %v5653_v49 }
 0x2b2   : > { %3331 = vst.msk [vmem:[#allocation3 + $0x8] sm:$0xff] %vm3330_vm4, %v3302_v33  ;;  %v3251_v56 = vpop.permute.xlu0 %3250 }
 0x2b3   : > { %v3249_v50 = vpop.permute.xlu1 %3248 }
 0x2b4   : > { %v3270_v31 = vsel %vm3258_vm3, %v3247_v30, %v3249_v50  ;;  %v3324_v57 = vmax.f32 %v8131_v35, %v3249_v50  ;;  %v6176_v35 = vpack.c.bf16 %v5643_v2, %v5641_v54  ;;  %v5657_v30 = vld [vmem:[%s9446_s3 + $0x320] sm:$0xff]  ;;  %v5659_v50 = vld [vmem:[%s9446_s3 + $0x330] sm:$0xff] }
 0x2b5   : > { %v8401_v32 = vmax.f32 %v8108_v22, %v3270_v31  ;;  %v8403_v28 = vld [vmem:[#allocation3 + $0xa8] sm:$0xff]  ;;  %v5664_v31 = vld [vmem:[%s9446_s3 + $0x358] sm:$0xff]  ;;  %v5661_v2 = vld [vmem:[%s9446_s3 + $0x340] sm:$0xff] }
 0x2b6   : > { %3353 = vst.msk [vmem:[#allocation3 + $0xb8] sm:$0xff] %vm3330_vm4, %v3324_v57  ;;  %5628 = vmatprep.mubr.msk.f32.mxu1 %vm3330_vm4, %v8403_v28  ;;  %v5646_v22 = vld [vmem:[%s9446_s3 + $0x2c8] sm:$0xff]  ;;  %v6192_v57 = vpack.c.bf16 %v5659_v50, %v5657_v30  ;;  %v5697_v30 = vld [vmem:[%s9446_s3 + $0x400] sm:$0xff]  ;;  %v5700_v50 = vld [vmem:[%s9446_s3 + $0x418] sm:$0xff] }
 0x2b7   : > { %3621 = vmatmul.mubr.f32.gmra.mrb[130].mxu1 %v8386_v39  ;;  %v6178_v17 = vpack.c.bf16 %v5648_v42, %v5646_v22  ;;  %v5663_v22 = vld [vmem:[%s9446_s3 + $0x350] sm:$0xff]  ;;  %v5666_v42 = vld [vmem:[%s9446_s3 + $0x368] sm:$0xff] }
 0x2b9   : > { %v3359_v58 = vld [vmem:[#allocation3 + $0x8] sm:$0xff] }
 0x2ba   : > { %5631 = vmatprep.mubr.msk.f32.mxu1 %vm3330_vm4, %v3359_v58  ;;  %v3255_v36 = vpop.permute.xlu0 %3254  ;;  %v6196_v58 = vpack.c.bf16 %v5663_v22, %v5661_v2  ;;  %v5701_v22 = vld [vmem:[%s9446_s3 + $0x420] sm:$0xff] }
 0x2bb   : > { %3701 = vmatmul.mubr.f32.vlgmr.msra.gmra.mrb[112].mxu1 %v3301_v0  ;;  %v3253_v12 = vpop.permute.xlu1 %3252 }
 0x2bc   : > { %6177 = vmatpush1.bf16.msra.mxu1 %v6176_v35  ;;  %v3271_v1 = vsel %vm3258_vm3, %v3251_v56, %v3253_v12  ;;  %v3326_v6 = vmax.f32 %v8145_v63, %v3253_v12  ;;  %5632 = vmatprep.mubr.msk.f32.mxu1 %vm3330_vm4, %v8180_v52  ;;  %v5654_v63 = vld [vmem:[%s9446_s3 + $0x308] sm:$0xff]  ;;  %v6184_v52 = vpack.c.bf16 %v5651_v13, %v5649_v27  ;;  %v5668_v35 = vld [vmem:[%s9446_s3 + $0x378] sm:$0xff] }
 0x2bd   : > { %v8439_v4 = vmax.f32 %v8128_v11, %v3271_v1  ;;  %6179 = vmatprep.subr.bf16.mxu1 %v6178_v17  ;;  %v5656_v11 = vld [vmem:[%s9446_s3 + $0x318] sm:$0xff]  ;;  %v6198_v17 = vpack.c.bf16 %v5668_v35, %v5666_v42  ;;  %v6200_v56 = vpack.c.bf16 %v5667_v55, %v5665_v29  ;;  %v6202_v12 = vpack.c.bf16 %v5672_v61, %v5670_v48  ;;  %v5669_v1 = vld [vmem:[%s9446_s3 + $0x380] sm:$0xff]  ;;  %v5706_v35 = vld [vmem:[%s9446_s3 + $0x448] sm:$0xff] }
 0x2be   : > { %3355 = vst.msk [vmem:[#allocation3 + $0xc8] sm:$0xff] %vm3330_vm4, %v3326_v6  ;;  %v6186_v59 = vpack.c.bf16 %v5656_v11, %v5654_v63  ;;  %v5671_v6 = vld [vmem:[%s9446_s3 + $0x390] sm:$0xff]  ;;  %v5673_v63 = vld [vmem:[%s9446_s3 + $0x3a0] sm:$0xff]  ;;  %v5704_v42 = vld [vmem:[%s9446_s3 + $0x438] sm:$0xff] }
 0x2bf   : > { %3707 = vmatmul.mubr.f32.gmra.mrb[114].mxu1 %v8160_v37  ;;  %v5660_v37 = vld [vmem:[%s9446_s3 + $0x338] sm:$0xff]  ;;  %v6204_v27 = vpack.c.bf16 %v5671_v6, %v5669_v1  ;;  %v5675_v11 = vld [vmem:[%s9446_s3 + $0x3b0] sm:$0xff]  ;;  %v5705_v55 = vld [vmem:[%s9446_s3 + $0x440] sm:$0xff] }
 0x2c0   : > { %6181 = vmatpush1.bf16.msra.mxu1 %v6180_v9  ;;  %5633 = vmatprep.mubr.msk.f32.mxu1 %vm3330_vm4, %v8215_v60  ;;  %v6190_v0 = vpack.c.bf16 %v5660_v37, %v5658_v51  ;;  %v5674_v9 = vld [vmem:[%s9446_s3 + $0x3a8] sm:$0xff]  ;;  %v6208_v49 = vpack.c.bf16 %v5675_v11, %v5673_v63  ;;  %v5677_v51 = vld [vmem:[%s9446_s3 + $0x3c0] sm:$0xff]  ;;  %v5679_v37 = vld [vmem:[%s9446_s3 + $0x3d0] sm:$0xff] }
 0x2c1   : > { %6183 = vmatprep.subr.bf16.mxu1 %v6182_v34  ;;  %v5676_v34 = vld [vmem:[%s9446_s3 + $0x3b8] sm:$0xff]  ;;  %v5703_v29 = vld [vmem:[%s9446_s3 + $0x430] sm:$0xff]  ;;  %v5710_v48 = vld [vmem:[%s9446_s3 + $0x468] sm:$0xff] }
 0x2c2   : > { %v6206_v13 = vpack.c.bf16 %v5676_v34, %v5674_v9  ;;  %v6224_v61 = vpack.c.bf16 %v5705_v55, %v5703_v29  ;;  %v5709_v1 = vld [vmem:[%s9446_s3 + $0x460] sm:$0xff]  ;;  %v5712_v6 = vld [vmem:[%s9446_s3 + $0x478] sm:$0xff]  ;;  %v5714_v9 = vld [vmem:[%s9446_s3 + $0x488] sm:$0xff] }
 0x2c3   : > { %3713 = vmatmul.mubr.f32.gmra.mrb[116].mxu1 %v8178_v20  ;;  %v3257_v41 = vpop.permute.xlu1 %3256  ;;  %v5713_v63 = vld [vmem:[%s9446_s3 + $0x480] sm:$0xff]  ;;  %v5716_v11 = vld [vmem:[%s9446_s3 + $0x498] sm:$0xff]  ;;  %v5734_v29 = vld [vmem:[%s9446_s3 + $0x528] sm:$0xff] }
 0x2c4   : > { %6185 = vmatpush1.bf16.msra.mxu1 %v6184_v52  ;;  %v8471_v26 = vsel %vm3258_vm3, %v3255_v36, %v3257_v41  ;;  %v3328_v19 = vmax.f32 %v8153_v14, %v3257_v41  ;;  %5634 = vmatprep.mubr.msk.f32.mxu1 %vm3330_vm4, %v8250_v21  ;;  %v5662_v14 = vld [vmem:[%s9446_s3 + $0x348] sm:$0xff]  ;;  %v6212_v36 = vpack.c.bf16 %v5679_v37, %v5677_v51  ;;  %v5717_v51 = vld [vmem:[%s9446_s3 + $0x4a0] sm:$0xff]  ;;  %v5720_v37 = vld [vmem:[%s9446_s3 + $0x4b8] sm:$0xff] }
 0x2c5   : > { %v3327_v33 = vmax.f32 %v8143_v5, %v8471_v26  ;;  %6187 = vmatprep.subr.bf16.mxu1 %v6186_v59  ;;  %v6194_v54 = vpack.c.bf16 %v5664_v31, %v5662_v14  ;;  %v5678_v52 = vld [vmem:[%s9446_s3 + $0x3c8] sm:$0xff]  ;;  %v5680_v59 = vld [vmem:[%s9446_s3 + $0x3d8] sm:$0xff]  ;;  %v5681_v31 = vld [vmem:[%s9446_s3 + $0x3e0] sm:$0x3] }
 0x2c6   : > { %3357 = vst.msk [vmem:[#allocation3 + $0xd8] sm:$0xff] %vm3330_vm4, %v3328_v19  ;;  %v6210_v44 = vpack.c.bf16 %v5680_v59, %v5678_v52  ;;  %v5682_v41 = vld [vmem:[%s9446_s3 + $0x3e8] sm:$0x3]  ;;  %v5696_v19 = vld [vmem:[%s9446_s3 + $0x3f8] sm:$0xff]  ;;  %v5805_v5 = vld [vmem:[%s9448_s5 + $0xa0] sm:$0xff] }
 0x2c7   : > { %3719 = vmatmul.mubr.f32.gmra.mrb[118].mxu1 %v8213_v8  ;;  %v5702_v14 = vld [vmem:[%s9446_s3 + $0x428] sm:$0xff] }
 0x2c8   : > { %6189 = vmatpush1.bf16.msra.mxu1 %v6188_v47  ;;  %5635 = vmatprep.mubr.msk.f32.mxu1 %vm3330_vm4, %v8286_v25  ;;  %v5698_v47 = vld [vmem:[%s9446_s3 + $0x408] sm:$0xff]  ;;  %v6218_v2 = vpack.c.bf16 %v5702_v14, %v5700_v50 }
 0x2c9   : > { %6191 = vmatprep.subr.bf16.mxu1 %v6190_v0  ;;  %v5695_v0 = vld [vmem:[%s9446_s3 + $0x3f0] sm:$0xff]  ;;  %v5718_v52 = vld [vmem:[%s9446_s3 + $0x4a8] sm:$0xff] }
 0x2ca   : > { %v5726_v50 = vld [vmem:[%s9446_s3 + $0x4e8] sm:$0xff] }
 0x2cb   : > { %3725 = vmatmul.mubr.f32.gmra.mrb[120].mxu1 %v8248_v53 }
 0x2cc   : > { %6193 = vmatpush1.bf16.msra.mxu1 %v6192_v57  ;;  %5636 = vmatprep.mubr.msk.f32.mxu1 %vm3330_vm4, %v8322_v18  ;;  %v6214_v57 = vpack.c.bf16 %v5698_v47, %v5696_v19  ;;  %v5719_v47 = vld [vmem:[%s9446_s3 + $0x4b0] sm:$0xff] }
 0x2cd   : > { %6195 = vmatprep.subr.bf16.mxu1 %v6194_v54  ;;  %v6216_v54 = vpack.c.bf16 %v5697_v30, %v5695_v0  ;;  %v5721_v0 = vld [vmem:[%s9446_s3 + $0x4c0] sm:$0xff]  ;;  %v5724_v30 = vld [vmem:[%s9446_s3 + $0x4d8] sm:$0xff] }
 0x2ce   : > { %v6240_v14 = vpack.c.bf16 %v5721_v0, %v5719_v47  ;;  %v5759_v47 = vld [vmem:[%s9446_s3 + $0x590] sm:$0xff] }
 0x2cf   : > { %3731 = vmatmul.mubr.f32.gmra.mrb[122].mxu1 %v8284_v46 }
 0x2d0   : > { %6197 = vmatpush1.bf16.msra.mxu1 %v6196_v58  ;;  %5637 = vmatprep.mubr.msk.f32.mxu1 %vm3330_vm4, %v8349_v62 }
 0x2d1   : > { %6199 = vmatprep.subr.bf16.mxu1 %v6198_v17  ;;  %v6222_v17 = vpack.c.bf16 %v5706_v35, %v5704_v42  ;;  %v5727_v35 = vld [vmem:[%s9446_s3 + $0x4f0] sm:$0xff] }
 0x2d3   : > { %3737 = vmatmul.mubr.f32.gmra.mrb[124].mxu1 %v8320_v38 }
 0x2d4   : > { %6201 = vmatpush1.bf16.msra.mxu1 %v6200_v56  ;;  %5638 = vmatprep.mubr.msk.f32.mxu1 %vm3330_vm4, %v8366_v16 }
 0x2d5   : > { %6203 = vmatprep.subr.bf16.mxu1 %v6202_v12  ;;  %v5707_v12 = vld [vmem:[%s9446_s3 + $0x450] sm:$0xff] }
 0x2d6   : > { %v6228_v34 = vpack.c.bf16 %v5709_v1, %v5707_v12  ;;  %v5736_v1 = vld [vmem:[%s9446_s3 + $0x538] sm:$0x3] }
 0x2d7   : > { %3743 = vmatmul.mubr.f32.gmra.mrb[126].mxu1 %v8347_v40 }
 0x2d8   : > { %6205 = vmatpush1.bf16.msra.mxu1 %v6204_v27  ;;  %5639 = vmatprep.mubr.msk.f32.mxu1 %vm3330_vm4, %v8377_v43  ;;  %v6230_v27 = vpack.c.bf16 %v5714_v9, %v5712_v6  ;;  %v5750_v6 = vld [vmem:[%s9446_s3 + $0x548] sm:$0xff]  ;;  %v5752_v9 = vld [vmem:[%s9446_s3 + $0x558] sm:$0xff] }
 0x2d9   : > { %6207 = vmatprep.subr.bf16.mxu1 %v6206_v13  ;;  %v5711_v13 = vld [vmem:[%s9446_s3 + $0x470] sm:$0xff] }
 0x2da   : > { %v6232_v59 = vpack.c.bf16 %v5713_v63, %v5711_v13  ;;  %v5754_v13 = vld [vmem:[%s9446_s3 + $0x568] sm:$0xff]  ;;  %v5756_v63 = vld [vmem:[%s9446_s3 + $0x578] sm:$0xff] }
 0x2db   : > { %3749 = vmatmul.mubr.f32.gmra.mrb[128].mxu1 %v8364_v24 }
 0x2dc   : > { %6209 = vmatpush1.bf16.msra.mxu1 %v6208_v49  ;;  %5640 = vmatprep.mubr.msk.f32.mxu1 %vm3330_vm4, %v8388_v23  ;;  %v6234_v49 = vpack.c.bf16 %v5718_v52, %v5716_v11  ;;  %v5735_v11 = vld [vmem:[%s9446_s3 + $0x530] sm:$0x3]  ;;  %v6254_v52 = vpack.c.bf16 %v5752_v9, %v5750_v6  ;;  %v5777_v6 = vld [vmem:[%s9446_s3 + $0x620] sm:$0xff] }
 0x2dd   : > { %6211 = vmatprep.subr.bf16.mxu1 %v6210_v44  ;;  %v5715_v44 = vld [vmem:[%s9446_s3 + $0x490] sm:$0xff] }
 0x2de   : > { %v5779_v9 = vld [vmem:[%s9446_s3 + $0x630] sm:$0xff] }
 0x2df   : > { %3755 = vmatmul.mubr.f32.gmra.mrb[130].mxu1 %v8375_v45 }
 0x2e0   : > { %6213 = vmatpush1.bf16.msra.mxu1 %v6212_v36  ;;  %5685 = vmatprep.mubr.msk.f32.mxu1 %vm3330_vm4, %v8215_v60  ;;  %v5699_v60 = vld [vmem:[%s9446_s3 + $0x410] sm:$0xff]  ;;  %v5722_v36 = vld [vmem:[%s9446_s3 + $0x4c8] sm:$0xff] }
 0x2e1   : > { %5683 = vmatprep.subr.msk.mxu1 %vm3495_vm2, %v5682_v41  ;;  %v6220_v58 = vpack.c.bf16 %v5701_v22, %v5699_v60  ;;  %v6236_v41 = vpack.c.bf16 %v5717_v51, %v5715_v44  ;;  %v6238_v19 = vpack.c.bf16 %v5722_v36, %v5720_v37  ;;  %v5730_v60 = vld [vmem:[%s9446_s3 + $0x508] sm:$0xff]  ;;  %v5755_v44 = vld [vmem:[%s9446_s3 + $0x570] sm:$0xff]  ;;  %v5760_v37 = vld [vmem:[%s9446_s3 + $0x598] sm:$0xff] }
 0x2e2   : > { %v5758_v51 = vld [vmem:[%s9446_s3 + $0x588] sm:$0xff] }
 0x2e4   : > { %5684 = vmatpush1.msk.msra.mxu1 %vm3495_vm2, %v5681_v31  ;;  %v6242_v31 = vpack.c.bf16 %v5726_v50, %v5724_v30  ;;  %v5761_v50 = vld [vmem:[%s9446_s3 + $0x5a0] sm:$0xff] }
 0x2e5   : > { %3925 = vmatmul.mubr.f32.vlgmr.msra.gmra.mrb[112].mxu1 %v8178_v20  ;;  %6215 = vmatprep.subr.bf16.mxu1 %v6214_v57  ;;  %v5708_v20 = vld [vmem:[%s9446_s3 + $0x458] sm:$0xff]  ;;  %v5723_v57 = vld [vmem:[%s9446_s3 + $0x4d0] sm:$0xff] }
 0x2e6   : > { %5686 = vmatprep.mubr.msk.f32.mxu1 %vm3330_vm4, %v8250_v21  ;;  %6217 = vmatpush1.bf16.msra.mxu1 %v6216_v54  ;;  %v6226_v56 = vpack.c.bf16 %v5710_v48, %v5708_v20  ;;  %v5725_v54 = vld [vmem:[%s9446_s3 + $0x4e0] sm:$0xff]  ;;  %v5731_v48 = vld [vmem:[%s9446_s3 + $0x510] sm:$0xff] }
 0x2e7   : > { %6219 = vmatprep.subr.bf16.mxu1 %v6218_v2  ;;  %v5728_v2 = vld [vmem:[%s9446_s3 + $0x4f8] sm:$0xff]  ;;  %v6244_v22 = vpack.c.bf16 %v5725_v54, %v5723_v57  ;;  %v5765_v54 = vld [vmem:[%s9446_s3 + $0x5c0] sm:$0xff] }
 0x2e8   : > { %v6246_v42 = vpack.c.bf16 %v5730_v60, %v5728_v2  ;;  %v5767_v2 = vld [vmem:[%s9446_s3 + $0x5d0] sm:$0xff]  ;;  %v5770_v60 = vld [vmem:[%s9446_s3 + $0x5e8] sm:$0xff] }
 0x2e9   : > { %3931 = vmatmul.mubr.f32.gmra.mrb[114].mxu1 %v8213_v8 }
 0x2ea   : > { %5687 = vmatprep.mubr.msk.f32.mxu1 %vm3330_vm4, %v8286_v25  ;;  %6221 = vmatpush1.bf16.msra.mxu1 %v6220_v58  ;;  %v5729_v58 = vld [vmem:[%s9446_s3 + $0x500] sm:$0xff] }
 0x2eb   : > { %6223 = vmatprep.subr.bf16.mxu1 %v6222_v17  ;;  %v5732_v17 = vld [vmem:[%s9446_s3 + $0x518] sm:$0xff]  ;;  %v6248_v55 = vpack.c.bf16 %v5729_v58, %v5727_v35  ;;  %v5769_v35 = vld [vmem:[%s9446_s3 + $0x5e0] sm:$0xff]  ;;  %v5771_v58 = vld [vmem:[%s9446_s3 + $0x5f0] sm:$0xff] }
 0x2ec   : > { %v6250_v20 = vpack.c.bf16 %v5734_v29, %v5732_v17  ;;  %v5774_v17 = vld [vmem:[%s9446_s3 + $0x608] sm:$0xff]  ;;  %v6276_v29 = vpack.c.bf16 %v5771_v58, %v5769_v35  ;;  %v5816_v35 = vld [vmem:[%s9448_s5 + $0xf8] sm:$0xff] }
 0x2ed   : > { %3937 = vmatmul.mubr.f32.gmra.mrb[116].mxu1 %v8248_v53 }
 0x2ee   : > { %5688 = vmatprep.mubr.msk.f32.mxu1 %vm3330_vm4, %v8322_v18  ;;  %6225 = vmatpush1.bf16.msra.mxu1 %v6224_v61  ;;  %v5733_v61 = vld [vmem:[%s9446_s3 + $0x520] sm:$0xff] }
 0x2ef   : > { %6227 = vmatprep.subr.bf16.mxu1 %v6226_v56  ;;  %v8719_v56 = vld [vmem:[#allocation3 + $0xb8] sm:$0xff]  ;;  %v6252_v12 = vpack.c.bf16 %v5733_v61, %v5731_v48  ;;  %v5775_v48 = vld [vmem:[%s9446_s3 + $0x610] sm:$0xff]  ;;  %v5778_v61 = vld [vmem:[%s9446_s3 + $0x628] sm:$0xff] }
 0x2f1   : > { %3943 = vmatmul.mubr.f32.gmra.mrb[118].mxu1 %v8284_v46 }
 0x2f2   : > { %5689 = vmatprep.mubr.msk.f32.mxu1 %vm3330_vm4, %v8349_v62  ;;  %6229 = vmatpush1.bf16.msra.mxu1 %v6228_v34  ;;  %v5749_v34 = vld [vmem:[%s9446_s3 + $0x540] sm:$0xff] }
 0x2f3   : > { %6231 = vmatprep.subr.bf16.mxu1 %v6230_v27  ;;  %v5751_v27 = vld [vmem:[%s9446_s3 + $0x550] sm:$0xff] }
 0x2f5   : > { %3949 = vmatmul.mubr.f32.gmra.mrb[120].mxu1 %v8320_v38 }
 0x2f6   : > { %5690 = vmatprep.mubr.msk.f32.mxu1 %vm3330_vm4, %v8366_v16  ;;  %6233 = vmatpush1.bf16.msra.mxu1 %v6232_v59  ;;  %v6256_v59 = vpack.c.bf16 %v5751_v27, %v5749_v34  ;;  %v5782_v34 = vld [vmem:[%s9446_s3 + $0x648] sm:$0xff]  ;;  %v5784_v27 = vld [vmem:[%s9446_s3 + $0x658] sm:$0xff] }
 0x2f7   : > { %6235 = vmatprep.subr.bf16.mxu1 %v6234_v49  ;;  %v6258_v49 = vpack.c.bf16 %v5756_v63, %v5754_v13  ;;  %v6284_v13 = vpack.c.bf16 %v5779_v9, %v5777_v6  ;;  %v6286_v63 = vpack.c.bf16 %v5784_v27, %v5782_v34 }
 0x2f9   : > { %3955 = vmatmul.mubr.f32.gmra.mrb[122].mxu1 %v8347_v40 }
 0x2fa   : > { %5691 = vmatprep.mubr.msk.f32.mxu1 %vm3330_vm4, %v8377_v43  ;;  %6237 = vmatpush1.bf16.msra.mxu1 %v6236_v41  ;;  %v6262_v41 = vpack.c.bf16 %v5760_v37, %v5758_v51  ;;  %v5785_v51 = vld [vmem:[%s9446_s3 + $0x660] sm:$0xff]  ;;  %v5787_v37 = vld [vmem:[%s9446_s3 + $0x670] sm:$0xff] }
 0x2fb   : > { %6239 = vmatprep.subr.bf16.mxu1 %v6238_v19  ;;  %v5757_v19 = vld [vmem:[%s9446_s3 + $0x580] sm:$0xff] }
 0x2fc   : > { %v6264_v0 = vpack.c.bf16 %v5759_v47, %v5757_v19  ;;  %v5790_v19 = vld [vmem:[%s9446_s3 + $0x688] sm:$0x3] }
 0x2fd   : > { %3961 = vmatmul.mubr.f32.gmra.mrb[124].mxu1 %v8364_v24  ;;  %v4250_v47 = vld [vmem:[#allocation3 + $0x48] sm:$0xff] }
 0x2fe   : > { %5692 = vmatprep.mubr.msk.f32.mxu1 %vm3330_vm4, %v8388_v23  ;;  %6241 = vmatpush1.bf16.msra.mxu1 %v6240_v14  ;;  %v5763_v14 = vld [vmem:[%s9446_s3 + $0x5b0] sm:$0xff] }
 0x2ff   : > { %6243 = vmatprep.subr.bf16.mxu1 %v6242_v31  ;;  %v5766_v31 = vld [vmem:[%s9446_s3 + $0x5c8] sm:$0xff] }
 0x301   : > { %3967 = vmatmul.mubr.f32.gmra.mrb[126].mxu1 %v8375_v45 }
 0x302   : > { %5693 = vmatprep.mubr.msk.f32.mxu1 %vm3330_vm4, %v8403_v28  ;;  %6245 = vmatpush1.bf16.msra.mxu1 %v6244_v22  ;;  %v6272_v22 = vpack.c.bf16 %v5767_v2, %v5765_v54 }
 0x303   : > { %6247 = vmatprep.subr.bf16.mxu1 %v6246_v42 }
 0x305   : > { %3973 = vmatmul.mubr.f32.gmra.mrb[128].mxu1 %v8386_v39 }
 0x306   : > { %5694 = vmatprep.mubr.msk.f32.mxu1 %vm3330_vm4, %v8719_v56  ;;  %6249 = vmatpush1.bf16.msra.mxu1 %v6248_v55 }
 0x307   : > { %6251 = vmatprep.subr.bf16.mxu1 %v6250_v20  ;;  %v5773_v20 = vld [vmem:[%s9446_s3 + $0x600] sm:$0xff] }
 0x309   : > { %3979 = vmatmul.mubr.f32.gmra.mrb[130].mxu1 %v8401_v32 }
 0x30a   : > { %6253 = vmatpush1.bf16.msra.mxu1 %v6252_v12  ;;  %5739 = vmatprep.mubr.msk.f32.mxu1 %vm3330_vm4, %v8250_v21  ;;  %v5753_v21 = vld [vmem:[%s9446_s3 + $0x560] sm:$0xff]  ;;  %v6280_v12 = vpack.c.bf16 %v5775_v48, %v5773_v20  ;;  %v5820_v20 = vld [vmem:[%s9448_s5 + $0x118] sm:$0xff] }
 0x30b   : > { %5737 = vmatprep.subr.msk.mxu1 %vm3495_vm2, %v5736_v1  ;;  %v6260_v36 = vpack.c.bf16 %v5755_v44, %v5753_v21 }
 0x30e   : > { %5738 = vmatpush1.msk.msra.mxu1 %vm3495_vm2, %v5735_v11  ;;  %v5781_v11 = vld [vmem:[%s9446_s3 + $0x640] sm:$0xff] }
 0x30f   : > { %4169 = vmatmul.mubr.f32.vlgmr.msra.gmra.mrb[112].mxu1 %v8213_v8  ;;  %6255 = vmatprep.subr.bf16.mxu1 %v6254_v52  ;;  %v5762_v8 = vld [vmem:[%s9446_s3 + $0x5a8] sm:$0xff]  ;;  %v5783_v52 = vld [vmem:[%s9446_s3 + $0x650] sm:$0xff] }
 0x310   : > { %5740 = vmatprep.mubr.msk.f32.mxu1 %vm3330_vm4, %v8286_v25  ;;  %6257 = vmatpush1.bf16.msra.mxu1 %v6256_v59  ;;  %v5764_v25 = vld [vmem:[%s9446_s3 + $0x5b8] sm:$0xff]  ;;  %v5786_v59 = vld [vmem:[%s9446_s3 + $0x668] sm:$0xff]  ;;  %v6288_v21 = vpack.c.bf16 %v5783_v52, %v5781_v11  ;;  %v5844_v11 = vld [vmem:[%s9448_s5 + $0x1c0] sm:$0xff] }
 0x311   : > { %6259 = vmatprep.subr.bf16.mxu1 %v6258_v49  ;;  %v6266_v30 = vpack.c.bf16 %v5764_v25, %v5762_v8  ;;  %v5788_v49 = vld [vmem:[%s9446_s3 + $0x678] sm:$0xff]  ;;  %v5789_v8 = vld [vmem:[%s9446_s3 + $0x680] sm:$0x3] }
 0x312   : > { %v6290_v44 = vpack.c.bf16 %v5788_v49, %v5786_v59  ;;  %v4249_v25 = vld [vmem:[#allocation3 + $0x40] sm:$0xff] }
 0x313   : > { %4175 = vmatmul.mubr.f32.gmra.mrb[114].mxu1 %v8248_v53  ;;  %v5768_v53 = vld [vmem:[%s9446_s3 + $0x5d8] sm:$0xff] }
 0x314   : > { %5741 = vmatprep.mubr.msk.f32.mxu1 %vm3330_vm4, %v8322_v18  ;;  %6261 = vmatpush1.bf16.msra.mxu1 %v6260_v36  ;;  %v6268_v18 = vpack.c.bf16 %v5763_v14, %v5761_v50  ;;  %v6270_v57 = vpack.c.bf16 %v5768_v53, %v5766_v31  ;;  %v4024_v36 = vld [vmem:[#allocation3 + $0xc8] sm:$0xff]  ;;  %v4253_v50 = vld [vmem:[#allocation3 + $0x60] sm:$0xff]  ;;  %v4255_v14 = vld [vmem:[#allocation3 + $0x70] sm:$0xff] }
 0x315   : > { %6263 = vmatprep.subr.bf16.mxu1 %v6262_v41  ;;  %v6292_v41 = vpack.c.bf16 %v5787_v37, %v5785_v51  ;;  %v5811_v31 = vld [vmem:[%s9448_s5 + $0xd0] sm:$0xff]  ;;  %v5812_v53 = vld [vmem:[%s9448_s5 + $0xd8] sm:$0xff] }
 0x316   : > { %v6307_v2 = vpack.c.bf16 %v5812_v53, %v5811_v31  ;;  %v5851_v31 = vld [vmem:[%s9448_s5 + $0x1f8] sm:$0xff] }
 0x317   : > { %4181 = vmatmul.mubr.f32.gmra.mrb[116].mxu1 %v8284_v46  ;;  %v5772_v46 = vld [vmem:[%s9446_s3 + $0x5f8] sm:$0xff] }
 0x318   : > { %5742 = vmatprep.mubr.msk.f32.mxu1 %vm3330_vm4, %v8349_v62  ;;  %6265 = vmatpush1.bf16.msra.mxu1 %v6264_v0  ;;  %v6274_v42 = vpack.c.bf16 %v5772_v46, %v5770_v60  ;;  %v4252_v0 = vld [vmem:[#allocation3 + $0x58] sm:$0xff]  ;;  %v5813_v60 = vld [vmem:[%s9448_s5 + $0xe0] sm:$0xff]  ;;  %v5814_v46 = vld [vmem:[%s9448_s5 + $0xe8] sm:$0xff] }
 0x319   : > { %6267 = vmatprep.subr.bf16.mxu1 %v6266_v30  ;;  %v4251_v30 = vld [vmem:[#allocation3 + $0x50] sm:$0xff] }
 0x31b   : > { %4187 = vmatmul.mubr.f32.gmra.mrb[118].mxu1 %v8320_v38  ;;  %v5776_v38 = vld [vmem:[%s9446_s3 + $0x618] sm:$0xff] }
 0x31c   : > { %5743 = vmatprep.mubr.msk.f32.mxu1 %vm3330_vm4, %v8366_v16  ;;  %6269 = vmatpush1.bf16.msra.mxu1 %v6268_v18  ;;  %v6278_v55 = vpack.c.bf16 %v5776_v38, %v5774_v17  ;;  %v5842_v18 = vld [vmem:[%s9448_s5 + $0x1b0] sm:$0xff]  ;;  %v5817_v17 = vld [vmem:[%s9448_s5 + $0x100] sm:$0xff]  ;;  %v5818_v38 = vld [vmem:[%s9448_s5 + $0x108] sm:$0xff] }
 0x31d   : > { %6271 = vmatprep.subr.bf16.mxu1 %v6270_v57  ;;  %v5843_v57 = vld [vmem:[%s9448_s5 + $0x1b8] sm:$0xff] }
 0x31e   : > { %v6376_v54 = vpack.c.bf16 %v5843_v57, %v5842_v18 }
 0x31f   : > { %4193 = vmatmul.mubr.f32.gmra.mrb[120].mxu1 %v8347_v40  ;;  %v5780_v40 = vld [vmem:[%s9446_s3 + $0x638] sm:$0xff] }
 0x320   : > { %5744 = vmatprep.mubr.msk.f32.mxu1 %vm3330_vm4, %v8377_v43  ;;  %6273 = vmatpush1.bf16.msra.mxu1 %v6272_v22  ;;  %v6282_v1 = vpack.c.bf16 %v5780_v40, %v5778_v61  ;;  %v6310_v22 = vpack.c.bf16 %v5814_v46, %v5813_v60  ;;  %v4493_v61 = vld [vmem:[%s9447_s4] sm:$0x3] }
 0x321   : > { %6275 = vmatprep.subr.bf16.mxu1 %v6274_v42  ;;  %v5815_v42 = vld [vmem:[%s9448_s5 + $0xf0] sm:$0xff]  ;;  %v8990_v40 = vrot.slane %v4493_v61, %v3026_v10  ;;  %v5845_v10 = vld [vmem:[%s9448_s5 + $0x1c8] sm:$0xff] }
 0x322   : > { %v6313_v58 = vpack.c.bf16 %v5816_v35, %v5815_v42  ;;  %v5852_v42 = vld [vmem:[%s9448_s5 + $0x200] sm:$0xff]  ;;  %v5853_v35 = vld [vmem:[%s9448_s5 + $0x208] sm:$0xff] }
 0x323   : > { %4199 = vmatmul.mubr.f32.gmra.mrb[122].mxu1 %v8364_v24 }
 0x324   : > { %5745 = vmatprep.mubr.msk.f32.mxu1 %vm3330_vm4, %v8388_v23  ;;  %6277 = vmatpush1.bf16.msra.mxu1 %v6276_v29  ;;  %v6316_v29 = vpack.c.bf16 %v5818_v38, %v5817_v17 }
 0x325   : > { %6279 = vmatprep.subr.bf16.mxu1 %v6278_v55  ;;  %v5819_v55 = vld [vmem:[%s9448_s5 + $0x110] sm:$0xff] }
 0x326   : > { %v6319_v48 = vpack.c.bf16 %v5820_v20, %v5819_v55 }
 0x327   : > { %4205 = vmatmul.mubr.f32.gmra.mrb[124].mxu1 %v8375_v45 }
 0x328   : > { %5746 = vmatprep.mubr.msk.f32.mxu1 %vm3330_vm4, %v8403_v28  ;;  %6281 = vmatpush1.bf16.msra.mxu1 %v6280_v12 }
 0x329   : > { %6283 = vmatprep.subr.bf16.mxu1 %v6282_v1  ;;  %v8994_v1 = vrot.slane %v4493_v61, %v3030_v3  ;;  %v6379_v3 = vpack.c.bf16 %v5845_v10, %v5844_v11 }
 0x32b   : > { %4211 = vmatmul.mubr.f32.gmra.mrb[126].mxu1 %v8386_v39 }
 0x32c   : > { %5747 = vmatprep.mubr.msk.f32.mxu1 %vm3330_vm4, %v8719_v56  ;;  %6285 = vmatpush1.bf16.msra.mxu1 %v6284_v13 }
 0x32d   : > { %6287 = vmatprep.subr.bf16.mxu1 %v6286_v63 }
 0x32f   : > { %4217 = vmatmul.mubr.f32.gmra.mrb[128].mxu1 %v8401_v32 }
 0x330   : > { %5748 = vmatprep.mubr.msk.f32.mxu1 %vm3330_vm4, %v4024_v36  ;;  %6289 = vmatpush1.bf16.msra.mxu1 %v6288_v21 }
 0x331   : > { %6291 = vmatprep.subr.bf16.mxu1 %v6290_v44 }
 0x333   : > { %4223 = vmatmul.mubr.f32.gmra.mrb[130].mxu1 %v8439_v4 }
 0x334   : > { %6293 = vmatpush1.bf16.msra.mxu1 %v6292_v41  ;;  %5793 = vmatprep.mubr.msk.f32.mxu1 %vm3330_vm4, %v4250_v47  ;;  %v5847_v47 = vld [vmem:[%s9448_s5 + $0x1d8] sm:$0xff] }
 0x335   : > { %5791 = vmatprep.subr.msk.mxu1 %vm3495_vm2, %v5790_v19  ;;  %v5846_v19 = vld [vmem:[%s9448_s5 + $0x1d0] sm:$0xff] }
 0x338   : > { %5792 = vmatpush1.msk.msra.mxu1 %vm3495_vm2, %v5789_v8 }
 0x339   : > { %4413 = vmatmul.mubr.f32.vlgmr.msra.gmra.mrb[112].mxu1 %v4249_v25 }
 0x33a   : > { %5794 = vmatprep.mubr.msk.f32.mxu1 %vm3330_vm4, %v4252_v0  ;;  %v6382_v0 = vpack.c.bf16 %v5847_v47, %v5846_v19 }
 0x33d   : > { %4419 = vmatmul.mubr.f32.gmra.mrb[114].mxu1 %v4251_v30 }
 0x33e   : > { %5795 = vmatprep.mubr.msk.f32.mxu1 %vm3330_vm4, %v8349_v62  ;;  %v4268_v62 = vld [vmem:[#allocation3 + $0xd8] sm:$0xff] }
 0x341   : > { %4425 = vmatmul.mubr.f32.gmra.mrb[116].mxu1 %v4253_v50 }
 0x342   : > { %5796 = vmatprep.mubr.msk.f32.mxu1 %vm3330_vm4, %v8366_v16  ;;  %v5803_v16 = vld [vmem:[%s9448_s5 + $0x90] sm:$0xff] }
 0x345   : > { %4431 = vmatmul.mubr.f32.gmra.mrb[118].mxu1 %v4255_v14 }
 0x346   : > { %5797 = vmatprep.mubr.msk.f32.mxu1 %vm3330_vm4, %v8377_v43 }
 0x349   : > { %4437 = vmatmul.mubr.f32.gmra.mrb[120].mxu1 %v8364_v24  ;;  %v6573_v24 = vmov 0.0|0.0  }
 0x34a   : > { %5798 = vmatprep.mubr.msk.f32.mxu1 %vm3330_vm4, %v8388_v23  ;;  %6294 = vmatprep.subr.bf16.mxu0 %v6573_v24 }
 0x34b   : > { %6375 = vmatprep.subr.bf16.mxu1 %v6573_v24 }
 0x34c   : > { %6377 = vmatpush1.bf16.msra.mxu1 %v6376_v54 }
 0x34d   : > { %4443 = vmatmul.mubr.f32.gmra.mrb[122].mxu1 %v8375_v45  ;;  %v5804_v45 = vld [vmem:[%s9448_s5 + $0x98] sm:$0xff]  ;;  %6378 = vmatprep.subr.bf16.mxu1 %v6573_v24 }
 0x34e   : > { %5799 = vmatprep.mubr.msk.f32.mxu1 %vm3330_vm4, %v8403_v28  ;;  %v6295_v43 = vpack.c.bf16 %v5804_v45, %v5803_v16  ;;  %v5808_v28 = vld [vmem:[%s9448_s5 + $0xb8] sm:$0xff]  ;;  %v5848_v45 = vld [vmem:[%s9448_s5 + $0x1e0] sm:$0xff] }
 0x350   : > { %6296 = vmatpush1.bf16.msra.mxu0 %v6295_v43  ;;  %6380 = vmatpush1.bf16.msra.mxu1 %v6379_v3  ;;  %v5849_v43 = vld [vmem:[%s9448_s5 + $0x1e8] sm:$0xff]  ;;  %v5856_v3 = vld [vmem:[%s9448_s5 + $0x220] sm:$0xff] }
 0x351   : > { %4449 = vmatmul.mubr.f32.gmra.mrb[124].mxu1 %v8386_v39  ;;  %6297 = vmatprep.subr.bf16.mxu0 %v6573_v24  ;;  %v5806_v39 = vld [vmem:[%s9448_s5 + $0xa8] sm:$0xff] }
 0x352   : > { %5800 = vmatprep.mubr.msk.f32.mxu1 %vm3330_vm4, %v8719_v56  ;;  %v6298_v23 = vpack.c.bf16 %v5806_v39, %v5805_v5  ;;  %6381 = vmatprep.subr.bf16.mxu1 %v6573_v24 }
 0x354   : > { %6299 = vmatpush1.bf16.msra.mxu0 %v6298_v23  ;;  %6383 = vmatpush1.bf16.msra.mxu1 %v6382_v0 }
 0x355   : > { %4455 = vmatmul.mubr.f32.gmra.mrb[126].mxu1 %v8401_v32  ;;  %6300 = vmatprep.subr.bf16.mxu0 %v6573_v24  ;;  %v5807_v32 = vld [vmem:[%s9448_s5 + $0xb0] sm:$0xff] }
 0x356   : > { %5801 = vmatprep.mubr.msk.f32.mxu1 %vm3330_vm4, %v4024_v36  ;;  %v6301_v26 = vpack.c.bf16 %v5808_v28, %v5807_v32  ;;  %6384 = vmatprep.subr.bf16.mxu1 %v6573_v24  ;;  %v6385_v32 = vpack.c.bf16 %v5849_v43, %v5848_v45 }
 0x358   : > { %6302 = vmatpush1.bf16.msra.mxu0 %v6301_v26  ;;  %6386 = vmatpush1.bf16.msra.mxu1 %v6385_v32 }
 0x359   : > { %4461 = vmatmul.mubr.f32.gmra.mrb[128].mxu1 %v8439_v4  ;;  %v5809_v4 = vld [vmem:[%s9448_s5 + $0xc0] sm:$0xff]  ;;  %6303 = vmatprep.subr.bf16.mxu0 %v6573_v24 }
 0x35a   : > { %5802 = vmatprep.mubr.msk.f32.mxu1 %vm3330_vm4, %v4268_v62  ;;  %6387 = vmatprep.subr.bf16.mxu1 %v6573_v24 }
 0x35d   : > { %4467 = vmatmul.mubr.f32.gmra.mrb[130].mxu1 %v3327_v33  ;;  %v5810_v33 = vld [vmem:[%s9448_s5 + $0xc8] sm:$0xff] }
 0x35e   : > { %v6304_v56 = vpack.c.bf16 %v5810_v33, %v5809_v4 }
 0x360   : > { %6305 = vmatpush1.bf16.msra.mxu0 %v6304_v56  ;;  %v5850_v56 = vld [vmem:[%s9448_s5 + $0x1f0] sm:$0xff] }
 0x361   : > { %6306 = vmatprep.subr.bf16.mxu0 %v6573_v24  ;;  %v6388_v57 = vpack.c.bf16 %v5851_v31, %v5850_v56 }
 0x363   : > { %6389 = vmatpush1.bf16.msra.mxu1 %v6388_v57 }
 0x364   : > { %6308 = vmatpush1.bf16.msra.mxu0 %v6307_v2  ;;  %6390 = vmatprep.subr.bf16.mxu1 %v6573_v24 }
 0x365   : > { %6309 = vmatprep.subr.bf16.mxu0 %v6573_v24 }
 0x368   : > { %6311 = vmatpush1.bf16.msra.mxu0 %v6310_v22 }
 0x369   : > { %6312 = vmatprep.subr.bf16.mxu0 %v6573_v24 }
 0x36c   : > { %6314 = vmatpush1.bf16.msra.mxu0 %v6313_v58 }
 0x36d   : > { %6315 = vmatprep.subr.bf16.mxu0 %v6573_v24 }
 0x370   : > { %6317 = vmatpush1.bf16.msra.mxu0 %v6316_v29  ;;  %v6391_v29 = vpack.c.bf16 %v5853_v35, %v5852_v42  ;;  %v4618_v35 = vld [vmem:[%s9448_s5 + $0x38] sm:$0xff] }
 0x371   : > { %6318 = vmatprep.subr.bf16.mxu0 %v6573_v24 }
 0x372   : > { %6392 = vmatpush1.bf16.msra.mxu1 %v6391_v29  ;;  %v4620_v29 = vld [vmem:[%s9448_s5 + $0x48] sm:$0xff] }
 0x373   : > { %6393 = vmatprep.subr.bf16.mxu1 %v6573_v24 }
 0x374   : > { %6320 = vmatpush1.bf16.msra.mxu0 %v6319_v48 }
 0x375   : > { %6321 = vmatprep.subr.bf16.mxu0 %v6573_v24 }
 0x40c   : > { %v4414_v12 = vpop.f32.mrb[112].mxu1 }
 0x40d   : > { %v4416_v6 = vpop.f32.mrb[113].mxu1  ;;  %v4505_v9 = vadd.f32 %v8990_v40, %v4414_v12  ;;  %v5854_v12 = vld [vmem:[%s9448_s5 + $0x210] sm:$0xff] }
 0x40e   : > { %v4506_v34 = vadd.f32 %v8994_v1, %v4416_v6  ;;  %v5855_v6 = vld [vmem:[%s9448_s5 + $0x218] sm:$0xff] }
 0x40f   : > { %v4525_v52 = vmax.f32 %v4505_v9, 0.0 }
 0x410   : > { %v4420_v27 = vpop.f32.mrb[114].mxu1  ;;  %v4526_v49 = vmax.f32 %v4506_v34, 0.0 }
 0x411   : > { %v4507_v13 = vadd.f32 %v8990_v40, %v4420_v27  ;;  %v4422_v63 = vpop.f32.mrb[115].mxu1  ;;  %v6394_v27 = vpack.c.bf16 %v5855_v6, %v5854_v12 }
 0x412   : > { %v4508_v15 = vadd.f32 %v8994_v1, %v4422_v63 }
 0x413   : > { %v4527_v59 = vmax.f32 %v4507_v13, 0.0  ;;  %6395 = vmatpush1.bf16.msra.mxu1 %v6394_v27 }
 0x414   : > { %v4528_v21 = vmax.f32 %v4508_v15, 0.0  ;;  %v4426_v44 = vpop.f32.mrb[116].mxu1  ;;  %6396 = vmatprep.subr.bf16.mxu1 %v6573_v24 }
 0x415   : > { %v9006_v51 = vmax.f32 %v4525_v52, %v4527_v59  ;;  %v4428_v37 = vpop.f32.mrb[117].mxu1  ;;  %v4509_v41 = vadd.f32 %v8990_v40, %v4426_v44  ;;  %v5857_v52 = vld [vmem:[%s9448_s5 + $0x228] sm:$0xff] }
 0x416   : > { %v9009_v36 = vmax.f32 %v4526_v49, %v4528_v21  ;;  %v4510_v8 = vadd.f32 %v8994_v1, %v4428_v37  ;;  %v6397_v44 = vpack.c.bf16 %v5857_v52, %v5856_v3  ;;  %v4625_v52 = vld [vmem:[%s9448_s5 + $0x70] sm:$0xff] }
 0x417   : > { %v4529_v62 = vmax.f32 %v4509_v41, 0.0 }
 0x418   : > { %v4432_v25 = vpop.f32.mrb[118].mxu1  ;;  %v4530_v5 = vmax.f32 %v4510_v8, 0.0  ;;  %6398 = vmatpush1.bf16.msra.mxu1 %v6397_v44  ;;  %v5858_v8 = vld [vmem:[%s9448_s5 + $0x230] sm:$0xff] }
 0x419   : > { %v4511_v30 = vadd.f32 %v8990_v40, %v4432_v25  ;;  %v4434_v50 = vpop.f32.mrb[119].mxu1  ;;  %6399 = vmatprep.subr.bf16.mxu1 %v6573_v24 }
 0x41a   : > { %v4512_v14 = vadd.f32 %v8994_v1, %v4434_v50 }
 0x41b   : > { %v4531_v16 = vmax.f32 %v4511_v30, 0.0  ;;  %v5859_v30 = vld [vmem:[%s9448_s5 + $0x238] sm:$0xff] }
 0x41c   : > { %v4532_v39 = vmax.f32 %v4512_v14, 0.0  ;;  %v4438_v23 = vpop.f32.mrb[120].mxu1 }
 0x41d   : > { %v9028_v28 = vmax.f32 %v4529_v62, %v4531_v16  ;;  %v4440_v4 = vpop.f32.mrb[121].mxu1  ;;  %v4513_v33 = vadd.f32 %v8990_v40, %v4438_v23  ;;  %v6400_v62 = vpack.c.bf16 %v5859_v30, %v5858_v8  ;;  %v4627_v8 = vld [vmem:[%s9448_s5 + $0x80] sm:$0xff]  ;;  %v5824_v30 = vld [vmem:[%s9448_s5 + $0x128] sm:$0xff] }
 0x41e   : > { %v9030_v26 = vmax.f32 %v4530_v5, %v4532_v39  ;;  %v4514_v53 = vadd.f32 %v8994_v1, %v4440_v4 }
 0x41f   : > { %4569 = vrot.lane.b32.xlu0 %v9028_v28, %s6574_s22  ;;  %v4533_v46 = vmax.f32 %v4513_v33, 0.0  ;;  %6401 = vmatpush1.bf16.msra.mxu1 %v6400_v62 }
 0x420   : > { %v4444_v18 = vpop.f32.mrb[122].mxu1  ;;  %4571 = vrot.lane.b32.xlu1 %v9030_v26, %s6574_s22  ;;  %v4534_v58 = vmax.f32 %v4514_v53, 0.0  ;;  %6429 = vmatprep.subr.bf16.mxu1 %v6573_v24 }
 0x421   : > { %v4515_v54 = vadd.f32 %v8990_v40, %v4444_v18  ;;  %v4446_v2 = vpop.f32.mrb[123].mxu1 }
 0x422   : > { %v4516_v60 = vadd.f32 %v8994_v1, %v4446_v2  ;;  %v4614_v2 = vld [vmem:[%s9448_s5 + $0x18] sm:$0xff] }
 0x423   : > { %v4535_v22 = vmax.f32 %v4515_v54, 0.0  ;;  %4565 = vrot.lane.b32.xlu0 %v9006_v51, %s6574_s22  ;;  %v4613_v54 = vld [vmem:[%s9448_s5 + $0x10] sm:$0xff] }
 0x424   : > { %v4536_v17 = vmax.f32 %v4516_v60, 0.0  ;;  %v4450_v38 = vpop.f32.mrb[124].mxu1  ;;  %4567 = vrot.lane.b32.xlu1 %v9009_v36, %s6574_s22 }
 0x425   : > { %v9058_v55 = vmax.f32 %v4533_v46, %v4535_v22  ;;  %v4452_v20 = vpop.f32.mrb[125].mxu1  ;;  %v4517_v61 = vadd.f32 %v8990_v40, %v4450_v38  ;;  %v6325_v22 = vpack.c.bf16 %v4614_v2, %v4613_v54  ;;  %v4619_v38 = vld [vmem:[%s9448_s5 + $0x40] sm:$0xff]  ;;  %v5836_v2 = vld [vmem:[%s9448_s5 + $0x188] sm:$0xff] }
 0x426   : > { %v9060_v48 = vmax.f32 %v4534_v58, %v4536_v17  ;;  %v4518_v9 = vadd.f32 %v8994_v1, %v4452_v20  ;;  %v6334_v6 = vpack.c.bf16 %v4620_v29, %v4619_v38  ;;  %v5835_v54 = vld [vmem:[%s9448_s5 + $0x180] sm:$0xff] }
 0x427   : > { %4573 = vrot.lane.b32.xlu0 %v9058_v55, %s6574_s22  ;;  %v4537_v10 = vmax.f32 %v4517_v61, 0.0 }
 0x428   : > { %v4456_v34 = vpop.f32.mrb[126].mxu1  ;;  %4575 = vrot.lane.b32.xlu1 %v9060_v48, %s6574_s22  ;;  %v4538_v59 = vmax.f32 %v4518_v9, 0.0  ;;  %v4621_v9 = vld [vmem:[%s9448_s5 + $0x50] sm:$0xff] }
 0x429   : > { %v4519_v13 = vadd.f32 %v8990_v40, %v4456_v34  ;;  %v4458_v63 = vpop.f32.mrb[127].mxu1  ;;  %v4622_v34 = vld [vmem:[%s9448_s5 + $0x58] sm:$0xff] }
 0x42a   : > { %v4520_v11 = vadd.f32 %v8994_v1, %v4458_v63  ;;  %v4623_v63 = vld [vmem:[%s9448_s5 + $0x60] sm:$0xff] }
 0x42b   : > { %v4539_v15 = vmax.f32 %v4519_v13, 0.0  ;;  %v6337_v13 = vpack.c.bf16 %v4622_v34, %v4621_v9  ;;  %v5866_v9 = vld [vmem:[%s9448_s5 + $0x268] sm:$0xff] }
 0x42c   : > { %v4540_v49 = vmax.f32 %v4520_v11, 0.0  ;;  %v4462_v21 = vpop.f32.mrb[128].mxu1  ;;  %v4624_v11 = vld [vmem:[%s9448_s5 + $0x68] sm:$0xff] }
 0x42d   : > { %v9084_v37 = vmax.f32 %v4537_v10, %v4539_v15  ;;  %v4464_v41 = vpop.f32.mrb[129].mxu1  ;;  %v4521_v47 = vadd.f32 %v8990_v40, %v4462_v21  ;;  %v6340_v15 = vpack.c.bf16 %v4624_v11, %v4623_v63  ;;  %v5869_v63 = vld [vmem:[%s9448_s5 + $0x280] sm:$0xff]  ;;  %v5870_v11 = vld [vmem:[%s9448_s5 + $0x288] sm:$0xff] }
 0x42e   : > { %v9086_v19 = vmax.f32 %v4538_v59, %v4540_v49  ;;  %v4522_v25 = vadd.f32 %v8994_v1, %v4464_v41  ;;  %v4626_v59 = vld [vmem:[%s9448_s5 + $0x78] sm:$0xff] }
 0x42f   : > { %v4541_v45 = vmax.f32 %v4521_v47, 0.0 }
 0x430   : > { %4579 = vrot.lane.b32.xlu1 %v9086_v19, %s6574_s22  ;;  %v4468_v0 = vpop.f32.mrb[130].mxu1  ;;  %v4542_v5 = vmax.f32 %v4522_v25, 0.0  ;;  %v4628_v25 = vld [vmem:[%s9448_s5 + $0x88] sm:$0xff] }
 0x431   : > { %v4523_v50 = vadd.f32 %v8990_v40, %v4468_v0  ;;  %v4470_v14 = vpop.f32.mrb[131].mxu1  ;;  %v4611_v40 = vld [vmem:[%s9448_s5] sm:$0xff] }
 0x432   : > { %v4524_v16 = vadd.f32 %v8994_v1, %v4470_v14  ;;  %v4612_v1 = vld [vmem:[%s9448_s5 + $0x8] sm:$0xff]  ;;  %v5823_v0 = vld [vmem:[%s9448_s5 + $0x120] sm:$0xff] }
 0x433   : > { %v4543_v43 = vmax.f32 %v4523_v50, 0.0  ;;  %v6322_v18 = vpack.c.bf16 %v4612_v1, %v4611_v40  ;;  %v6349_v14 = vpack.c.bf16 %v5824_v30, %v5823_v0  ;;  %v5830_v40 = vld [vmem:[%s9448_s5 + $0x158] sm:$0xff]  ;;  %v5083_v30 = vld [vmem:[%s9450_s7] sm:$0xff] }
 0x434   : > { %v4544_v39 = vmax.f32 %v4524_v16, 0.0  ;;  %v5825_v16 = vld [vmem:[%s9448_s5 + $0x130] sm:$0xff] }
 0x435   : > { %v9102_v23 = vmax.f32 %v4541_v45, %v4543_v43  ;;  %v5826_v45 = vld [vmem:[%s9448_s5 + $0x138] sm:$0xff] }
 0x436   : > { %v9104_v32 = vmax.f32 %v4542_v5, %v4544_v39  ;;  %v6352_v5 = vpack.c.bf16 %v5826_v45, %v5825_v16  ;;  %v5828_v39 = vld [vmem:[%s9448_s5 + $0x148] sm:$0xff]  ;;  %v5087_v16 = vld [vmem:[%s9450_s7 + $0x20] sm:$0xff] }
 0x437   : > { %v6558_v4 = vpack.i.bf16 %v9102_v23, %v9084_v37  ;;  %v5088_v45 = vld [vmem:[%s9450_s7 + $0x28] sm:$0xff] }
 0x439   : > { %6559 = vrot.lane.b32.xlu0 %v6558_v4, %s6574_s22 }
 0x43d   : > { %4583 = vrot.lane.b32.xlu0 %v9104_v32, %s6574_s22 }
 0x491   : > { %v4570_v33 = vpop.permute.xlu0 %4569 }
 0x492   : > { %v4572_v56 = vpop.permute.xlu1 %4571 }
 0x493   : > { %v4587_v31 = vsel %vm4585_vm5, %v4570_v33, %v4572_v56  ;;  %v4604_v53 = vmax.f32 %v9030_v26, %v4572_v56  ;;  %v4616_v26 = vld [vmem:[%s9448_s5 + $0x28] sm:$0xff]  ;;  %v5831_v33 = vld [vmem:[%s9448_s5 + $0x160] sm:$0xff] }
 0x494   : > { %v4603_v57 = vmax.f32 %v9028_v28, %v4587_v31  ;;  %v4615_v28 = vld [vmem:[%s9448_s5 + $0x20] sm:$0xff]  ;;  %v5832_v56 = vld [vmem:[%s9448_s5 + $0x168] sm:$0xff] }
 0x495   : > { %5821 = vmatprep.mubr.msk.f32.mxu0 %vm4648_vm6, %v4604_v53  ;;  %v6328_v42 = vpack.c.bf16 %v4616_v26, %v4615_v28  ;;  %v4566_v20 = vpop.permute.xlu0 %4565  ;;  %v6361_v31 = vpack.c.bf16 %v5832_v56, %v5831_v33  ;;  %v5833_v53 = vld [vmem:[%s9448_s5 + $0x170] sm:$0xff]  ;;  %v5839_v26 = vld [vmem:[%s9448_s5 + $0x1a0] sm:$0xff]  ;;  %v5094_v33 = vld [vmem:[%s9450_s7 + $0x58] sm:$0xff] }
 0x496   : > { %4717 = vmatmul.mubr.f32.vlgmr.msra.gmra.mrb[168].mxu0 %v4603_v57  ;;  %v4568_v60 = vpop.permute.xlu1 %4567 }
 0x497   : > { %6323 = vmatpush1.bf16.msra.mxu0 %v6322_v18  ;;  %v4602_v46 = vmax.f32 %v9009_v36, %v4568_v60  ;;  %v4617_v36 = vld [vmem:[%s9448_s5 + $0x30] sm:$0xff]  ;;  %v4586_v50 = vsel %vm4585_vm5, %v4566_v20, %v4568_v60  ;;  %v5834_v18 = vld [vmem:[%s9448_s5 + $0x178] sm:$0xff]  ;;  %v6367_v60 = vpack.c.bf16 %v5836_v2, %v5835_v54  ;;  %v5180_v54 = vld [vmem:[%s9452_s9] sm:$0xff] }
 0x498   : > { %6324 = vmatprep.subr.bf16.mxu0 %v6573_v24  ;;  %v6331_v17 = vpack.c.bf16 %v4618_v35, %v4617_v36  ;;  %v4601_v62 = vmax.f32 %v9006_v51, %v4586_v50  ;;  %v5827_v51 = vld [vmem:[%s9448_s5 + $0x140] sm:$0xff]  ;;  %v6364_v57 = vpack.c.bf16 %v5834_v18, %v5833_v53  ;;  %v5084_v50 = vld [vmem:[%s9450_s7 + $0x8] sm:$0xff] }
 0x499   : > { %5822 = vmatprep.mubr.msk.f32.mxu0 %vm4648_vm6, %v4602_v46  ;;  %v9161_v27 = vpop.permute.xlu0 %4573  ;;  %v6355_v4 = vpack.c.bf16 %v5828_v39, %v5827_v51  ;;  %v5837_v46 = vld [vmem:[%s9448_s5 + $0x190] sm:$0xff]  ;;  %v5861_v35 = vld [vmem:[%s9448_s5 + $0x240] sm:$0xff]  ;;  %v5090_v51 = vld [vmem:[%s9450_s7 + $0x38] sm:$0xff] }
 0x49a   : > { %v9143_v58 = vpop.permute.xlu1 %4575  ;;  %v5096_v53 = vld [vmem:[%s9450_s7 + $0x68] sm:$0xff] }
 0x49b   : > { %6326 = vmatpush1.bf16.msra.mxu0 %v6325_v22  ;;  %v4606_v43 = vmax.f32 %v9060_v48, %v9143_v58  ;;  %v5829_v48 = vld [vmem:[%s9448_s5 + $0x150] sm:$0xff]  ;;  %v5838_v22 = vld [vmem:[%s9448_s5 + $0x198] sm:$0xff]  ;;  %v4588_v38 = vsel %vm4585_vm5, %v9161_v27, %v9143_v58  ;;  %v5181_v2 = vld [vmem:[%s9452_s9 + $0x8] sm:$0xff] }
 0x49c   : > { %6327 = vmatprep.subr.bf16.mxu0 %v6573_v24  ;;  %v6358_v1 = vpack.c.bf16 %v5830_v40, %v5829_v48  ;;  %v6370_v28 = vpack.c.bf16 %v5838_v22, %v5837_v46  ;;  %v4605_v20 = vmax.f32 %v9058_v55, %v4588_v38  ;;  %v5865_v55 = vld [vmem:[%s9448_s5 + $0x260] sm:$0xff]  ;;  %v5868_v27 = vld [vmem:[%s9448_s5 + $0x278] sm:$0xff]  ;;  %v5092_v48 = vld [vmem:[%s9450_s7 + $0x48] sm:$0xff]  ;;  %v6451_v46 = vpack.c.bf16 %v5181_v2, %v5180_v54 }
 0x49d   : > { %v6409_v34 = vpack.c.bf16 %v5866_v9, %v5865_v55  ;;  %v5183_v22 = vld [vmem:[%s9452_s9 + $0x18] sm:$0xff] }
 0x49f   : > { %6329 = vmatpush1.bf16.msra.mxu0 %v6328_v42  ;;  %v5840_v42 = vld [vmem:[%s9448_s5 + $0x1a8] sm:$0xff] }
 0x4a0   : > { %6330 = vmatprep.subr.bf16.mxu0 %v6573_v24  ;;  %v6373_v36 = vpack.c.bf16 %v5840_v42, %v5839_v26  ;;  %v5184_v26 = vld [vmem:[%s9452_s9 + $0x20] sm:$0xff]  ;;  %v5185_v42 = vld [vmem:[%s9452_s9 + $0x28] sm:$0xff] }
 0x4a2   : > { %v4580_v61 = vpop.permute.xlu1 %4579 }
 0x4a3   : > { %6332 = vmatpush1.bf16.msra.mxu0 %v6331_v17  ;;  %v4608_v12 = vmax.f32 %v9086_v19, %v4580_v61  ;;  %v6343_v19 = vpack.c.bf16 %v4626_v59, %v4625_v52  ;;  %v5862_v17 = vld [vmem:[%s9448_s5 + $0x248] sm:$0xff]  ;;  %v5873_v59 = vld [vmem:[%s9448_s5 + $0x2a0] sm:$0xff] }
 0x4a4   : > { %6333 = vmatprep.subr.bf16.mxu0 %v6573_v24  ;;  %v6403_v29 = vpack.c.bf16 %v5862_v17, %v5861_v35  ;;  %v5186_v35 = vld [vmem:[%s9452_s9 + $0x30] sm:$0xff]  ;;  %v5187_v17 = vld [vmem:[%s9452_s9 + $0x38] sm:$0xff] }
 0x4a5   : > { %5860 = vmatprep.mubr.msk.f32.mxu1 %vm4648_vm6, %v4608_v12  ;;  %v5864_v12 = vld [vmem:[%s9448_s5 + $0x258] sm:$0xff]  ;;  %v6460_v38 = vpack.c.bf16 %v5187_v17, %v5186_v35 }
 0x4a7   : > { %6335 = vmatpush1.bf16.msra.mxu0 %v6334_v6 }
 0x4a8   : > { %6336 = vmatprep.subr.bf16.mxu0 %v6573_v24 }
 0x4ab   : > { %6338 = vmatpush1.bf16.msra.mxu0 %v6337_v13  ;;  %v6560_v10 = vpop.permute.xlu0 %6559 }
 0x4ac   : > { %v6561_v3 = vunpack.i.l.bf16 %v6560_v10  ;;  %6339 = vmatprep.subr.bf16.mxu0 %v6573_v24  ;;  %v6562_v49 = vunpack.i.h.bf16 %v6560_v10  ;;  %v6415_v10 = vpack.c.bf16 %v5870_v11, %v5869_v63  ;;  %v5880_v63 = vld [vmem:[%s9449_s6] ss:$0 sm:$0xff] }
 0x4ae   : > { %v4589_v21 = vsel %vm4585_vm5, %v6561_v3, %v4580_v61  ;;  %v5863_v61 = vld [vmem:[%s9448_s5 + $0x250] sm:$0xff]  ;;  %v5872_v3 = vld [vmem:[%s9448_s5 + $0x298] sm:$0xff] }
 0x4af   : > { %v4607_v44 = vmax.f32 %v9084_v37, %v4589_v21  ;;  %6341 = vmatpush1.bf16.msra.mxu0 %v6340_v15  ;;  %v9179_v41 = vpop.permute.xlu0 %4583  ;;  %v6346_v37 = vpack.c.bf16 %v4628_v25, %v4627_v8  ;;  %v6406_v58 = vpack.c.bf16 %v5864_v12, %v5863_v61  ;;  %v5871_v15 = vld [vmem:[%s9448_s5 + $0x290] sm:$0xff]  ;;  %v5877_v8 = vld [vmem:[%s9448_s5 + $0x2c0] sm:$0xff]  ;;  %v5878_v25 = vld [vmem:[%s9448_s5 + $0x2c8] sm:$0xff] }
 0x4b0   : > { %v9183_v47 = vsel %vm4585_vm5, %v6562_v49, %v9179_v41  ;;  %6342 = vmatprep.subr.bf16.mxu0 %v6573_v24  ;;  %v4610_v6 = vmax.f32 %v9104_v32, %v9179_v41  ;;  %v5867_v32 = vld [vmem:[%s9448_s5 + $0x270] sm:$0xff]  ;;  %v6418_v52 = vpack.c.bf16 %v5872_v3, %v5871_v15  ;;  %v5874_v49 = vld [vmem:[%s9448_s5 + $0x2a8] sm:$0xff]  ;;  %v5876_v41 = vld [vmem:[%s9448_s5 + $0x2b8] sm:$0xff] }
 0x4b1   : > { %4975 = vmatmul.mubr.f32.vlgmr.msra.gmra.mrb[132].mxu1 %v4607_v44  ;;  %v6412_v13 = vpack.c.bf16 %v5868_v27, %v5867_v32  ;;  %v6421_v21 = vpack.c.bf16 %v5874_v49, %v5873_v59  ;;  %v5875_v44 = vld [vmem:[%s9448_s5 + $0x2b0] sm:$0xff]  ;;  %v4609_v0 = vmax.f32 %v9102_v23, %v9183_v47  ;;  %v5086_v23 = vld [vmem:[%s9450_s7 + $0x18] sm:$0xff] }
 0x4b2   : > { %5946 = vmatprep.mubr.msk.f32.mxu1 %vm6575_vm7, %v6571_v7  ;;  %v5190_v49 = vld [vmem:[%s9452_s9 + $0x50] sm:$0xf] }
 0x4b3   : > { %6344 = vmatpush1.bf16.msra.mxu0 %v6343_v19  ;;  %v6424_v19 = vpack.c.bf16 %v5876_v41, %v5875_v44 }
 0x4b4   : > { %6345 = vmatprep.subr.bf16.mxu0 %v6573_v24 }
 0x4b7   : > { %6347 = vmatpush1.bf16.msra.mxu0 %v6346_v37  ;;  %v6427_v37 = vpack.c.bf16 %v5878_v25, %v5877_v8 }
 0x4b8   : > { %6348 = vmatprep.subr.bf16.mxu0 %v6573_v24 }
 0x4ba   : > { %4790 = vmatmul.mubr.f32.vlgmr.msra.gmra.mrb[170].mxu0 %v4601_v62  ;;  %v6430_v62 = vpack.c.bf16 %v5084_v50, %v5083_v30 }
 0x4bb   : > { %6350 = vmatpush1.bf16.msra.mxu0 %v6349_v14  ;;  %5841 = vmatprep.mubr.msk.f32.mxu0 %vm4648_vm6, %v4606_v43  ;;  %v5085_v14 = vld [vmem:[%s9450_s7 + $0x10] sm:$0xff]  ;;  %v6436_v43 = vpack.c.bf16 %v5088_v45, %v5087_v16 }
 0x4bc   : > { %6351 = vmatprep.subr.bf16.mxu0 %v6573_v24  ;;  %6431 = vmatpush3.bf16.msra.mxu1 %v6430_v62  ;;  %v6433_v47 = vpack.c.bf16 %v5086_v23, %v5085_v14 }
 0x4bd   : > { %6432 = vmatprep.subr.bf16.mxu1 %v6573_v24 }
 0x4bf   : > { %6353 = vmatpush1.bf16.msra.mxu0 %v6352_v5  ;;  %v5089_v5 = vld [vmem:[%s9450_s7 + $0x30] sm:$0xff] }
 0x4c0   : > { %6354 = vmatprep.subr.bf16.mxu0 %v6573_v24  ;;  %6434 = vmatpush3.bf16.msra.mxu1 %v6433_v47  ;;  %v6439_v39 = vpack.c.bf16 %v5090_v51, %v5089_v5 }
 0x4c1   : > { %6435 = vmatprep.subr.bf16.mxu1 %v6573_v24 }
 0x4c3   : > { %6356 = vmatpush1.bf16.msra.mxu0 %v6355_v4  ;;  %v5091_v4 = vld [vmem:[%s9450_s7 + $0x40] sm:$0xff] }
 0x4c4   : > { %6357 = vmatprep.subr.bf16.mxu0 %v6573_v24  ;;  %6437 = vmatpush3.bf16.msra.mxu1 %v6436_v43  ;;  %v6442_v40 = vpack.c.bf16 %v5092_v48, %v5091_v4 }
 0x4c5   : > { %6438 = vmatprep.subr.bf16.mxu1 %v6573_v24 }
 0x4c7   : > { %6359 = vmatpush1.bf16.msra.mxu0 %v6358_v1  ;;  %v5093_v1 = vld [vmem:[%s9450_s7 + $0x50] sm:$0xff] }
 0x4c8   : > { %6360 = vmatprep.subr.bf16.mxu0 %v6573_v24  ;;  %6440 = vmatpush3.bf16.msra.mxu1 %v6439_v39  ;;  %v6445_v56 = vpack.c.bf16 %v5094_v33, %v5093_v1 }
 0x4c9   : > { %6441 = vmatprep.subr.bf16.mxu1 %v6573_v24 }
 0x4cb   : > { %6362 = vmatpush1.bf16.msra.mxu0 %v6361_v31  ;;  %v5095_v31 = vld [vmem:[%s9450_s7 + $0x60] sm:$0xff] }
 0x4cc   : > { %6363 = vmatprep.subr.bf16.mxu0 %v6573_v24  ;;  %6443 = vmatpush3.bf16.msra.mxu1 %v6442_v40  ;;  %v6448_v18 = vpack.c.bf16 %v5096_v53, %v5095_v31 }
 0x4cd   : > { %6444 = vmatprep.subr.bf16.mxu1 %v6573_v24 }
 0x4cf   : > { %6365 = vmatpush1.bf16.msra.mxu0 %v6364_v57  ;;  %v5097_v57 = vld [vmem:[%s9450_s7 + $0x70] sm:$0xff] }
 0x4d0   : > { %6366 = vmatprep.subr.bf16.mxu0 %v6573_v24  ;;  %6446 = vmatpush3.bf16.msra.mxu1 %v6445_v56 }
 0x4d1   : > { %6447 = vmatprep.subr.bf16.mxu1 %v6573_v24 }
 0x4d3   : > { %6368 = vmatpush1.bf16.msra.mxu0 %v6367_v60  ;;  %v5182_v60 = vld [vmem:[%s9452_s9 + $0x10] sm:$0xff] }
 0x4d4   : > { %6369 = vmatprep.subr.bf16.mxu0 %v6573_v24  ;;  %6449 = vmatpush3.bf16.msra.mxu1 %v6448_v18 }
 0x4d5   : > { %5944 = vmatprep.subr.mxu1 %v6571_v7 }
 0x4d7   : > { %6371 = vmatpush1.bf16.msra.mxu0 %v6370_v28  ;;  %v6454_v28 = vpack.c.bf16 %v5183_v22, %v5182_v60 }
 0x4d8   : > { %6372 = vmatprep.subr.bf16.mxu0 %v6573_v24  ;;  %5945 = vmatpush3.msra.mxu1 %v5097_v57 }
 0x4db   : > { %6374 = vmatpush1.bf16.msra.mxu0 %v6373_v36  ;;  %v6457_v36 = vpack.c.bf16 %v5185_v42, %v5184_v26 }
 0x4dc   : > { %6402 = vmatprep.subr.bf16.mxu0 %v6573_v24 }
 0x4de   : > { %4882 = vmatmul.mubr.f32.vlgmr.msra.gmra.mrb[172].mxu0 %v4605_v20 }
 0x4df   : > { %6404 = vmatpush1.bf16.msra.mxu0 %v6403_v29  ;;  %5879 = vmatprep.mubr.msk.f32.mxu0 %vm4648_vm6, %v4610_v6 }
 0x4e0   : > { %6405 = vmatprep.subr.bf16.mxu0 %v6573_v24 }
 0x4e3   : > { %6407 = vmatpush1.bf16.msra.mxu0 %v6406_v58 }
 0x4e4   : > { %6408 = vmatprep.subr.bf16.mxu0 %v6573_v24 }
 0x4e7   : > { %6410 = vmatpush1.bf16.msra.mxu0 %v6409_v34 }
 0x4e8   : > { %6411 = vmatprep.subr.bf16.mxu0 %v6573_v24 }
 0x4eb   : > { %6413 = vmatpush1.bf16.msra.mxu0 %v6412_v13 }
 0x4ec   : > { %6414 = vmatprep.subr.bf16.mxu0 %v6573_v24 }
 0x4ef   : > { %6416 = vmatpush1.bf16.msra.mxu0 %v6415_v10 }
 0x4f0   : > { %6417 = vmatprep.subr.bf16.mxu0 %v6573_v24 }
 0x4f3   : > { %6419 = vmatpush1.bf16.msra.mxu0 %v6418_v52  ;;  %v5189_v52 = vld [vmem:[%s9452_s9 + $0x48] sm:$0xff] }
 0x4f4   : > { %6420 = vmatprep.subr.bf16.mxu0 %v6573_v24 }
 0x4f7   : > { %6422 = vmatpush1.bf16.msra.mxu0 %v6421_v21  ;;  %v5881_v21 = vld [vmem:[%s9451_s8] ss:$0 sm:$0xff] }
 0x4f8   : > { %6423 = vmatprep.subr.bf16.mxu0 %v6573_v24 }
 0x4fb   : > { %6425 = vmatpush1.bf16.msra.mxu0 %v6424_v19 }
 0x4fc   : > { %6426 = vmatprep.subr.bf16.mxu0 %v6573_v24 }
 0x4ff   : > { %6428 = vmatpush1.bf16.msra.mxu0 %v6427_v37 }
 0x500   : > { %6450 = vmatprep.subr.bf16.mxu0 %v6573_v24 }
 0x502   : > { %5068 = vmatmul.mubr.f32.vlgmr.msra.gmra.mrb[174].mxu0 %v4609_v0 }
 0x503   : > { %5971 = vmatprep.mubr.msk.f32.mxu0 %vm6575_vm7, %v6571_v7  ;;  %6452 = vmatpush3.bf16.msra.mxu0 %v6451_v46 }
 0x504   : > { %6453 = vmatprep.subr.bf16.mxu0 %v6573_v24 }
 0x507   : > { %6455 = vmatpush3.bf16.msra.mxu0 %v6454_v28 }
 0x508   : > { %6456 = vmatprep.subr.bf16.mxu0 %v6573_v24 }
 0x50b   : > { %6458 = vmatpush3.bf16.msra.mxu0 %v6457_v36 }
 0x50c   : > { %6459 = vmatprep.subr.bf16.mxu0 %v6573_v24 }
 0x50f   : > { %6461 = vmatpush3.bf16.msra.mxu0 %v6460_v38 }
 0x510   : > { %6462 = vmatprep.subr.bf16.mxu0 %v6573_v24  ;;  %v5188_v24 = vld [vmem:[%s9452_s9 + $0x40] sm:$0xff] }
 0x511   : > { %v6463_v59 = vpack.c.bf16 %v5189_v52, %v5188_v24 }
 0x513   : > { %6464 = vmatpush3.bf16.msra.mxu0 %v6463_v59 }
 0x514   : > { %5969 = vmatprep.subr.mxu0 %v6571_v7  ;;  %v5883_v7 = vld [vmem:[%s9453_s10] ss:$0 sm:$0xff] }
 0x517   : > { %5970 = vmatpush3.msk.msra.mxu0 %vm5202_vm9, %v5190_v49 }
 0x569   : > { %v4718_v29 = vpop.f32.mrb[168].mxu0 }
 0x56a   : > { %v4720_v20 = vpop.f32.mrb[169].mxu0 }
 0x584   : > { %v4976_v61 = vpop.f32.mrb[132].mxu1 }
 0x585   : > { %v4978_v12 = vpop.f32.mrb[133].mxu1 }
 0x58d   : > { %v4791_v6 = vpop.f32.mrb[170].mxu0 }
 0x58e   : > { %v4792_v58 = vadd.f32 %v4791_v6, %v4718_v29  ;;  %v4793_v55 = vpop.f32.mrb[171].mxu0 }
 0x5b1   : > { %v4883_v9 = vpop.f32.mrb[172].mxu0 }
 0x5b2   : > { %v4887_v34 = vadd.f32 %v4883_v9, %v4792_v58  ;;  %v4885_v32 = vpop.f32.mrb[173].mxu0 }
 0x5b4   : > { %v4980_v27 = vadd.f32 %v4976_v61, %v4887_v34 }
 0x5d5   : > { %v5069_v13 = vpop.f32.mrb[174].mxu0 }
 0x5d6   : > { %v5073_v11 = vadd.f32 %v5069_v13, %v4980_v27  ;;  %v5071_v10 = vpop.f32.mrb[175].mxu0 }
 0x5d8   : > { %v5081_v15 = vadd.f32 %v5880_v63, %v5073_v11 }
 0x5da   : > { %v5082_v3 = vmax.f32 %v5081_v15, 0.0 }
 0x5dc   : > { %5947 = vmatmul.mubr.msk.f32.vlgmr.msra.gmra.mrb[134].mxu1 %vm5105_vm8, %v5082_v3 }
 0x6af   : > { %v5175_v44 = vpop.f32.mrb[134].mxu1 }
 0x6b0   : > { %v5176_v41 = vadd.f32 %v5881_v21, %v5175_v44  ;;  %v5948_v19 = vpop.f32.mrb[135].mxu1 }
 0x6b2   : > { %v5179_v8 = vmax.f32 %v5176_v41, 0.0 }
 0x6b4   : > { %5972 = vmatmul.mubr.msk.f32.vlgmr.msra.gmra.mrb[176].mxu0 %vm5198_vm10, %v5179_v8 }
 0x787   : > { %v5272_v25 = vpop.f32.mrb[176].mxu0 }
 0x788   : > { %v5273_v37 = vadd.f32 %v5883_v7, %v5272_v25  ;;  %v5973_v0 = vpop.f32.mrb[177].mxu0 }
 0x78a   : > { %5277 = vst.msk [vmem:[%s386_s26] sm:$0xff] %vm5276_vm11, %v5273_v37 }
 0x78b PF: > { %s21_s17 = sadd.s32 1, %s6569_s17  }
 0x78c   : > { %p18_p5 = scmp.ge.s32.totalorder %s21_s17, 4  }
 0x78e   :  { %20 = sbr.rel (!%p18_p5) target bundleno = 1 (0x1), region = 106 }

</bundles_post_ra>
